<compile_context>
chip_gen: v7x
topology: tpu7x:2x2x1
jax: 0.10.0
libtpu: 0.0.40
codegen_flags: <defaults>
</compile_context>

<pallas_src>
import jax
import jax.numpy as jnp
from jax.experimental import pallas as pl
from jax.experimental.pallas import tpu as pltpu


# ----------------------------- config ---------------------------------------
class CFG:
    n_mels = 8
    d_hidden = 32
    pre_kernel_size = 7
    post_kernel_size = 7
    relu_slope = 0.1
    kernels_upsample = [4, 4]                 # stride 2, 2 -> total x4 upsample
    kernels_resblocks = [3, 5]
    dilations_resblocks = [[[1, 1], [3, 1]],  # resblock 0 (kernel 3)
                           [[1, 1], [3, 1]]]  # resblock 1 (kernel 5)


# ----------------------------- static layout plan ----------------------------
def build_plan(cfg):
    """Ordered layer descriptors with static slab row / bias-column offsets."""
    plan = []
    row = 0
    bcol = 0

    def add(kind, cout, cin, K, dil, rows_used):
        nonlocal row, bcol
        plan.append(dict(kind=kind, cout=cout, cin=cin, K=K, dil=dil,
                         row=row, bcol=bcol))
        row += -(-rows_used // 8) * 8          # keep every entry sublane aligned
        bcol += 1

    add('conv', cfg.d_hidden, cfg.n_mels, cfg.pre_kernel_size, 1, cfg.d_hidden)
    for i, _K_up in enumerate(cfg.kernels_upsample):
        cin = cfg.d_hidden // (2 ** i)
        cout = cin // 2
        # fused even/odd polyphase weights -> 2*cout rows, 3-tap stack
        add('up', cout, cin, 3, 1, 2 * cout)
        for r, Kr in enumerate(cfg.kernels_resblocks):
            for d_outer in cfg.dilations_resblocks[r]:
                for d in d_outer:
                    add('conv', cout, cout, Kr, d, cout)
    c_last = cfg.d_hidden // (2 ** len(cfg.kernels_upsample))
    add('conv', 1, c_last, cfg.post_kernel_size, 1, 1)
    n_rows = -(-row // 8) * 8
    return plan, n_rows, bcol


def _walk_params(params):
    items = [('conv', params['pre_w'], params['pre_b'])]
    for blk in params['blocks']:
        items.append(('up', blk['up_w'], blk['up_b']))
        for res_r in blk['res']:
            for inner_list in res_r:
                for (w, b) in inner_list:
                    items.append(('conv', w, b))
    items.append(('conv', params['post_w'], params['post_b']))
    return items


def pack_params(params, cfg):
    """Pack all weights/biases into two (8,128)-aligned VMEM slabs."""
    plan, n_rows, n_bias = build_plan(cfg)
    wcols = max(e['K'] * e['cin'] for e in plan)
    wcols = -(-wcols // 128) * 128
    brows = -(-max(e['cout'] for e in plan) // 8) * 8
    bcols = -(-n_bias // 128) * 128
    assert n_bias <= bcols

    w_slab = jnp.zeros((n_rows, wcols), jnp.float32)
    b_slab = jnp.zeros((brows, bcols), jnp.float32)

    items = _walk_params(params)
    assert len(items) == len(plan)
    for ent, (kind, w, b) in zip(plan, items):
        assert kind == ent['kind']
        cout, cin, K = ent['cout'], ent['cin'], ent['K']
        if kind == 'conv':
            # torch Conv1d weight [Cout, Cin, K] -> [Cout, K*Cin] (tap-major)
            wk = jnp.transpose(w, (0, 2, 1)).reshape(cout, K * cin)
            rows = cout
        else:
            # torch ConvTranspose1d weight [Cin, Cout, 4] -> fused polyphase
            # rows [0:Cout]      (even phase): [W3^T | W1^T |  0  ]
            # rows [Cout:2Cout]  (odd  phase): [  0  | W2^T | W0^T]
            z = jnp.zeros((cout, cin), jnp.float32)
            w_even = jnp.concatenate([w[:, :, 3].T, w[:, :, 1].T, z], axis=1)
            w_odd = jnp.concatenate([z, w[:, :, 2].T, w[:, :, 0].T], axis=1)
            wk = jnp.concatenate([w_even, w_odd], axis=0)
            rows = 2 * cout
        wk = wk.astype(jnp.float32)
        w_slab = w_slab.at[ent['row']:ent['row'] + rows, :wk.shape[1]].set(wk)
        b_slab = b_slab.at[:cout, ent['bcol']].set(b.astype(jnp.float32))
    return w_slab, b_slab


# ----------------------------- fused Pallas kernel ---------------------------
def make_fused_kernel(cfg, plan, B, T0, width):
    slope = cfg.relu_slope

    def kernel(x_ref, w_ref, b_ref, out_ref):
        # ---- constants built once per trace and cached (no iota re-emit) ----
        lane_iota = jax.lax.broadcasted_iota(jnp.int32, (1, width), 1)
        mask_cache = {}
        spread_cache = {}

        def seg_mask(tseg, off):
            # 1.0 where the shifted source lane stays inside its own batch
            # segment (and inside the valid region), 0.0 elsewhere.
            key = (tseg, off)
            if key not in mask_cache:
                lo, hi = max(0, -off), tseg - max(0, off)
                m = None
                for b in range(B):
                    mb = ((lane_iota >= b * tseg + lo)
                          & (lane_iota < b * tseg + hi))
                    m = mb if m is None else (m | mb)
                mask_cache[key] = m.astype(jnp.float32)
            return mask_cache[key]

        def shift_time(h, off, tseg):
            # h_shift[:, r] = h[:, r + off] with zero 'same' padding per batch
            # segment.  pltpu.roll is circular (XLU); the mask (VPU) zeroes the
            # wrapped lanes and the batch-boundary lanes.
            if off == 0:
                return h
            rolled = pltpu.roll(h, (-off) % width, axis=1)
            return rolled * seg_mask(tseg, off)

        def lrelu(v):
            return jnp.where(v > 0, v, slope * v)

        def get_w(ent, rows, cols):
            r0 = ent['row']
            return w_ref[r0:r0 + rows, 0:cols]

        def get_b(ent):
            c = ent['bcol']
            return b_ref[0:ent['cout'], c:c + 1]

        def tap_stack(h, K, dil, tseg):
            pad = dil * (K - 1) // 2
            taps = [shift_time(h, k * dil - pad, tseg) for k in range(K)]
            return jnp.concatenate(taps, axis=0) if K > 1 else taps[0]

        def conv_same(h, ent, tseg):
            K, dil, cin, cout = ent['K'], ent['dil'], ent['cin'], ent['cout']
            stack = tap_stack(h, K, dil, tseg)                 # [K*cin, width]
            w = get_w(ent, cout, K * cin)                      # [cout, K*cin]
            return (jnp.dot(w, stack, preferred_element_type=jnp.float32)
                    + get_b(ent))

        def interleave(e, o):
            # out[:, 2r] = e[:, r], out[:, 2r + 1] = o[:, r]; batch packing is
            # preserved because 2*(b*Tseg + m) = b*(2*Tseg) + 2m.
            if 'S' not in spread_cache:
                r_idx = jax.lax.broadcasted_iota(jnp.int32, (width, width), 0)
                c_idx = jax.lax.broadcasted_iota(jnp.int32, (width, width), 1)
                spread_cache['S'] = (
                    (c_idx == 2 * r_idx).astype(jnp.float32),
                    (c_idx == 2 * r_idx + 1).astype(jnp.float32))
            s_e, s_o = spread_cache['S']
            return (jnp.dot(e, s_e, preferred_element_type=jnp.float32)
                    + jnp.dot(o, s_o, preferred_element_type=jnp.float32))

        def upsample_x2(h, ent, tseg):
            # ConvTranspose1d(K=4, stride=2, padding=1), polyphase form with
            # even/odd phase weights fused into one MXU matmul.
            cin, cout = ent['cin'], ent['cout']
            stack = tap_stack(h, ent['K'], ent['dil'], tseg)   # [3*cin, width]
            eo = jnp.dot(get_w(ent, 2 * cout, 3 * cin), stack,
                         preferred_element_type=jnp.float32)   # [2*cout, width]
            return interleave(eo[0:cout, :], eo[cout:2 * cout, :]) + get_b(ent)

        # ------------------------------ network ------------------------------
        pi = iter(plan)
        tseg = T0
        h = lrelu(conv_same(x_ref[...], next(pi), tseg))        # pre
        for _ in cfg.kernels_upsample:
            h = upsample_x2(h, next(pi), tseg)                  # time x2
            tseg *= 2
            mrf = None
            for r, _Kr in enumerate(cfg.kernels_resblocks):     # MRF
                xr = h
                for d_outer in cfg.dilations_resblocks[r]:
                    hh = xr
                    for _d in d_outer:
                        hh = conv_same(lrelu(hh), next(pi), tseg)
                    xr = xr + hh
                mrf = xr if mrf is None else mrf + xr
            h = lrelu(mrf)                                      # block tail
        out_ref[...] = jnp.tanh(conv_same(h, next(pi), tseg))   # post + tanh

    return kernel


def hifi_forward_pallas(x, w_slab, b_slab, cfg):
    """x: [B, n_mels, T0]; returns [B, L] with L = T0 * prod(stride)."""
    B, n_mels, T0 = x.shape
    up = 1
    for k in cfg.kernels_upsample:
        assert k == 4, "polyphase upsample assumes kernel_size=4 (stride 2)"
        up *= 2
    L = T0 * up
    width = max(128, -(-(B * L) // 128) * 128)   # lane-dense packed width
    plan, _, _ = build_plan(cfg)

    # batch packed into the lane axis: batch b at lanes [b*T0, (b+1)*T0)
    xp = jnp.transpose(x, (1, 0, 2)).reshape(n_mels, B * T0).astype(jnp.float32)
    xp = jnp.pad(xp, ((0, 0), (0, width - B * T0)))

    out = pl.pallas_call(
        make_fused_kernel(cfg, plan, B, T0, width),
        out_shape=jax.ShapeDtypeStruct((1, width), jnp.float32),
        in_specs=[pl.BlockSpec(memory_space=pltpu.MemorySpace.VMEM)] * 3,
        out_specs=pl.BlockSpec(memory_space=pltpu.MemorySpace.VMEM),
    )(xp, w_slab, b_slab)
    return out[0, :B * L].reshape(B, L)


# ----------------------------- pure-JAX reference ----------------------------
def hifi_forward_reference(x_bct, params, cfg):
    slope = cfg.relu_slope
    x = jnp.transpose(x_bct, (0, 2, 1)).astype(jnp.float32)    # [B, T, C]
    HI = jax.lax.Precision.HIGHEST

    def lrelu(v):
        return jnp.where(v > 0, v, slope * v)

    def conv_same(h, w_t, b, dil):
        K = w_t.shape[2]
        pad = dil * (K - 1) // 2
        w = jnp.transpose(w_t, (2, 1, 0))                      # [K, Cin, Cout]
        y = jax.lax.conv_general_dilated(
            h, w, window_strides=(1,), padding=[(pad, pad)],
            rhs_dilation=(dil,), dimension_numbers=('NWC', 'WIO', 'NWC'),
            precision=HI)
        return y + b.reshape(1, 1, -1)

    def conv_transpose(h, wt, b, K):
        stride, padding = K // 2, K // 4
        B, T, Cin = h.shape
        u = jnp.zeros((B, (T - 1) * stride + 1, Cin), h.dtype)
        u = u.at[:, ::stride, :].set(h)
        edge = K - 1 - padding
        up = jnp.pad(u, ((0, 0), (edge, edge), (0, 0)))
        w = jnp.transpose(jnp.flip(wt, axis=2), (2, 0, 1))     # [K, Cin, Cout]
        y = jax.lax.conv_general_dilated(
            up, w, window_strides=(1,), padding=[(0, 0)],
            dimension_numbers=('NWC', 'WIO', 'NWC'), precision=HI)
        return y + b.reshape(1, 1, -1)

    x = lrelu(conv_same(x, params['pre_w'], params['pre_b'], 1))
    for i, blk in enumerate(params['blocks']):
        x = conv_transpose(x, blk['up_w'], blk['up_b'], cfg.kernels_upsample[i])
        mrf = None
        for r, outer_list in enumerate(blk['res']):
            xr = x
            for o, inner_list in enumerate(outer_list):
                hh = xr
                for j, (w, b) in enumerate(inner_list):
                    d = cfg.dilations_resblocks[r][o][j]
                    hh = conv_same(lrelu(hh), w, b, d)
                xr = xr + hh
            mrf = xr if mrf is None else mrf + xr
        x = lrelu(mrf)
    y = jnp.tanh(conv_same(x, params['post_w'], params['post_b'], 1))
    return y[:, :, 0]                                          # [B, L]


# ----------------------------- parameter init (torch layout) -----------------
def init_params(cfg, key):
    keys = iter(jax.random.split(key, 64))

    def nrm(shape):
        return 0.05 * jax.random.normal(next(keys), shape, jnp.float32)

    params = {
        'pre_w': nrm((cfg.d_hidden, cfg.n_mels, cfg.pre_kernel_size)),
        'pre_b': nrm((cfg.d_hidden,)),
    }
    blocks = []
    n_blocks = len(cfg.kernels_upsample)
    for i in range(n_blocks):
        cin = cfg.d_hidden // (2 ** i)
        cout = cin // 2
        K = cfg.kernels_upsample[i]
        blk = {'up_w': nrm((cin, cout, K)),     # torch ConvTranspose1d layout
               'up_b': nrm((cout,))}
        res = []
        for r, Kr in enumerate(cfg.kernels_resblocks):
            outer = []
            for d_outer in cfg.dilations_resblocks[r]:
                inner = []
                for _d in d_outer:
                    inner.append((nrm((cout, cout, Kr)), nrm((cout,))))
                outer.append(inner)
            res.append(outer)
        blk['res'] = res
        blocks.append(blk)
    params['blocks'] = blocks
    c_last = cfg.d_hidden // (2 ** n_blocks)
    params['post_w'] = nrm((1, c_last, cfg.post_kernel_size))
    params['post_b'] = nrm((1,))
    return params


# ----------------------------- main ------------------------------------------
if __name__ == "__main__":
    cfg = CFG
    key = jax.random.PRNGKey(0)
    kx, kp = jax.random.split(key)

    B, T = 2, 16
    x = jax.random.normal(kx, (B, cfg.n_mels, T), jnp.float32)  # [B, n_mels, T]
    params = init_params(cfg, kp)
    w_slab, b_slab = pack_params(params, cfg)

    pallas_fn = jax.jit(lambda xx, ws, bs: hifi_forward_pallas(xx, ws, bs, cfg))
    ref_fn = jax.jit(lambda xx, pp: hifi_forward_reference(xx, pp, cfg))

    out = jax.block_until_ready(pallas_fn(x, w_slab, b_slab))
    ref = jax.block_until_ready(ref_fn(x, params))

    total_upsample = 1
    for k in cfg.kernels_upsample:
        total_upsample *= k // 2

    assert out.shape == (B, T * total_upsample), out.shape
    assert bool(jnp.all(jnp.isfinite(out)))
    max_err = float(jnp.max(jnp.abs(out - ref)))
    assert bool(jnp.allclose(out, ref, atol=1e-3, rtol=1e-2)), max_err

    print("KERNEL_OK")
</pallas_src>

<mosaic_0001>
module attributes {stable_mosaic.version = 11 : i64} {
  func.func @kernel(%arg0: memref<8x128xf32, #tpu.memory_space<vmem>>, %arg1: memref<280x128xf32, #tpu.memory_space<vmem>>, %arg2: memref<32x128xf32, #tpu.memory_space<vmem>>, %arg3: memref<1x128xf32, #tpu.memory_space<vmem>>) attributes {dimension_semantics = [], scalar_prefetch = 0 : i64, scratch_operands = 0 : i64, tpu.core_type = #tpu.core_type<tc>} {
    %0 = tpu.iota {dimensions = array<i32: 1>} : vector<1x128xi32>
    %c0 = arith.constant 0 : index
    %c0_0 = arith.constant 0 : index
    %1 = vector.load %arg0[%c0, %c0_0] : memref<8x128xf32, #tpu.memory_space<vmem>>, vector<8x128xf32>
    %c3_i32 = arith.constant 3 : i32
    %2 = tpu.dynamic_rotate %1 by %c3_i32 dim 1 : vector<8x128xf32>, i32 -> vector<8x128xf32>
    %c3_i32_1 = arith.constant 3 : i32
    %3 = vector.broadcast %c3_i32_1 : i32 to vector<1x128xi32>
    %4 = arith.cmpi sge, %0, %3 : vector<1x128xi32>
    %c16_i32 = arith.constant 16 : i32
    %5 = vector.broadcast %c16_i32 : i32 to vector<1x128xi32>
    %6 = arith.cmpi slt, %0, %5 : vector<1x128xi32>
    %7 = arith.andi %4, %6 : vector<1x128xi1>
    %c19_i32 = arith.constant 19 : i32
    %8 = vector.broadcast %c19_i32 : i32 to vector<1x128xi32>
    %9 = arith.cmpi sge, %0, %8 : vector<1x128xi32>
    %c32_i32 = arith.constant 32 : i32
    %10 = vector.broadcast %c32_i32 : i32 to vector<1x128xi32>
    %11 = arith.cmpi slt, %0, %10 : vector<1x128xi32>
    %12 = arith.andi %9, %11 : vector<1x128xi1>
    %13 = arith.ori %7, %12 : vector<1x128xi1>
    %14 = arith.extui %13 : vector<1x128xi1> to vector<1x128xi32>
    %15 = arith.sitofp %14 : vector<1x128xi32> to vector<1x128xf32>
    %16 = vector.broadcast %15 : vector<1x128xf32> to vector<8x128xf32>
    %17 = arith.mulf %2, %16 : vector<8x128xf32>
    %c2_i32 = arith.constant 2 : i32
    %18 = tpu.dynamic_rotate %1 by %c2_i32 dim 1 : vector<8x128xf32>, i32 -> vector<8x128xf32>
    %c2_i32_2 = arith.constant 2 : i32
    %19 = vector.broadcast %c2_i32_2 : i32 to vector<1x128xi32>
    %20 = arith.cmpi sge, %0, %19 : vector<1x128xi32>
    %c16_i32_3 = arith.constant 16 : i32
    %21 = vector.broadcast %c16_i32_3 : i32 to vector<1x128xi32>
    %22 = arith.cmpi slt, %0, %21 : vector<1x128xi32>
    %23 = arith.andi %20, %22 : vector<1x128xi1>
    %c18_i32 = arith.constant 18 : i32
    %24 = vector.broadcast %c18_i32 : i32 to vector<1x128xi32>
    %25 = arith.cmpi sge, %0, %24 : vector<1x128xi32>
    %c32_i32_4 = arith.constant 32 : i32
    %26 = vector.broadcast %c32_i32_4 : i32 to vector<1x128xi32>
    %27 = arith.cmpi slt, %0, %26 : vector<1x128xi32>
    %28 = arith.andi %25, %27 : vector<1x128xi1>
    %29 = arith.ori %23, %28 : vector<1x128xi1>
    %30 = arith.extui %29 : vector<1x128xi1> to vector<1x128xi32>
    %31 = arith.sitofp %30 : vector<1x128xi32> to vector<1x128xf32>
    %32 = vector.broadcast %31 : vector<1x128xf32> to vector<8x128xf32>
    %33 = arith.mulf %18, %32 : vector<8x128xf32>
    %c1_i32 = arith.constant 1 : i32
    %34 = tpu.dynamic_rotate %1 by %c1_i32 dim 1 : vector<8x128xf32>, i32 -> vector<8x128xf32>
    %c1_i32_5 = arith.constant 1 : i32
    %35 = vector.broadcast %c1_i32_5 : i32 to vector<1x128xi32>
    %36 = arith.cmpi sge, %0, %35 : vector<1x128xi32>
    %c16_i32_6 = arith.constant 16 : i32
    %37 = vector.broadcast %c16_i32_6 : i32 to vector<1x128xi32>
    %38 = arith.cmpi slt, %0, %37 : vector<1x128xi32>
    %39 = arith.andi %36, %38 : vector<1x128xi1>
    %c17_i32 = arith.constant 17 : i32
    %40 = vector.broadcast %c17_i32 : i32 to vector<1x128xi32>
    %41 = arith.cmpi sge, %0, %40 : vector<1x128xi32>
    %c32_i32_7 = arith.constant 32 : i32
    %42 = vector.broadcast %c32_i32_7 : i32 to vector<1x128xi32>
    %43 = arith.cmpi slt, %0, %42 : vector<1x128xi32>
    %44 = arith.andi %41, %43 : vector<1x128xi1>
    %45 = arith.ori %39, %44 : vector<1x128xi1>
    %46 = arith.extui %45 : vector<1x128xi1> to vector<1x128xi32>
    %47 = arith.sitofp %46 : vector<1x128xi32> to vector<1x128xf32>
    %48 = vector.broadcast %47 : vector<1x128xf32> to vector<8x128xf32>
    %49 = arith.mulf %34, %48 : vector<8x128xf32>
    %c127_i32 = arith.constant 127 : i32
    %50 = tpu.dynamic_rotate %1 by %c127_i32 dim 1 : vector<8x128xf32>, i32 -> vector<8x128xf32>
    %c0_i32 = arith.constant 0 : i32
    %51 = vector.broadcast %c0_i32 : i32 to vector<1x128xi32>
    %52 = arith.cmpi sge, %0, %51 : vector<1x128xi32>
    %c15_i32 = arith.constant 15 : i32
    %53 = vector.broadcast %c15_i32 : i32 to vector<1x128xi32>
    %54 = arith.cmpi slt, %0, %53 : vector<1x128xi32>
    %55 = arith.andi %52, %54 : vector<1x128xi1>
    %c16_i32_8 = arith.constant 16 : i32
    %56 = vector.broadcast %c16_i32_8 : i32 to vector<1x128xi32>
    %57 = arith.cmpi sge, %0, %56 : vector<1x128xi32>
    %c31_i32 = arith.constant 31 : i32
    %58 = vector.broadcast %c31_i32 : i32 to vector<1x128xi32>
    %59 = arith.cmpi slt, %0, %58 : vector<1x128xi32>
    %60 = arith.andi %57, %59 : vector<1x128xi1>
    %61 = arith.ori %55, %60 : vector<1x128xi1>
    %62 = arith.extui %61 : vector<1x128xi1> to vector<1x128xi32>
    %63 = arith.sitofp %62 : vector<1x128xi32> to vector<1x128xf32>
    %64 = vector.broadcast %63 : vector<1x128xf32> to vector<8x128xf32>
    %65 = arith.mulf %50, %64 : vector<8x128xf32>
    %c126_i32 = arith.constant 126 : i32
    %66 = tpu.dynamic_rotate %1 by %c126_i32 dim 1 : vector<8x128xf32>, i32 -> vector<8x128xf32>
    %c0_i32_9 = arith.constant 0 : i32
    %67 = vector.broadcast %c0_i32_9 : i32 to vector<1x128xi32>
    %68 = arith.cmpi sge, %0, %67 : vector<1x128xi32>
    %c14_i32 = arith.constant 14 : i32
    %69 = vector.broadcast %c14_i32 : i32 to vector<1x128xi32>
    %70 = arith.cmpi slt, %0, %69 : vector<1x128xi32>
    %71 = arith.andi %68, %70 : vector<1x128xi1>
    %c16_i32_10 = arith.constant 16 : i32
    %72 = vector.broadcast %c16_i32_10 : i32 to vector<1x128xi32>
    %73 = arith.cmpi sge, %0, %72 : vector<1x128xi32>
    %c30_i32 = arith.constant 30 : i32
    %74 = vector.broadcast %c30_i32 : i32 to vector<1x128xi32>
    %75 = arith.cmpi slt, %0, %74 : vector<1x128xi32>
    %76 = arith.andi %73, %75 : vector<1x128xi1>
    %77 = arith.ori %71, %76 : vector<1x128xi1>
    %78 = arith.extui %77 : vector<1x128xi1> to vector<1x128xi32>
    %79 = arith.sitofp %78 : vector<1x128xi32> to vector<1x128xf32>
    %80 = vector.broadcast %79 : vector<1x128xf32> to vector<8x128xf32>
    %81 = arith.mulf %66, %80 : vector<8x128xf32>
    %c125_i32 = arith.constant 125 : i32
    %82 = tpu.dynamic_rotate %1 by %c125_i32 dim 1 : vector<8x128xf32>, i32 -> vector<8x128xf32>
    %c0_i32_11 = arith.constant 0 : i32
    %83 = vector.broadcast %c0_i32_11 : i32 to vector<1x128xi32>
    %84 = arith.cmpi sge, %0, %83 : vector<1x128xi32>
    %c13_i32 = arith.constant 13 : i32
    %85 = vector.broadcast %c13_i32 : i32 to vector<1x128xi32>
    %86 = arith.cmpi slt, %0, %85 : vector<1x128xi32>
    %87 = arith.andi %84, %86 : vector<1x128xi1>
    %c16_i32_12 = arith.constant 16 : i32
    %88 = vector.broadcast %c16_i32_12 : i32 to vector<1x128xi32>
    %89 = arith.cmpi sge, %0, %88 : vector<1x128xi32>
    %c29_i32 = arith.constant 29 : i32
    %90 = vector.broadcast %c29_i32 : i32 to vector<1x128xi32>
    %91 = arith.cmpi slt, %0, %90 : vector<1x128xi32>
    %92 = arith.andi %89, %91 : vector<1x128xi1>
    %93 = arith.ori %87, %92 : vector<1x128xi1>
    %94 = arith.extui %93 : vector<1x128xi1> to vector<1x128xi32>
    %95 = arith.sitofp %94 : vector<1x128xi32> to vector<1x128xf32>
    %96 = vector.broadcast %95 : vector<1x128xf32> to vector<8x128xf32>
    %97 = arith.mulf %82, %96 : vector<8x128xf32>
    %98 = tpu.concatenate %17, %33, %49, %1, %65, %81, %97 in 0 : vector<8x128xf32>, vector<8x128xf32>, vector<8x128xf32>, vector<8x128xf32>, vector<8x128xf32>, vector<8x128xf32>, vector<8x128xf32> -> vector<56x128xf32>
    %c0_13 = arith.constant 0 : index
    %c0_14 = arith.constant 0 : index
    %99 = vector.load %arg1[%c0_13, %c0_14] : memref<280x128xf32, #tpu.memory_space<vmem>>, vector<32x56xf32>
    %cst = arith.constant dense<0.000000e+00> : vector<32x128xf32>
    %100 = tpu.matmul %99, %98, %cst {dimension_numbers = #tpu.dot_dimension_numbers<[1], [0], [0], [1], [0, 0, 1, 1], [], []>} : vector<32x56xf32>, vector<56x128xf32>, vector<32x128xf32> -> vector<32x128xf32>
    %c0_15 = arith.constant 0 : index
    %c0_16 = arith.constant 0 : index
    %101 = vector.load %arg2[%c0_15, %c0_16] : memref<32x128xf32, #tpu.memory_space<vmem>>, vector<32x1xf32>
    %102 = vector.broadcast %101 : vector<32x1xf32> to vector<32x128xf32>
    %103 = arith.addf %100, %102 : vector<32x128xf32>
    %cst_17 = arith.constant 0.000000e+00 : f32
    %104 = vector.broadcast %cst_17 : f32 to vector<32x128xf32>
    %105 = arith.cmpf ogt, %103, %104 : vector<32x128xf32>
    %cst_18 = arith.constant 1.000000e-01 : f32
    %106 = vector.broadcast %cst_18 : f32 to vector<32x128xf32>
    %107 = arith.mulf %106, %103 : vector<32x128xf32>
    %108 = arith.select %105, %103, %107 : vector<32x128xi1>, vector<32x128xf32>
    %c1_i32_19 = arith.constant 1 : i32
    %109 = tpu.dynamic_rotate %108 by %c1_i32_19 dim 1 : vector<32x128xf32>, i32 -> vector<32x128xf32>
    %110 = vector.broadcast %47 : vector<1x128xf32> to vector<32x128xf32>
    %111 = arith.mulf %109, %110 : vector<32x128xf32>
    %c127_i32_20 = arith.constant 127 : i32
    %112 = tpu.dynamic_rotate %108 by %c127_i32_20 dim 1 : vector<32x128xf32>, i32 -> vector<32x128xf32>
    %113 = vector.broadcast %63 : vector<1x128xf32> to vector<32x128xf32>
    %114 = arith.mulf %112, %113 : vector<32x128xf32>
    %115 = tpu.concatenate %111, %108, %114 in 0 : vector<32x128xf32>, vector<32x128xf32>, vector<32x128xf32> -> vector<96x128xf32>
    %c32 = arith.constant 32 : index
    %c0_21 = arith.constant 0 : index
    %116 = vector.load %arg1[%c32, %c0_21] : memref<280x128xf32, #tpu.memory_space<vmem>>, vector<32x96xf32>
    %cst_22 = arith.constant dense<0.000000e+00> : vector<32x128xf32>
    %117 = tpu.matmul %116, %115, %cst_22 {dimension_numbers = #tpu.dot_dimension_numbers<[1], [0], [0], [1], [0, 0, 1, 1], [], []>} : vector<32x96xf32>, vector<96x128xf32>, vector<32x128xf32> -> vector<32x128xf32>
    %118 = vector.extract_strided_slice %117 {offsets = [0, 0], sizes = [16, 128], strides = [1, 1]} : vector<32x128xf32> to vector<16x128xf32>
    %119 = vector.extract_strided_slice %117 {offsets = [16, 0], sizes = [16, 128], strides = [1, 1]} : vector<32x128xf32> to vector<16x128xf32>
    %120 = tpu.iota {dimensions = array<i32: 0>} : vector<128x128xi32>
    %121 = tpu.iota {dimensions = array<i32: 1>} : vector<128x128xi32>
    %c2_i32_23 = arith.constant 2 : i32
    %122 = vector.broadcast %c2_i32_23 : i32 to vector<128x128xi32>
    %123 = arith.muli %122, %120 : vector<128x128xi32>
    %124 = arith.cmpi eq, %121, %123 : vector<128x128xi32>
    %125 = arith.extui %124 : vector<128x128xi1> to vector<128x128xi32>
    %126 = arith.sitofp %125 : vector<128x128xi32> to vector<128x128xf32>
    %c2_i32_24 = arith.constant 2 : i32
    %127 = vector.broadcast %c2_i32_24 : i32 to vector<128x128xi32>
    %128 = arith.muli %127, %120 : vector<128x128xi32>
    %c1_i32_25 = arith.constant 1 : i32
    %129 = vector.broadcast %c1_i32_25 : i32 to vector<128x128xi32>
    %130 = arith.addi %128, %129 : vector<128x128xi32>
    %131 = arith.cmpi eq, %121, %130 : vector<128x128xi32>
    %132 = arith.extui %131 : vector<128x128xi1> to vector<128x128xi32>
    %133 = arith.sitofp %132 : vector<128x128xi32> to vector<128x128xf32>
    %cst_26 = arith.constant dense<0.000000e+00> : vector<16x128xf32>
    %134 = tpu.matmul %118, %126, %cst_26 {dimension_numbers = #tpu.dot_dimension_numbers<[1], [0], [0], [1], [0, 0, 1, 1], [], []>} : vector<16x128xf32>, vector<128x128xf32>, vector<16x128xf32> -> vector<16x128xf32>
    %cst_27 = arith.constant dense<0.000000e+00> : vector<16x128xf32>
    %135 = tpu.matmul %119, %133, %cst_27 {dimension_numbers = #tpu.dot_dimension_numbers<[1], [0], [0], [1], [0, 0, 1, 1], [], []>} : vector<16x128xf32>, vector<128x128xf32>, vector<16x128xf32> -> vector<16x128xf32>
    %136 = arith.addf %134, %135 : vector<16x128xf32>
    %c0_28 = arith.constant 0 : index
    %c1 = arith.constant 1 : index
    %137 = vector.load %arg2[%c0_28, %c1] : memref<32x128xf32, #tpu.memory_space<vmem>>, vector<16x1xf32>
    %138 = vector.broadcast %137 : vector<16x1xf32> to vector<16x128xf32>
    %139 = arith.addf %136, %138 : vector<16x128xf32>
    %cst_29 = arith.constant 0.000000e+00 : f32
    %140 = vector.broadcast %cst_29 : f32 to vector<16x128xf32>
    %141 = arith.cmpf ogt, %139, %140 : vector<16x128xf32>
    %cst_30 = arith.constant 1.000000e-01 : f32
    %142 = vector.broadcast %cst_30 : f32 to vector<16x128xf32>
    %143 = arith.mulf %142, %139 : vector<16x128xf32>
    %144 = arith.select %141, %139, %143 : vector<16x128xi1>, vector<16x128xf32>
    %c1_i32_31 = arith.constant 1 : i32
    %145 = tpu.dynamic_rotate %144 by %c1_i32_31 dim 1 : vector<16x128xf32>, i32 -> vector<16x128xf32>
    %c1_i32_32 = arith.constant 1 : i32
    %146 = vector.broadcast %c1_i32_32 : i32 to vector<1x128xi32>
    %147 = arith.cmpi sge, %0, %146 : vector<1x128xi32>
    %c32_i32_33 = arith.constant 32 : i32
    %148 = vector.broadcast %c32_i32_33 : i32 to vector<1x128xi32>
    %149 = arith.cmpi slt, %0, %148 : vector<1x128xi32>
    %150 = arith.andi %147, %149 : vector<1x128xi1>
    %c33_i32 = arith.constant 33 : i32
    %151 = vector.broadcast %c33_i32 : i32 to vector<1x128xi32>
    %152 = arith.cmpi sge, %0, %151 : vector<1x128xi32>
    %c64_i32 = arith.constant 64 : i32
    %153 = vector.broadcast %c64_i32 : i32 to vector<1x128xi32>
    %154 = arith.cmpi slt, %0, %153 : vector<1x128xi32>
    %155 = arith.andi %152, %154 : vector<1x128xi1>
    %156 = arith.ori %150, %155 : vector<1x128xi1>
    %157 = arith.extui %156 : vector<1x128xi1> to vector<1x128xi32>
    %158 = arith.sitofp %157 : vector<1x128xi32> to vector<1x128xf32>
    %159 = vector.broadcast %158 : vector<1x128xf32> to vector<16x128xf32>
    %160 = arith.mulf %145, %159 : vector<16x128xf32>
    %c127_i32_34 = arith.constant 127 : i32
    %161 = tpu.dynamic_rotate %144 by %c127_i32_34 dim 1 : vector<16x128xf32>, i32 -> vector<16x128xf32>
    %c0_i32_35 = arith.constant 0 : i32
    %162 = vector.broadcast %c0_i32_35 : i32 to vector<1x128xi32>
    %163 = arith.cmpi sge, %0, %162 : vector<1x128xi32>
    %c31_i32_36 = arith.constant 31 : i32
    %164 = vector.broadcast %c31_i32_36 : i32 to vector<1x128xi32>
    %165 = arith.cmpi slt, %0, %164 : vector<1x128xi32>
    %166 = arith.andi %163, %165 : vector<1x128xi1>
    %c32_i32_37 = arith.constant 32 : i32
    %167 = vector.broadcast %c32_i32_37 : i32 to vector<1x128xi32>
    %168 = arith.cmpi sge, %0, %167 : vector<1x128xi32>
    %c63_i32 = arith.constant 63 : i32
    %169 = vector.broadcast %c63_i32 : i32 to vector<1x128xi32>
    %170 = arith.cmpi slt, %0, %169 : vector<1x128xi32>
    %171 = arith.andi %168, %170 : vector<1x128xi1>
    %172 = arith.ori %166, %171 : vector<1x128xi1>
    %173 = arith.extui %172 : vector<1x128xi1> to vector<1x128xi32>
    %174 = arith.sitofp %173 : vector<1x128xi32> to vector<1x128xf32>
    %175 = vector.broadcast %174 : vector<1x128xf32> to vector<16x128xf32>
    %176 = arith.mulf %161, %175 : vector<16x128xf32>
    %177 = tpu.concatenate %160, %144, %176 in 0 : vector<16x128xf32>, vector<16x128xf32>, vector<16x128xf32> -> vector<48x128xf32>
    %c64 = arith.constant 64 : index
    %c0_38 = arith.constant 0 : index
    %178 = vector.load %arg1[%c64, %c0_38] : memref<280x128xf32, #tpu.memory_space<vmem>>, vector<16x48xf32>
    %cst_39 = arith.constant dense<0.000000e+00> : vector<16x128xf32>
    %179 = tpu.matmul %178, %177, %cst_39 {dimension_numbers = #tpu.dot_dimension_numbers<[1], [0], [0], [1], [0, 0, 1, 1], [], []>} : vector<16x48xf32>, vector<48x128xf32>, vector<16x128xf32> -> vector<16x128xf32>
    %c0_40 = arith.constant 0 : index
    %c2 = arith.constant 2 : index
    %180 = vector.load %arg2[%c0_40, %c2] : memref<32x128xf32, #tpu.memory_space<vmem>>, vector<16x1xf32>
    %181 = vector.broadcast %180 : vector<16x1xf32> to vector<16x128xf32>
    %182 = arith.addf %179, %181 : vector<16x128xf32>
    %cst_41 = arith.constant 0.000000e+00 : f32
    %183 = vector.broadcast %cst_41 : f32 to vector<16x128xf32>
    %184 = arith.cmpf ogt, %182, %183 : vector<16x128xf32>
    %cst_42 = arith.constant 1.000000e-01 : f32
    %185 = vector.broadcast %cst_42 : f32 to vector<16x128xf32>
    %186 = arith.mulf %185, %182 : vector<16x128xf32>
    %187 = arith.select %184, %182, %186 : vector<16x128xi1>, vector<16x128xf32>
    %c1_i32_43 = arith.constant 1 : i32
    %188 = tpu.dynamic_rotate %187 by %c1_i32_43 dim 1 : vector<16x128xf32>, i32 -> vector<16x128xf32>
    %189 = vector.broadcast %158 : vector<1x128xf32> to vector<16x128xf32>
    %190 = arith.mulf %188, %189 : vector<16x128xf32>
    %c127_i32_44 = arith.constant 127 : i32
    %191 = tpu.dynamic_rotate %187 by %c127_i32_44 dim 1 : vector<16x128xf32>, i32 -> vector<16x128xf32>
    %192 = vector.broadcast %174 : vector<1x128xf32> to vector<16x128xf32>
    %193 = arith.mulf %191, %192 : vector<16x128xf32>
    %194 = tpu.concatenate %190, %187, %193 in 0 : vector<16x128xf32>, vector<16x128xf32>, vector<16x128xf32> -> vector<48x128xf32>
    %c80 = arith.constant 80 : index
    %c0_45 = arith.constant 0 : index
    %195 = vector.load %arg1[%c80, %c0_45] : memref<280x128xf32, #tpu.memory_space<vmem>>, vector<16x48xf32>
    %cst_46 = arith.constant dense<0.000000e+00> : vector<16x128xf32>
    %196 = tpu.matmul %195, %194, %cst_46 {dimension_numbers = #tpu.dot_dimension_numbers<[1], [0], [0], [1], [0, 0, 1, 1], [], []>} : vector<16x48xf32>, vector<48x128xf32>, vector<16x128xf32> -> vector<16x128xf32>
    %c0_47 = arith.constant 0 : index
    %c3 = arith.constant 3 : index
    %197 = vector.load %arg2[%c0_47, %c3] : memref<32x128xf32, #tpu.memory_space<vmem>>, vector<16x1xf32>
    %198 = vector.broadcast %197 : vector<16x1xf32> to vector<16x128xf32>
    %199 = arith.addf %196, %198 : vector<16x128xf32>
    %200 = arith.addf %139, %199 : vector<16x128xf32>
    %cst_48 = arith.constant 0.000000e+00 : f32
    %201 = vector.broadcast %cst_48 : f32 to vector<16x128xf32>
    %202 = arith.cmpf ogt, %200, %201 : vector<16x128xf32>
    %cst_49 = arith.constant 1.000000e-01 : f32
    %203 = vector.broadcast %cst_49 : f32 to vector<16x128xf32>
    %204 = arith.mulf %203, %200 : vector<16x128xf32>
    %205 = arith.select %202, %200, %204 : vector<16x128xi1>, vector<16x128xf32>
    %c3_i32_50 = arith.constant 3 : i32
    %206 = tpu.dynamic_rotate %205 by %c3_i32_50 dim 1 : vector<16x128xf32>, i32 -> vector<16x128xf32>
    %c3_i32_51 = arith.constant 3 : i32
    %207 = vector.broadcast %c3_i32_51 : i32 to vector<1x128xi32>
    %208 = arith.cmpi sge, %0, %207 : vector<1x128xi32>
    %c32_i32_52 = arith.constant 32 : i32
    %209 = vector.broadcast %c32_i32_52 : i32 to vector<1x128xi32>
    %210 = arith.cmpi slt, %0, %209 : vector<1x128xi32>
    %211 = arith.andi %208, %210 : vector<1x128xi1>
    %c35_i32 = arith.constant 35 : i32
    %212 = vector.broadcast %c35_i32 : i32 to vector<1x128xi32>
    %213 = arith.cmpi sge, %0, %212 : vector<1x128xi32>
    %c64_i32_53 = arith.constant 64 : i32
    %214 = vector.broadcast %c64_i32_53 : i32 to vector<1x128xi32>
    %215 = arith.cmpi slt, %0, %214 : vector<1x128xi32>
    %216 = arith.andi %213, %215 : vector<1x128xi1>
    %217 = arith.ori %211, %216 : vector<1x128xi1>
    %218 = arith.extui %217 : vector<1x128xi1> to vector<1x128xi32>
    %219 = arith.sitofp %218 : vector<1x128xi32> to vector<1x128xf32>
    %220 = vector.broadcast %219 : vector<1x128xf32> to vector<16x128xf32>
    %221 = arith.mulf %206, %220 : vector<16x128xf32>
    %c125_i32_54 = arith.constant 125 : i32
    %222 = tpu.dynamic_rotate %205 by %c125_i32_54 dim 1 : vector<16x128xf32>, i32 -> vector<16x128xf32>
    %c0_i32_55 = arith.constant 0 : i32
    %223 = vector.broadcast %c0_i32_55 : i32 to vector<1x128xi32>
    %224 = arith.cmpi sge, %0, %223 : vector<1x128xi32>
    %c29_i32_56 = arith.constant 29 : i32
    %225 = vector.broadcast %c29_i32_56 : i32 to vector<1x128xi32>
    %226 = arith.cmpi slt, %0, %225 : vector<1x128xi32>
    %227 = arith.andi %224, %226 : vector<1x128xi1>
    %c32_i32_57 = arith.constant 32 : i32
    %228 = vector.broadcast %c32_i32_57 : i32 to vector<1x128xi32>
    %229 = arith.cmpi sge, %0, %228 : vector<1x128xi32>
    %c61_i32 = arith.constant 61 : i32
    %230 = vector.broadcast %c61_i32 : i32 to vector<1x128xi32>
    %231 = arith.cmpi slt, %0, %230 : vector<1x128xi32>
    %232 = arith.andi %229, %231 : vector<1x128xi1>
    %233 = arith.ori %227, %232 : vector<1x128xi1>
    %234 = arith.extui %233 : vector<1x128xi1> to vector<1x128xi32>
    %235 = arith.sitofp %234 : vector<1x128xi32> to vector<1x128xf32>
    %236 = vector.broadcast %235 : vector<1x128xf32> to vector<16x128xf32>
    %237 = arith.mulf %222, %236 : vector<16x128xf32>
    %238 = tpu.concatenate %221, %205, %237 in 0 : vector<16x128xf32>, vector<16x128xf32>, vector<16x128xf32> -> vector<48x128xf32>
    %c96 = arith.constant 96 : index
    %c0_58 = arith.constant 0 : index
    %239 = vector.load %arg1[%c96, %c0_58] : memref<280x128xf32, #tpu.memory_space<vmem>>, vector<16x48xf32>
    %cst_59 = arith.constant dense<0.000000e+00> : vector<16x128xf32>
    %240 = tpu.matmul %239, %238, %cst_59 {dimension_numbers = #tpu.dot_dimension_numbers<[1], [0], [0], [1], [0, 0, 1, 1], [], []>} : vector<16x48xf32>, vector<48x128xf32>, vector<16x128xf32> -> vector<16x128xf32>
    %c0_60 = arith.constant 0 : index
    %c4 = arith.constant 4 : index
    %241 = vector.load %arg2[%c0_60, %c4] : memref<32x128xf32, #tpu.memory_space<vmem>>, vector<16x1xf32>
    %242 = vector.broadcast %241 : vector<16x1xf32> to vector<16x128xf32>
    %243 = arith.addf %240, %242 : vector<16x128xf32>
    %cst_61 = arith.constant 0.000000e+00 : f32
    %244 = vector.broadcast %cst_61 : f32 to vector<16x128xf32>
    %245 = arith.cmpf ogt, %243, %244 : vector<16x128xf32>
    %cst_62 = arith.constant 1.000000e-01 : f32
    %246 = vector.broadcast %cst_62 : f32 to vector<16x128xf32>
    %247 = arith.mulf %246, %243 : vector<16x128xf32>
    %248 = arith.select %245, %243, %247 : vector<16x128xi1>, vector<16x128xf32>
    %c1_i32_63 = arith.constant 1 : i32
    %249 = tpu.dynamic_rotate %248 by %c1_i32_63 dim 1 : vector<16x128xf32>, i32 -> vector<16x128xf32>
    %250 = vector.broadcast %158 : vector<1x128xf32> to vector<16x128xf32>
    %251 = arith.mulf %249, %250 : vector<16x128xf32>
    %c127_i32_64 = arith.constant 127 : i32
    %252 = tpu.dynamic_rotate %248 by %c127_i32_64 dim 1 : vector<16x128xf32>, i32 -> vector<16x128xf32>
    %253 = vector.broadcast %174 : vector<1x128xf32> to vector<16x128xf32>
    %254 = arith.mulf %252, %253 : vector<16x128xf32>
    %255 = tpu.concatenate %251, %248, %254 in 0 : vector<16x128xf32>, vector<16x128xf32>, vector<16x128xf32> -> vector<48x128xf32>
    %c112 = arith.constant 112 : index
    %c0_65 = arith.constant 0 : index
    %256 = vector.load %arg1[%c112, %c0_65] : memref<280x128xf32, #tpu.memory_space<vmem>>, vector<16x48xf32>
    %cst_66 = arith.constant dense<0.000000e+00> : vector<16x128xf32>
    %257 = tpu.matmul %256, %255, %cst_66 {dimension_numbers = #tpu.dot_dimension_numbers<[1], [0], [0], [1], [0, 0, 1, 1], [], []>} : vector<16x48xf32>, vector<48x128xf32>, vector<16x128xf32> -> vector<16x128xf32>
    %c0_67 = arith.constant 0 : index
    %c5 = arith.constant 5 : index
    %258 = vector.load %arg2[%c0_67, %c5] : memref<32x128xf32, #tpu.memory_space<vmem>>, vector<16x1xf32>
    %259 = vector.broadcast %258 : vector<16x1xf32> to vector<16x128xf32>
    %260 = arith.addf %257, %259 : vector<16x128xf32>
    %261 = arith.addf %200, %260 : vector<16x128xf32>
    %cst_68 = arith.constant 0.000000e+00 : f32
    %262 = vector.broadcast %cst_68 : f32 to vector<16x128xf32>
    %263 = arith.cmpf ogt, %139, %262 : vector<16x128xf32>
    %cst_69 = arith.constant 1.000000e-01 : f32
    %264 = vector.broadcast %cst_69 : f32 to vector<16x128xf32>
    %265 = arith.mulf %264, %139 : vector<16x128xf32>
    %266 = arith.select %263, %139, %265 : vector<16x128xi1>, vector<16x128xf32>
    %c2_i32_70 = arith.constant 2 : i32
    %267 = tpu.dynamic_rotate %266 by %c2_i32_70 dim 1 : vector<16x128xf32>, i32 -> vector<16x128xf32>
    %c2_i32_71 = arith.constant 2 : i32
    %268 = vector.broadcast %c2_i32_71 : i32 to vector<1x128xi32>
    %269 = arith.cmpi sge, %0, %268 : vector<1x128xi32>
    %c32_i32_72 = arith.constant 32 : i32
    %270 = vector.broadcast %c32_i32_72 : i32 to vector<1x128xi32>
    %271 = arith.cmpi slt, %0, %270 : vector<1x128xi32>
    %272 = arith.andi %269, %271 : vector<1x128xi1>
    %c34_i32 = arith.constant 34 : i32
    %273 = vector.broadcast %c34_i32 : i32 to vector<1x128xi32>
    %274 = arith.cmpi sge, %0, %273 : vector<1x128xi32>
    %c64_i32_73 = arith.constant 64 : i32
    %275 = vector.broadcast %c64_i32_73 : i32 to vector<1x128xi32>
    %276 = arith.cmpi slt, %0, %275 : vector<1x128xi32>
    %277 = arith.andi %274, %276 : vector<1x128xi1>
    %278 = arith.ori %272, %277 : vector<1x128xi1>
    %279 = arith.extui %278 : vector<1x128xi1> to vector<1x128xi32>
    %280 = arith.sitofp %279 : vector<1x128xi32> to vector<1x128xf32>
    %281 = vector.broadcast %280 : vector<1x128xf32> to vector<16x128xf32>
    %282 = arith.mulf %267, %281 : vector<16x128xf32>
    %c1_i32_74 = arith.constant 1 : i32
    %283 = tpu.dynamic_rotate %266 by %c1_i32_74 dim 1 : vector<16x128xf32>, i32 -> vector<16x128xf32>
    %284 = vector.broadcast %158 : vector<1x128xf32> to vector<16x128xf32>
    %285 = arith.mulf %283, %284 : vector<16x128xf32>
    %c127_i32_75 = arith.constant 127 : i32
    %286 = tpu.dynamic_rotate %266 by %c127_i32_75 dim 1 : vector<16x128xf32>, i32 -> vector<16x128xf32>
    %287 = vector.broadcast %174 : vector<1x128xf32> to vector<16x128xf32>
    %288 = arith.mulf %286, %287 : vector<16x128xf32>
    %c126_i32_76 = arith.constant 126 : i32
    %289 = tpu.dynamic_rotate %266 by %c126_i32_76 dim 1 : vector<16x128xf32>, i32 -> vector<16x128xf32>
    %c0_i32_77 = arith.constant 0 : i32
    %290 = vector.broadcast %c0_i32_77 : i32 to vector<1x128xi32>
    %291 = arith.cmpi sge, %0, %290 : vector<1x128xi32>
    %c30_i32_78 = arith.constant 30 : i32
    %292 = vector.broadcast %c30_i32_78 : i32 to vector<1x128xi32>
    %293 = arith.cmpi slt, %0, %292 : vector<1x128xi32>
    %294 = arith.andi %291, %293 : vector<1x128xi1>
    %c32_i32_79 = arith.constant 32 : i32
    %295 = vector.broadcast %c32_i32_79 : i32 to vector<1x128xi32>
    %296 = arith.cmpi sge, %0, %295 : vector<1x128xi32>
    %c62_i32 = arith.constant 62 : i32
    %297 = vector.broadcast %c62_i32 : i32 to vector<1x128xi32>
    %298 = arith.cmpi slt, %0, %297 : vector<1x128xi32>
    %299 = arith.andi %296, %298 : vector<1x128xi1>
    %300 = arith.ori %294, %299 : vector<1x128xi1>
    %301 = arith.extui %300 : vector<1x128xi1> to vector<1x128xi32>
    %302 = arith.sitofp %301 : vector<1x128xi32> to vector<1x128xf32>
    %303 = vector.broadcast %302 : vector<1x128xf32> to vector<16x128xf32>
    %304 = arith.mulf %289, %303 : vector<16x128xf32>
    %305 = tpu.concatenate %282, %285, %266, %288, %304 in 0 : vector<16x128xf32>, vector<16x128xf32>, vector<16x128xf32>, vector<16x128xf32>, vector<16x128xf32> -> vector<80x128xf32>
    %c128 = arith.constant 128 : index
    %c0_80 = arith.constant 0 : index
    %306 = vector.load %arg1[%c128, %c0_80] : memref<280x128xf32, #tpu.memory_space<vmem>>, vector<16x80xf32>
    %cst_81 = arith.constant dense<0.000000e+00> : vector<16x128xf32>
    %307 = tpu.matmul %306, %305, %cst_81 {dimension_numbers = #tpu.dot_dimension_numbers<[1], [0], [0], [1], [0, 0, 1, 1], [], []>} : vector<16x80xf32>, vector<80x128xf32>, vector<16x128xf32> -> vector<16x128xf32>
    %c0_82 = arith.constant 0 : index
    %c6 = arith.constant 6 : index
    %308 = vector.load %arg2[%c0_82, %c6] : memref<32x128xf32, #tpu.memory_space<vmem>>, vector<16x1xf32>
    %309 = vector.broadcast %308 : vector<16x1xf32> to vector<16x128xf32>
    %310 = arith.addf %307, %309 : vector<16x128xf32>
    %cst_83 = arith.constant 0.000000e+00 : f32
    %311 = vector.broadcast %cst_83 : f32 to vector<16x128xf32>
    %312 = arith.cmpf ogt, %310, %311 : vector<16x128xf32>
    %cst_84 = arith.constant 1.000000e-01 : f32
    %313 = vector.broadcast %cst_84 : f32 to vector<16x128xf32>
    %314 = arith.mulf %313, %310 : vector<16x128xf32>
    %315 = arith.select %312, %310, %314 : vector<16x128xi1>, vector<16x128xf32>
    %c2_i32_85 = arith.constant 2 : i32
    %316 = tpu.dynamic_rotate %315 by %c2_i32_85 dim 1 : vector<16x128xf32>, i32 -> vector<16x128xf32>
    %317 = vector.broadcast %280 : vector<1x128xf32> to vector<16x128xf32>
    %318 = arith.mulf %316, %317 : vector<16x128xf32>
    %c1_i32_86 = arith.constant 1 : i32
    %319 = tpu.dynamic_rotate %315 by %c1_i32_86 dim 1 : vector<16x128xf32>, i32 -> vector<16x128xf32>
    %320 = vector.broadcast %158 : vector<1x128xf32> to vector<16x128xf32>
    %321 = arith.mulf %319, %320 : vector<16x128xf32>
    %c127_i32_87 = arith.constant 127 : i32
    %322 = tpu.dynamic_rotate %315 by %c127_i32_87 dim 1 : vector<16x128xf32>, i32 -> vector<16x128xf32>
    %323 = vector.broadcast %174 : vector<1x128xf32> to vector<16x128xf32>
    %324 = arith.mulf %322, %323 : vector<16x128xf32>
    %c126_i32_88 = arith.constant 126 : i32
    %325 = tpu.dynamic_rotate %315 by %c126_i32_88 dim 1 : vector<16x128xf32>, i32 -> vector<16x128xf32>
    %326 = vector.broadcast %302 : vector<1x128xf32> to vector<16x128xf32>
    %327 = arith.mulf %325, %326 : vector<16x128xf32>
    %328 = tpu.concatenate %318, %321, %315, %324, %327 in 0 : vector<16x128xf32>, vector<16x128xf32>, vector<16x128xf32>, vector<16x128xf32>, vector<16x128xf32> -> vector<80x128xf32>
    %c144 = arith.constant 144 : index
    %c0_89 = arith.constant 0 : index
    %329 = vector.load %arg1[%c144, %c0_89] : memref<280x128xf32, #tpu.memory_space<vmem>>, vector<16x80xf32>
    %cst_90 = arith.constant dense<0.000000e+00> : vector<16x128xf32>
    %330 = tpu.matmul %329, %328, %cst_90 {dimension_numbers = #tpu.dot_dimension_numbers<[1], [0], [0], [1], [0, 0, 1, 1], [], []>} : vector<16x80xf32>, vector<80x128xf32>, vector<16x128xf32> -> vector<16x128xf32>
    %c0_91 = arith.constant 0 : index
    %c7 = arith.constant 7 : index
    %331 = vector.load %arg2[%c0_91, %c7] : memref<32x128xf32, #tpu.memory_space<vmem>>, vector<16x1xf32>
    %332 = vector.broadcast %331 : vector<16x1xf32> to vector<16x128xf32>
    %333 = arith.addf %330, %332 : vector<16x128xf32>
    %334 = arith.addf %139, %333 : vector<16x128xf32>
    %cst_92 = arith.constant 0.000000e+00 : f32
    %335 = vector.broadcast %cst_92 : f32 to vector<16x128xf32>
    %336 = arith.cmpf ogt, %334, %335 : vector<16x128xf32>
    %cst_93 = arith.constant 1.000000e-01 : f32
    %337 = vector.broadcast %cst_93 : f32 to vector<16x128xf32>
    %338 = arith.mulf %337, %334 : vector<16x128xf32>
    %339 = arith.select %336, %334, %338 : vector<16x128xi1>, vector<16x128xf32>
    %c6_i32 = arith.constant 6 : i32
    %340 = tpu.dynamic_rotate %339 by %c6_i32 dim 1 : vector<16x128xf32>, i32 -> vector<16x128xf32>
    %c6_i32_94 = arith.constant 6 : i32
    %341 = vector.broadcast %c6_i32_94 : i32 to vector<1x128xi32>
    %342 = arith.cmpi sge, %0, %341 : vector<1x128xi32>
    %c32_i32_95 = arith.constant 32 : i32
    %343 = vector.broadcast %c32_i32_95 : i32 to vector<1x128xi32>
    %344 = arith.cmpi slt, %0, %343 : vector<1x128xi32>
    %345 = arith.andi %342, %344 : vector<1x128xi1>
    %c38_i32 = arith.constant 38 : i32
    %346 = vector.broadcast %c38_i32 : i32 to vector<1x128xi32>
    %347 = arith.cmpi sge, %0, %346 : vector<1x128xi32>
    %c64_i32_96 = arith.constant 64 : i32
    %348 = vector.broadcast %c64_i32_96 : i32 to vector<1x128xi32>
    %349 = arith.cmpi slt, %0, %348 : vector<1x128xi32>
    %350 = arith.andi %347, %349 : vector<1x128xi1>
    %351 = arith.ori %345, %350 : vector<1x128xi1>
    %352 = arith.extui %351 : vector<1x128xi1> to vector<1x128xi32>
    %353 = arith.sitofp %352 : vector<1x128xi32> to vector<1x128xf32>
    %354 = vector.broadcast %353 : vector<1x128xf32> to vector<16x128xf32>
    %355 = arith.mulf %340, %354 : vector<16x128xf32>
    %c3_i32_97 = arith.constant 3 : i32
    %356 = tpu.dynamic_rotate %339 by %c3_i32_97 dim 1 : vector<16x128xf32>, i32 -> vector<16x128xf32>
    %357 = vector.broadcast %219 : vector<1x128xf32> to vector<16x128xf32>
    %358 = arith.mulf %356, %357 : vector<16x128xf32>
    %c125_i32_98 = arith.constant 125 : i32
    %359 = tpu.dynamic_rotate %339 by %c125_i32_98 dim 1 : vector<16x128xf32>, i32 -> vector<16x128xf32>
    %360 = vector.broadcast %235 : vector<1x128xf32> to vector<16x128xf32>
    %361 = arith.mulf %359, %360 : vector<16x128xf32>
    %c122_i32 = arith.constant 122 : i32
    %362 = tpu.dynamic_rotate %339 by %c122_i32 dim 1 : vector<16x128xf32>, i32 -> vector<16x128xf32>
    %c0_i32_99 = arith.constant 0 : i32
    %363 = vector.broadcast %c0_i32_99 : i32 to vector<1x128xi32>
    %364 = arith.cmpi sge, %0, %363 : vector<1x128xi32>
    %c26_i32 = arith.constant 26 : i32
    %365 = vector.broadcast %c26_i32 : i32 to vector<1x128xi32>
    %366 = arith.cmpi slt, %0, %365 : vector<1x128xi32>
    %367 = arith.andi %364, %366 : vector<1x128xi1>
    %c32_i32_100 = arith.constant 32 : i32
    %368 = vector.broadcast %c32_i32_100 : i32 to vector<1x128xi32>
    %369 = arith.cmpi sge, %0, %368 : vector<1x128xi32>
    %c58_i32 = arith.constant 58 : i32
    %370 = vector.broadcast %c58_i32 : i32 to vector<1x128xi32>
    %371 = arith.cmpi slt, %0, %370 : vector<1x128xi32>
    %372 = arith.andi %369, %371 : vector<1x128xi1>
    %373 = arith.ori %367, %372 : vector<1x128xi1>
    %374 = arith.extui %373 : vector<1x128xi1> to vector<1x128xi32>
    %375 = arith.sitofp %374 : vector<1x128xi32> to vector<1x128xf32>
    %376 = vector.broadcast %375 : vector<1x128xf32> to vector<16x128xf32>
    %377 = arith.mulf %362, %376 : vector<16x128xf32>
    %378 = tpu.concatenate %355, %358, %339, %361, %377 in 0 : vector<16x128xf32>, vector<16x128xf32>, vector<16x128xf32>, vector<16x128xf32>, vector<16x128xf32> -> vector<80x128xf32>
    %c160 = arith.constant 160 : index
    %c0_101 = arith.constant 0 : index
    %379 = vector.load %arg1[%c160, %c0_101] : memref<280x128xf32, #tpu.memory_space<vmem>>, vector<16x80xf32>
    %cst_102 = arith.constant dense<0.000000e+00> : vector<16x128xf32>
    %380 = tpu.matmul %379, %378, %cst_102 {dimension_numbers = #tpu.dot_dimension_numbers<[1], [0], [0], [1], [0, 0, 1, 1], [], []>} : vector<16x80xf32>, vector<80x128xf32>, vector<16x128xf32> -> vector<16x128xf32>
    %c0_103 = arith.constant 0 : index
    %c8 = arith.constant 8 : index
    %381 = vector.load %arg2[%c0_103, %c8] : memref<32x128xf32, #tpu.memory_space<vmem>>, vector<16x1xf32>
    %382 = vector.broadcast %381 : vector<16x1xf32> to vector<16x128xf32>
    %383 = arith.addf %380, %382 : vector<16x128xf32>
    %cst_104 = arith.constant 0.000000e+00 : f32
    %384 = vector.broadcast %cst_104 : f32 to vector<16x128xf32>
    %385 = arith.cmpf ogt, %383, %384 : vector<16x128xf32>
    %cst_105 = arith.constant 1.000000e-01 : f32
    %386 = vector.broadcast %cst_105 : f32 to vector<16x128xf32>
    %387 = arith.mulf %386, %383 : vector<16x128xf32>
    %388 = arith.select %385, %383, %387 : vector<16x128xi1>, vector<16x128xf32>
    %c2_i32_106 = arith.constant 2 : i32
    %389 = tpu.dynamic_rotate %388 by %c2_i32_106 dim 1 : vector<16x128xf32>, i32 -> vector<16x128xf32>
    %390 = vector.broadcast %280 : vector<1x128xf32> to vector<16x128xf32>
    %391 = arith.mulf %389, %390 : vector<16x128xf32>
    %c1_i32_107 = arith.constant 1 : i32
    %392 = tpu.dynamic_rotate %388 by %c1_i32_107 dim 1 : vector<16x128xf32>, i32 -> vector<16x128xf32>
    %393 = vector.broadcast %158 : vector<1x128xf32> to vector<16x128xf32>
    %394 = arith.mulf %392, %393 : vector<16x128xf32>
    %c127_i32_108 = arith.constant 127 : i32
    %395 = tpu.dynamic_rotate %388 by %c127_i32_108 dim 1 : vector<16x128xf32>, i32 -> vector<16x128xf32>
    %396 = vector.broadcast %174 : vector<1x128xf32> to vector<16x128xf32>
    %397 = arith.mulf %395, %396 : vector<16x128xf32>
    %c126_i32_109 = arith.constant 126 : i32
    %398 = tpu.dynamic_rotate %388 by %c126_i32_109 dim 1 : vector<16x128xf32>, i32 -> vector<16x128xf32>
    %399 = vector.broadcast %302 : vector<1x128xf32> to vector<16x128xf32>
    %400 = arith.mulf %398, %399 : vector<16x128xf32>
    %401 = tpu.concatenate %391, %394, %388, %397, %400 in 0 : vector<16x128xf32>, vector<16x128xf32>, vector<16x128xf32>, vector<16x128xf32>, vector<16x128xf32> -> vector<80x128xf32>
    %c176 = arith.constant 176 : index
    %c0_110 = arith.constant 0 : index
    %402 = vector.load %arg1[%c176, %c0_110] : memref<280x128xf32, #tpu.memory_space<vmem>>, vector<16x80xf32>
    %cst_111 = arith.constant dense<0.000000e+00> : vector<16x128xf32>
    %403 = tpu.matmul %402, %401, %cst_111 {dimension_numbers = #tpu.dot_dimension_numbers<[1], [0], [0], [1], [0, 0, 1, 1], [], []>} : vector<16x80xf32>, vector<80x128xf32>, vector<16x128xf32> -> vector<16x128xf32>
    %c0_112 = arith.constant 0 : index
    %c9 = arith.constant 9 : index
    %404 = vector.load %arg2[%c0_112, %c9] : memref<32x128xf32, #tpu.memory_space<vmem>>, vector<16x1xf32>
    %405 = vector.broadcast %404 : vector<16x1xf32> to vector<16x128xf32>
    %406 = arith.addf %403, %405 : vector<16x128xf32>
    %407 = arith.addf %334, %406 : vector<16x128xf32>
    %408 = arith.addf %261, %407 : vector<16x128xf32>
    %cst_113 = arith.constant 0.000000e+00 : f32
    %409 = vector.broadcast %cst_113 : f32 to vector<16x128xf32>
    %410 = arith.cmpf ogt, %408, %409 : vector<16x128xf32>
    %cst_114 = arith.constant 1.000000e-01 : f32
    %411 = vector.broadcast %cst_114 : f32 to vector<16x128xf32>
    %412 = arith.mulf %411, %408 : vector<16x128xf32>
    %413 = arith.select %410, %408, %412 : vector<16x128xi1>, vector<16x128xf32>
    %c1_i32_115 = arith.constant 1 : i32
    %414 = tpu.dynamic_rotate %413 by %c1_i32_115 dim 1 : vector<16x128xf32>, i32 -> vector<16x128xf32>
    %415 = vector.broadcast %158 : vector<1x128xf32> to vector<16x128xf32>
    %416 = arith.mulf %414, %415 : vector<16x128xf32>
    %c127_i32_116 = arith.constant 127 : i32
    %417 = tpu.dynamic_rotate %413 by %c127_i32_116 dim 1 : vector<16x128xf32>, i32 -> vector<16x128xf32>
    %418 = vector.broadcast %174 : vector<1x128xf32> to vector<16x128xf32>
    %419 = arith.mulf %417, %418 : vector<16x128xf32>
    %420 = tpu.concatenate %416, %413, %419 in 0 : vector<16x128xf32>, vector<16x128xf32>, vector<16x128xf32> -> vector<48x128xf32>
    %c192 = arith.constant 192 : index
    %c0_117 = arith.constant 0 : index
    %421 = vector.load %arg1[%c192, %c0_117] : memref<280x128xf32, #tpu.memory_space<vmem>>, vector<16x48xf32>
    %cst_118 = arith.constant dense<0.000000e+00> : vector<16x128xf32>
    %422 = tpu.matmul %421, %420, %cst_118 {dimension_numbers = #tpu.dot_dimension_numbers<[1], [0], [0], [1], [0, 0, 1, 1], [], []>} : vector<16x48xf32>, vector<48x128xf32>, vector<16x128xf32> -> vector<16x128xf32>
    %423 = vector.extract_strided_slice %422 {offsets = [0, 0], sizes = [8, 128], strides = [1, 1]} : vector<16x128xf32> to vector<8x128xf32>
    %424 = vector.extract_strided_slice %422 {offsets = [8, 0], sizes = [8, 128], strides = [1, 1]} : vector<16x128xf32> to vector<8x128xf32>
    %cst_119 = arith.constant dense<0.000000e+00> : vector<8x128xf32>
    %425 = tpu.matmul %423, %126, %cst_119 {dimension_numbers = #tpu.dot_dimension_numbers<[1], [0], [0], [1], [0, 0, 1, 1], [], []>} : vector<8x128xf32>, vector<128x128xf32>, vector<8x128xf32> -> vector<8x128xf32>
    %cst_120 = arith.constant dense<0.000000e+00> : vector<8x128xf32>
    %426 = tpu.matmul %424, %133, %cst_120 {dimension_numbers = #tpu.dot_dimension_numbers<[1], [0], [0], [1], [0, 0, 1, 1], [], []>} : vector<8x128xf32>, vector<128x128xf32>, vector<8x128xf32> -> vector<8x128xf32>
    %427 = arith.addf %425, %426 : vector<8x128xf32>
    %c0_121 = arith.constant 0 : index
    %c10 = arith.constant 10 : index
    %428 = vector.load %arg2[%c0_121, %c10] : memref<32x128xf32, #tpu.memory_space<vmem>>, vector<8x1xf32>
    %429 = vector.broadcast %428 : vector<8x1xf32> to vector<8x128xf32>
    %430 = arith.addf %427, %429 : vector<8x128xf32>
    %cst_122 = arith.constant 0.000000e+00 : f32
    %431 = vector.broadcast %cst_122 : f32 to vector<8x128xf32>
    %432 = arith.cmpf ogt, %430, %431 : vector<8x128xf32>
    %cst_123 = arith.constant 1.000000e-01 : f32
    %433 = vector.broadcast %cst_123 : f32 to vector<8x128xf32>
    %434 = arith.mulf %433, %430 : vector<8x128xf32>
    %435 = arith.select %432, %430, %434 : vector<8x128xi1>, vector<8x128xf32>
    %c1_i32_124 = arith.constant 1 : i32
    %436 = tpu.dynamic_rotate %435 by %c1_i32_124 dim 1 : vector<8x128xf32>, i32 -> vector<8x128xf32>
    %c1_i32_125 = arith.constant 1 : i32
    %437 = vector.broadcast %c1_i32_125 : i32 to vector<1x128xi32>
    %438 = arith.cmpi sge, %0, %437 : vector<1x128xi32>
    %c64_i32_126 = arith.constant 64 : i32
    %439 = vector.broadcast %c64_i32_126 : i32 to vector<1x128xi32>
    %440 = arith.cmpi slt, %0, %439 : vector<1x128xi32>
    %441 = arith.andi %438, %440 : vector<1x128xi1>
    %c65_i32 = arith.constant 65 : i32
    %442 = vector.broadcast %c65_i32 : i32 to vector<1x128xi32>
    %443 = arith.cmpi sge, %0, %442 : vector<1x128xi32>
    %c128_i32 = arith.constant 128 : i32
    %444 = vector.broadcast %c128_i32 : i32 to vector<1x128xi32>
    %445 = arith.cmpi slt, %0, %444 : vector<1x128xi32>
    %446 = arith.andi %443, %445 : vector<1x128xi1>
    %447 = arith.ori %441, %446 : vector<1x128xi1>
    %448 = arith.extui %447 : vector<1x128xi1> to vector<1x128xi32>
    %449 = arith.sitofp %448 : vector<1x128xi32> to vector<1x128xf32>
    %450 = vector.broadcast %449 : vector<1x128xf32> to vector<8x128xf32>
    %451 = arith.mulf %436, %450 : vector<8x128xf32>
    %c127_i32_127 = arith.constant 127 : i32
    %452 = tpu.dynamic_rotate %435 by %c127_i32_127 dim 1 : vector<8x128xf32>, i32 -> vector<8x128xf32>
    %c0_i32_128 = arith.constant 0 : i32
    %453 = vector.broadcast %c0_i32_128 : i32 to vector<1x128xi32>
    %454 = arith.cmpi sge, %0, %453 : vector<1x128xi32>
    %c63_i32_129 = arith.constant 63 : i32
    %455 = vector.broadcast %c63_i32_129 : i32 to vector<1x128xi32>
    %456 = arith.cmpi slt, %0, %455 : vector<1x128xi32>
    %457 = arith.andi %454, %456 : vector<1x128xi1>
    %c64_i32_130 = arith.constant 64 : i32
    %458 = vector.broadcast %c64_i32_130 : i32 to vector<1x128xi32>
    %459 = arith.cmpi sge, %0, %458 : vector<1x128xi32>
    %c127_i32_131 = arith.constant 127 : i32
    %460 = vector.broadcast %c127_i32_131 : i32 to vector<1x128xi32>
    %461 = arith.cmpi slt, %0, %460 : vector<1x128xi32>
    %462 = arith.andi %459, %461 : vector<1x128xi1>
    %463 = arith.ori %457, %462 : vector<1x128xi1>
    %464 = arith.extui %463 : vector<1x128xi1> to vector<1x128xi32>
    %465 = arith.sitofp %464 : vector<1x128xi32> to vector<1x128xf32>
    %466 = vector.broadcast %465 : vector<1x128xf32> to vector<8x128xf32>
    %467 = arith.mulf %452, %466 : vector<8x128xf32>
    %468 = tpu.concatenate %451, %435, %467 in 0 : vector<8x128xf32>, vector<8x128xf32>, vector<8x128xf32> -> vector<24x128xf32>
    %c208 = arith.constant 208 : index
    %c0_132 = arith.constant 0 : index
    %469 = vector.load %arg1[%c208, %c0_132] : memref<280x128xf32, #tpu.memory_space<vmem>>, vector<8x24xf32>
    %cst_133 = arith.constant dense<0.000000e+00> : vector<8x128xf32>
    %470 = tpu.matmul %469, %468, %cst_133 {dimension_numbers = #tpu.dot_dimension_numbers<[1], [0], [0], [1], [0, 0, 1, 1], [], []>} : vector<8x24xf32>, vector<24x128xf32>, vector<8x128xf32> -> vector<8x128xf32>
    %c0_134 = arith.constant 0 : index
    %c11 = arith.constant 11 : index
    %471 = vector.load %arg2[%c0_134, %c11] : memref<32x128xf32, #tpu.memory_space<vmem>>, vector<8x1xf32>
    %472 = vector.broadcast %471 : vector<8x1xf32> to vector<8x128xf32>
    %473 = arith.addf %470, %472 : vector<8x128xf32>
    %cst_135 = arith.constant 0.000000e+00 : f32
    %474 = vector.broadcast %cst_135 : f32 to vector<8x128xf32>
    %475 = arith.cmpf ogt, %473, %474 : vector<8x128xf32>
    %cst_136 = arith.constant 1.000000e-01 : f32
    %476 = vector.broadcast %cst_136 : f32 to vector<8x128xf32>
    %477 = arith.mulf %476, %473 : vector<8x128xf32>
    %478 = arith.select %475, %473, %477 : vector<8x128xi1>, vector<8x128xf32>
    %c1_i32_137 = arith.constant 1 : i32
    %479 = tpu.dynamic_rotate %478 by %c1_i32_137 dim 1 : vector<8x128xf32>, i32 -> vector<8x128xf32>
    %480 = vector.broadcast %449 : vector<1x128xf32> to vector<8x128xf32>
    %481 = arith.mulf %479, %480 : vector<8x128xf32>
    %c127_i32_138 = arith.constant 127 : i32
    %482 = tpu.dynamic_rotate %478 by %c127_i32_138 dim 1 : vector<8x128xf32>, i32 -> vector<8x128xf32>
    %483 = vector.broadcast %465 : vector<1x128xf32> to vector<8x128xf32>
    %484 = arith.mulf %482, %483 : vector<8x128xf32>
    %485 = tpu.concatenate %481, %478, %484 in 0 : vector<8x128xf32>, vector<8x128xf32>, vector<8x128xf32> -> vector<24x128xf32>
    %c216 = arith.constant 216 : index
    %c0_139 = arith.constant 0 : index
    %486 = vector.load %arg1[%c216, %c0_139] : memref<280x128xf32, #tpu.memory_space<vmem>>, vector<8x24xf32>
    %cst_140 = arith.constant dense<0.000000e+00> : vector<8x128xf32>
    %487 = tpu.matmul %486, %485, %cst_140 {dimension_numbers = #tpu.dot_dimension_numbers<[1], [0], [0], [1], [0, 0, 1, 1], [], []>} : vector<8x24xf32>, vector<24x128xf32>, vector<8x128xf32> -> vector<8x128xf32>
    %c0_141 = arith.constant 0 : index
    %c12 = arith.constant 12 : index
    %488 = vector.load %arg2[%c0_141, %c12] : memref<32x128xf32, #tpu.memory_space<vmem>>, vector<8x1xf32>
    %489 = vector.broadcast %488 : vector<8x1xf32> to vector<8x128xf32>
    %490 = arith.addf %487, %489 : vector<8x128xf32>
    %491 = arith.addf %430, %490 : vector<8x128xf32>
    %cst_142 = arith.constant 0.000000e+00 : f32
    %492 = vector.broadcast %cst_142 : f32 to vector<8x128xf32>
    %493 = arith.cmpf ogt, %491, %492 : vector<8x128xf32>
    %cst_143 = arith.constant 1.000000e-01 : f32
    %494 = vector.broadcast %cst_143 : f32 to vector<8x128xf32>
    %495 = arith.mulf %494, %491 : vector<8x128xf32>
    %496 = arith.select %493, %491, %495 : vector<8x128xi1>, vector<8x128xf32>
    %c3_i32_144 = arith.constant 3 : i32
    %497 = tpu.dynamic_rotate %496 by %c3_i32_144 dim 1 : vector<8x128xf32>, i32 -> vector<8x128xf32>
    %c3_i32_145 = arith.constant 3 : i32
    %498 = vector.broadcast %c3_i32_145 : i32 to vector<1x128xi32>
    %499 = arith.cmpi sge, %0, %498 : vector<1x128xi32>
    %c64_i32_146 = arith.constant 64 : i32
    %500 = vector.broadcast %c64_i32_146 : i32 to vector<1x128xi32>
    %501 = arith.cmpi slt, %0, %500 : vector<1x128xi32>
    %502 = arith.andi %499, %501 : vector<1x128xi1>
    %c67_i32 = arith.constant 67 : i32
    %503 = vector.broadcast %c67_i32 : i32 to vector<1x128xi32>
    %504 = arith.cmpi sge, %0, %503 : vector<1x128xi32>
    %c128_i32_147 = arith.constant 128 : i32
    %505 = vector.broadcast %c128_i32_147 : i32 to vector<1x128xi32>
    %506 = arith.cmpi slt, %0, %505 : vector<1x128xi32>
    %507 = arith.andi %504, %506 : vector<1x128xi1>
    %508 = arith.ori %502, %507 : vector<1x128xi1>
    %509 = arith.extui %508 : vector<1x128xi1> to vector<1x128xi32>
    %510 = arith.sitofp %509 : vector<1x128xi32> to vector<1x128xf32>
    %511 = vector.broadcast %510 : vector<1x128xf32> to vector<8x128xf32>
    %512 = arith.mulf %497, %511 : vector<8x128xf32>
    %c125_i32_148 = arith.constant 125 : i32
    %513 = tpu.dynamic_rotate %496 by %c125_i32_148 dim 1 : vector<8x128xf32>, i32 -> vector<8x128xf32>
    %c0_i32_149 = arith.constant 0 : i32
    %514 = vector.broadcast %c0_i32_149 : i32 to vector<1x128xi32>
    %515 = arith.cmpi sge, %0, %514 : vector<1x128xi32>
    %c61_i32_150 = arith.constant 61 : i32
    %516 = vector.broadcast %c61_i32_150 : i32 to vector<1x128xi32>
    %517 = arith.cmpi slt, %0, %516 : vector<1x128xi32>
    %518 = arith.andi %515, %517 : vector<1x128xi1>
    %c64_i32_151 = arith.constant 64 : i32
    %519 = vector.broadcast %c64_i32_151 : i32 to vector<1x128xi32>
    %520 = arith.cmpi sge, %0, %519 : vector<1x128xi32>
    %c125_i32_152 = arith.constant 125 : i32
    %521 = vector.broadcast %c125_i32_152 : i32 to vector<1x128xi32>
    %522 = arith.cmpi slt, %0, %521 : vector<1x128xi32>
    %523 = arith.andi %520, %522 : vector<1x128xi1>
    %524 = arith.ori %518, %523 : vector<1x128xi1>
    %525 = arith.extui %524 : vector<1x128xi1> to vector<1x128xi32>
    %526 = arith.sitofp %525 : vector<1x128xi32> to vector<1x128xf32>
    %527 = vector.broadcast %526 : vector<1x128xf32> to vector<8x128xf32>
    %528 = arith.mulf %513, %527 : vector<8x128xf32>
    %529 = tpu.concatenate %512, %496, %528 in 0 : vector<8x128xf32>, vector<8x128xf32>, vector<8x128xf32> -> vector<24x128xf32>
    %c224 = arith.constant 224 : index
    %c0_153 = arith.constant 0 : index
    %530 = vector.load %arg1[%c224, %c0_153] : memref<280x128xf32, #tpu.memory_space<vmem>>, vector<8x24xf32>
    %cst_154 = arith.constant dense<0.000000e+00> : vector<8x128xf32>
    %531 = tpu.matmul %530, %529, %cst_154 {dimension_numbers = #tpu.dot_dimension_numbers<[1], [0], [0], [1], [0, 0, 1, 1], [], []>} : vector<8x24xf32>, vector<24x128xf32>, vector<8x128xf32> -> vector<8x128xf32>
    %c0_155 = arith.constant 0 : index
    %c13 = arith.constant 13 : index
    %532 = vector.load %arg2[%c0_155, %c13] : memref<32x128xf32, #tpu.memory_space<vmem>>, vector<8x1xf32>
    %533 = vector.broadcast %532 : vector<8x1xf32> to vector<8x128xf32>
    %534 = arith.addf %531, %533 : vector<8x128xf32>
    %cst_156 = arith.constant 0.000000e+00 : f32
    %535 = vector.broadcast %cst_156 : f32 to vector<8x128xf32>
    %536 = arith.cmpf ogt, %534, %535 : vector<8x128xf32>
    %cst_157 = arith.constant 1.000000e-01 : f32
    %537 = vector.broadcast %cst_157 : f32 to vector<8x128xf32>
    %538 = arith.mulf %537, %534 : vector<8x128xf32>
    %539 = arith.select %536, %534, %538 : vector<8x128xi1>, vector<8x128xf32>
    %c1_i32_158 = arith.constant 1 : i32
    %540 = tpu.dynamic_rotate %539 by %c1_i32_158 dim 1 : vector<8x128xf32>, i32 -> vector<8x128xf32>
    %541 = vector.broadcast %449 : vector<1x128xf32> to vector<8x128xf32>
    %542 = arith.mulf %540, %541 : vector<8x128xf32>
    %c127_i32_159 = arith.constant 127 : i32
    %543 = tpu.dynamic_rotate %539 by %c127_i32_159 dim 1 : vector<8x128xf32>, i32 -> vector<8x128xf32>
    %544 = vector.broadcast %465 : vector<1x128xf32> to vector<8x128xf32>
    %545 = arith.mulf %543, %544 : vector<8x128xf32>
    %546 = tpu.concatenate %542, %539, %545 in 0 : vector<8x128xf32>, vector<8x128xf32>, vector<8x128xf32> -> vector<24x128xf32>
    %c232 = arith.constant 232 : index
    %c0_160 = arith.constant 0 : index
    %547 = vector.load %arg1[%c232, %c0_160] : memref<280x128xf32, #tpu.memory_space<vmem>>, vector<8x24xf32>
    %cst_161 = arith.constant dense<0.000000e+00> : vector<8x128xf32>
    %548 = tpu.matmul %547, %546, %cst_161 {dimension_numbers = #tpu.dot_dimension_numbers<[1], [0], [0], [1], [0, 0, 1, 1], [], []>} : vector<8x24xf32>, vector<24x128xf32>, vector<8x128xf32> -> vector<8x128xf32>
    %c0_162 = arith.constant 0 : index
    %c14 = arith.constant 14 : index
    %549 = vector.load %arg2[%c0_162, %c14] : memref<32x128xf32, #tpu.memory_space<vmem>>, vector<8x1xf32>
    %550 = vector.broadcast %549 : vector<8x1xf32> to vector<8x128xf32>
    %551 = arith.addf %548, %550 : vector<8x128xf32>
    %552 = arith.addf %491, %551 : vector<8x128xf32>
    %cst_163 = arith.constant 0.000000e+00 : f32
    %553 = vector.broadcast %cst_163 : f32 to vector<8x128xf32>
    %554 = arith.cmpf ogt, %430, %553 : vector<8x128xf32>
    %cst_164 = arith.constant 1.000000e-01 : f32
    %555 = vector.broadcast %cst_164 : f32 to vector<8x128xf32>
    %556 = arith.mulf %555, %430 : vector<8x128xf32>
    %557 = arith.select %554, %430, %556 : vector<8x128xi1>, vector<8x128xf32>
    %c2_i32_165 = arith.constant 2 : i32
    %558 = tpu.dynamic_rotate %557 by %c2_i32_165 dim 1 : vector<8x128xf32>, i32 -> vector<8x128xf32>
    %c2_i32_166 = arith.constant 2 : i32
    %559 = vector.broadcast %c2_i32_166 : i32 to vector<1x128xi32>
    %560 = arith.cmpi sge, %0, %559 : vector<1x128xi32>
    %c64_i32_167 = arith.constant 64 : i32
    %561 = vector.broadcast %c64_i32_167 : i32 to vector<1x128xi32>
    %562 = arith.cmpi slt, %0, %561 : vector<1x128xi32>
    %563 = arith.andi %560, %562 : vector<1x128xi1>
    %c66_i32 = arith.constant 66 : i32
    %564 = vector.broadcast %c66_i32 : i32 to vector<1x128xi32>
    %565 = arith.cmpi sge, %0, %564 : vector<1x128xi32>
    %c128_i32_168 = arith.constant 128 : i32
    %566 = vector.broadcast %c128_i32_168 : i32 to vector<1x128xi32>
    %567 = arith.cmpi slt, %0, %566 : vector<1x128xi32>
    %568 = arith.andi %565, %567 : vector<1x128xi1>
    %569 = arith.ori %563, %568 : vector<1x128xi1>
    %570 = arith.extui %569 : vector<1x128xi1> to vector<1x128xi32>
    %571 = arith.sitofp %570 : vector<1x128xi32> to vector<1x128xf32>
    %572 = vector.broadcast %571 : vector<1x128xf32> to vector<8x128xf32>
    %573 = arith.mulf %558, %572 : vector<8x128xf32>
    %c1_i32_169 = arith.constant 1 : i32
    %574 = tpu.dynamic_rotate %557 by %c1_i32_169 dim 1 : vector<8x128xf32>, i32 -> vector<8x128xf32>
    %575 = vector.broadcast %449 : vector<1x128xf32> to vector<8x128xf32>
    %576 = arith.mulf %574, %575 : vector<8x128xf32>
    %c127_i32_170 = arith.constant 127 : i32
    %577 = tpu.dynamic_rotate %557 by %c127_i32_170 dim 1 : vector<8x128xf32>, i32 -> vector<8x128xf32>
    %578 = vector.broadcast %465 : vector<1x128xf32> to vector<8x128xf32>
    %579 = arith.mulf %577, %578 : vector<8x128xf32>
    %c126_i32_171 = arith.constant 126 : i32
    %580 = tpu.dynamic_rotate %557 by %c126_i32_171 dim 1 : vector<8x128xf32>, i32 -> vector<8x128xf32>
    %c0_i32_172 = arith.constant 0 : i32
    %581 = vector.broadcast %c0_i32_172 : i32 to vector<1x128xi32>
    %582 = arith.cmpi sge, %0, %581 : vector<1x128xi32>
    %c62_i32_173 = arith.constant 62 : i32
    %583 = vector.broadcast %c62_i32_173 : i32 to vector<1x128xi32>
    %584 = arith.cmpi slt, %0, %583 : vector<1x128xi32>
    %585 = arith.andi %582, %584 : vector<1x128xi1>
    %c64_i32_174 = arith.constant 64 : i32
    %586 = vector.broadcast %c64_i32_174 : i32 to vector<1x128xi32>
    %587 = arith.cmpi sge, %0, %586 : vector<1x128xi32>
    %c126_i32_175 = arith.constant 126 : i32
    %588 = vector.broadcast %c126_i32_175 : i32 to vector<1x128xi32>
    %589 = arith.cmpi slt, %0, %588 : vector<1x128xi32>
    %590 = arith.andi %587, %589 : vector<1x128xi1>
    %591 = arith.ori %585, %590 : vector<1x128xi1>
    %592 = arith.extui %591 : vector<1x128xi1> to vector<1x128xi32>
    %593 = arith.sitofp %592 : vector<1x128xi32> to vector<1x128xf32>
    %594 = vector.broadcast %593 : vector<1x128xf32> to vector<8x128xf32>
    %595 = arith.mulf %580, %594 : vector<8x128xf32>
    %596 = tpu.concatenate %573, %576, %557, %579, %595 in 0 : vector<8x128xf32>, vector<8x128xf32>, vector<8x128xf32>, vector<8x128xf32>, vector<8x128xf32> -> vector<40x128xf32>
    %c240 = arith.constant 240 : index
    %c0_176 = arith.constant 0 : index
    %597 = vector.load %arg1[%c240, %c0_176] : memref<280x128xf32, #tpu.memory_space<vmem>>, vector<8x40xf32>
    %cst_177 = arith.constant dense<0.000000e+00> : vector<8x128xf32>
    %598 = tpu.matmul %597, %596, %cst_177 {dimension_numbers = #tpu.dot_dimension_numbers<[1], [0], [0], [1], [0, 0, 1, 1], [], []>} : vector<8x40xf32>, vector<40x128xf32>, vector<8x128xf32> -> vector<8x128xf32>
    %c0_178 = arith.constant 0 : index
    %c15 = arith.constant 15 : index
    %599 = vector.load %arg2[%c0_178, %c15] : memref<32x128xf32, #tpu.memory_space<vmem>>, vector<8x1xf32>
    %600 = vector.broadcast %599 : vector<8x1xf32> to vector<8x128xf32>
    %601 = arith.addf %598, %600 : vector<8x128xf32>
    %cst_179 = arith.constant 0.000000e+00 : f32
    %602 = vector.broadcast %cst_179 : f32 to vector<8x128xf32>
    %603 = arith.cmpf ogt, %601, %602 : vector<8x128xf32>
    %cst_180 = arith.constant 1.000000e-01 : f32
    %604 = vector.broadcast %cst_180 : f32 to vector<8x128xf32>
    %605 = arith.mulf %604, %601 : vector<8x128xf32>
    %606 = arith.select %603, %601, %605 : vector<8x128xi1>, vector<8x128xf32>
    %c2_i32_181 = arith.constant 2 : i32
    %607 = tpu.dynamic_rotate %606 by %c2_i32_181 dim 1 : vector<8x128xf32>, i32 -> vector<8x128xf32>
    %608 = vector.broadcast %571 : vector<1x128xf32> to vector<8x128xf32>
    %609 = arith.mulf %607, %608 : vector<8x128xf32>
    %c1_i32_182 = arith.constant 1 : i32
    %610 = tpu.dynamic_rotate %606 by %c1_i32_182 dim 1 : vector<8x128xf32>, i32 -> vector<8x128xf32>
    %611 = vector.broadcast %449 : vector<1x128xf32> to vector<8x128xf32>
    %612 = arith.mulf %610, %611 : vector<8x128xf32>
    %c127_i32_183 = arith.constant 127 : i32
    %613 = tpu.dynamic_rotate %606 by %c127_i32_183 dim 1 : vector<8x128xf32>, i32 -> vector<8x128xf32>
    %614 = vector.broadcast %465 : vector<1x128xf32> to vector<8x128xf32>
    %615 = arith.mulf %613, %614 : vector<8x128xf32>
    %c126_i32_184 = arith.constant 126 : i32
    %616 = tpu.dynamic_rotate %606 by %c126_i32_184 dim 1 : vector<8x128xf32>, i32 -> vector<8x128xf32>
    %617 = vector.broadcast %593 : vector<1x128xf32> to vector<8x128xf32>
    %618 = arith.mulf %616, %617 : vector<8x128xf32>
    %619 = tpu.concatenate %609, %612, %606, %615, %618 in 0 : vector<8x128xf32>, vector<8x128xf32>, vector<8x128xf32>, vector<8x128xf32>, vector<8x128xf32> -> vector<40x128xf32>
    %c248 = arith.constant 248 : index
    %c0_185 = arith.constant 0 : index
    %620 = vector.load %arg1[%c248, %c0_185] : memref<280x128xf32, #tpu.memory_space<vmem>>, vector<8x40xf32>
    %cst_186 = arith.constant dense<0.000000e+00> : vector<8x128xf32>
    %621 = tpu.matmul %620, %619, %cst_186 {dimension_numbers = #tpu.dot_dimension_numbers<[1], [0], [0], [1], [0, 0, 1, 1], [], []>} : vector<8x40xf32>, vector<40x128xf32>, vector<8x128xf32> -> vector<8x128xf32>
    %c0_187 = arith.constant 0 : index
    %c16 = arith.constant 16 : index
    %622 = vector.load %arg2[%c0_187, %c16] : memref<32x128xf32, #tpu.memory_space<vmem>>, vector<8x1xf32>
    %623 = vector.broadcast %622 : vector<8x1xf32> to vector<8x128xf32>
    %624 = arith.addf %621, %623 : vector<8x128xf32>
    %625 = arith.addf %430, %624 : vector<8x128xf32>
    %cst_188 = arith.constant 0.000000e+00 : f32
    %626 = vector.broadcast %cst_188 : f32 to vector<8x128xf32>
    %627 = arith.cmpf ogt, %625, %626 : vector<8x128xf32>
    %cst_189 = arith.constant 1.000000e-01 : f32
    %628 = vector.broadcast %cst_189 : f32 to vector<8x128xf32>
    %629 = arith.mulf %628, %625 : vector<8x128xf32>
    %630 = arith.select %627, %625, %629 : vector<8x128xi1>, vector<8x128xf32>
    %c6_i32_190 = arith.constant 6 : i32
    %631 = tpu.dynamic_rotate %630 by %c6_i32_190 dim 1 : vector<8x128xf32>, i32 -> vector<8x128xf32>
    %c6_i32_191 = arith.constant 6 : i32
    %632 = vector.broadcast %c6_i32_191 : i32 to vector<1x128xi32>
    %633 = arith.cmpi sge, %0, %632 : vector<1x128xi32>
    %c64_i32_192 = arith.constant 64 : i32
    %634 = vector.broadcast %c64_i32_192 : i32 to vector<1x128xi32>
    %635 = arith.cmpi slt, %0, %634 : vector<1x128xi32>
    %636 = arith.andi %633, %635 : vector<1x128xi1>
    %c70_i32 = arith.constant 70 : i32
    %637 = vector.broadcast %c70_i32 : i32 to vector<1x128xi32>
    %638 = arith.cmpi sge, %0, %637 : vector<1x128xi32>
    %c128_i32_193 = arith.constant 128 : i32
    %639 = vector.broadcast %c128_i32_193 : i32 to vector<1x128xi32>
    %640 = arith.cmpi slt, %0, %639 : vector<1x128xi32>
    %641 = arith.andi %638, %640 : vector<1x128xi1>
    %642 = arith.ori %636, %641 : vector<1x128xi1>
    %643 = arith.extui %642 : vector<1x128xi1> to vector<1x128xi32>
    %644 = arith.sitofp %643 : vector<1x128xi32> to vector<1x128xf32>
    %645 = vector.broadcast %644 : vector<1x128xf32> to vector<8x128xf32>
    %646 = arith.mulf %631, %645 : vector<8x128xf32>
    %c3_i32_194 = arith.constant 3 : i32
    %647 = tpu.dynamic_rotate %630 by %c3_i32_194 dim 1 : vector<8x128xf32>, i32 -> vector<8x128xf32>
    %648 = vector.broadcast %510 : vector<1x128xf32> to vector<8x128xf32>
    %649 = arith.mulf %647, %648 : vector<8x128xf32>
    %c125_i32_195 = arith.constant 125 : i32
    %650 = tpu.dynamic_rotate %630 by %c125_i32_195 dim 1 : vector<8x128xf32>, i32 -> vector<8x128xf32>
    %651 = vector.broadcast %526 : vector<1x128xf32> to vector<8x128xf32>
    %652 = arith.mulf %650, %651 : vector<8x128xf32>
    %c122_i32_196 = arith.constant 122 : i32
    %653 = tpu.dynamic_rotate %630 by %c122_i32_196 dim 1 : vector<8x128xf32>, i32 -> vector<8x128xf32>
    %c0_i32_197 = arith.constant 0 : i32
    %654 = vector.broadcast %c0_i32_197 : i32 to vector<1x128xi32>
    %655 = arith.cmpi sge, %0, %654 : vector<1x128xi32>
    %c58_i32_198 = arith.constant 58 : i32
    %656 = vector.broadcast %c58_i32_198 : i32 to vector<1x128xi32>
    %657 = arith.cmpi slt, %0, %656 : vector<1x128xi32>
    %658 = arith.andi %655, %657 : vector<1x128xi1>
    %c64_i32_199 = arith.constant 64 : i32
    %659 = vector.broadcast %c64_i32_199 : i32 to vector<1x128xi32>
    %660 = arith.cmpi sge, %0, %659 : vector<1x128xi32>
    %c122_i32_200 = arith.constant 122 : i32
    %661 = vector.broadcast %c122_i32_200 : i32 to vector<1x128xi32>
    %662 = arith.cmpi slt, %0, %661 : vector<1x128xi32>
    %663 = arith.andi %660, %662 : vector<1x128xi1>
    %664 = arith.ori %658, %663 : vector<1x128xi1>
    %665 = arith.extui %664 : vector<1x128xi1> to vector<1x128xi32>
    %666 = arith.sitofp %665 : vector<1x128xi32> to vector<1x128xf32>
    %667 = vector.broadcast %666 : vector<1x128xf32> to vector<8x128xf32>
    %668 = arith.mulf %653, %667 : vector<8x128xf32>
    %669 = tpu.concatenate %646, %649, %630, %652, %668 in 0 : vector<8x128xf32>, vector<8x128xf32>, vector<8x128xf32>, vector<8x128xf32>, vector<8x128xf32> -> vector<40x128xf32>
    %c256 = arith.constant 256 : index
    %c0_201 = arith.constant 0 : index
    %670 = vector.load %arg1[%c256, %c0_201] : memref<280x128xf32, #tpu.memory_space<vmem>>, vector<8x40xf32>
    %cst_202 = arith.constant dense<0.000000e+00> : vector<8x128xf32>
    %671 = tpu.matmul %670, %669, %cst_202 {dimension_numbers = #tpu.dot_dimension_numbers<[1], [0], [0], [1], [0, 0, 1, 1], [], []>} : vector<8x40xf32>, vector<40x128xf32>, vector<8x128xf32> -> vector<8x128xf32>
    %c0_203 = arith.constant 0 : index
    %c17 = arith.constant 17 : index
    %672 = vector.load %arg2[%c0_203, %c17] : memref<32x128xf32, #tpu.memory_space<vmem>>, vector<8x1xf32>
    %673 = vector.broadcast %672 : vector<8x1xf32> to vector<8x128xf32>
    %674 = arith.addf %671, %673 : vector<8x128xf32>
    %cst_204 = arith.constant 0.000000e+00 : f32
    %675 = vector.broadcast %cst_204 : f32 to vector<8x128xf32>
    %676 = arith.cmpf ogt, %674, %675 : vector<8x128xf32>
    %cst_205 = arith.constant 1.000000e-01 : f32
    %677 = vector.broadcast %cst_205 : f32 to vector<8x128xf32>
    %678 = arith.mulf %677, %674 : vector<8x128xf32>
    %679 = arith.select %676, %674, %678 : vector<8x128xi1>, vector<8x128xf32>
    %c2_i32_206 = arith.constant 2 : i32
    %680 = tpu.dynamic_rotate %679 by %c2_i32_206 dim 1 : vector<8x128xf32>, i32 -> vector<8x128xf32>
    %681 = vector.broadcast %571 : vector<1x128xf32> to vector<8x128xf32>
    %682 = arith.mulf %680, %681 : vector<8x128xf32>
    %c1_i32_207 = arith.constant 1 : i32
    %683 = tpu.dynamic_rotate %679 by %c1_i32_207 dim 1 : vector<8x128xf32>, i32 -> vector<8x128xf32>
    %684 = vector.broadcast %449 : vector<1x128xf32> to vector<8x128xf32>
    %685 = arith.mulf %683, %684 : vector<8x128xf32>
    %c127_i32_208 = arith.constant 127 : i32
    %686 = tpu.dynamic_rotate %679 by %c127_i32_208 dim 1 : vector<8x128xf32>, i32 -> vector<8x128xf32>
    %687 = vector.broadcast %465 : vector<1x128xf32> to vector<8x128xf32>
    %688 = arith.mulf %686, %687 : vector<8x128xf32>
    %c126_i32_209 = arith.constant 126 : i32
    %689 = tpu.dynamic_rotate %679 by %c126_i32_209 dim 1 : vector<8x128xf32>, i32 -> vector<8x128xf32>
    %690 = vector.broadcast %593 : vector<1x128xf32> to vector<8x128xf32>
    %691 = arith.mulf %689, %690 : vector<8x128xf32>
    %692 = tpu.concatenate %682, %685, %679, %688, %691 in 0 : vector<8x128xf32>, vector<8x128xf32>, vector<8x128xf32>, vector<8x128xf32>, vector<8x128xf32> -> vector<40x128xf32>
    %c264 = arith.constant 264 : index
    %c0_210 = arith.constant 0 : index
    %693 = vector.load %arg1[%c264, %c0_210] : memref<280x128xf32, #tpu.memory_space<vmem>>, vector<8x40xf32>
    %cst_211 = arith.constant dense<0.000000e+00> : vector<8x128xf32>
    %694 = tpu.matmul %693, %692, %cst_211 {dimension_numbers = #tpu.dot_dimension_numbers<[1], [0], [0], [1], [0, 0, 1, 1], [], []>} : vector<8x40xf32>, vector<40x128xf32>, vector<8x128xf32> -> vector<8x128xf32>
    %c0_212 = arith.constant 0 : index
    %c18 = arith.constant 18 : index
    %695 = vector.load %arg2[%c0_212, %c18] : memref<32x128xf32, #tpu.memory_space<vmem>>, vector<8x1xf32>
    %696 = vector.broadcast %695 : vector<8x1xf32> to vector<8x128xf32>
    %697 = arith.addf %694, %696 : vector<8x128xf32>
    %698 = arith.addf %625, %697 : vector<8x128xf32>
    %699 = arith.addf %552, %698 : vector<8x128xf32>
    %cst_213 = arith.constant 0.000000e+00 : f32
    %700 = vector.broadcast %cst_213 : f32 to vector<8x128xf32>
    %701 = arith.cmpf ogt, %699, %700 : vector<8x128xf32>
    %cst_214 = arith.constant 1.000000e-01 : f32
    %702 = vector.broadcast %cst_214 : f32 to vector<8x128xf32>
    %703 = arith.mulf %702, %699 : vector<8x128xf32>
    %704 = arith.select %701, %699, %703 : vector<8x128xi1>, vector<8x128xf32>
    %c3_i32_215 = arith.constant 3 : i32
    %705 = tpu.dynamic_rotate %704 by %c3_i32_215 dim 1 : vector<8x128xf32>, i32 -> vector<8x128xf32>
    %706 = vector.broadcast %510 : vector<1x128xf32> to vector<8x128xf32>
    %707 = arith.mulf %705, %706 : vector<8x128xf32>
    %c2_i32_216 = arith.constant 2 : i32
    %708 = tpu.dynamic_rotate %704 by %c2_i32_216 dim 1 : vector<8x128xf32>, i32 -> vector<8x128xf32>
    %709 = vector.broadcast %571 : vector<1x128xf32> to vector<8x128xf32>
    %710 = arith.mulf %708, %709 : vector<8x128xf32>
    %c1_i32_217 = arith.constant 1 : i32
    %711 = tpu.dynamic_rotate %704 by %c1_i32_217 dim 1 : vector<8x128xf32>, i32 -> vector<8x128xf32>
    %712 = vector.broadcast %449 : vector<1x128xf32> to vector<8x128xf32>
    %713 = arith.mulf %711, %712 : vector<8x128xf32>
    %c127_i32_218 = arith.constant 127 : i32
    %714 = tpu.dynamic_rotate %704 by %c127_i32_218 dim 1 : vector<8x128xf32>, i32 -> vector<8x128xf32>
    %715 = vector.broadcast %465 : vector<1x128xf32> to vector<8x128xf32>
    %716 = arith.mulf %714, %715 : vector<8x128xf32>
    %c126_i32_219 = arith.constant 126 : i32
    %717 = tpu.dynamic_rotate %704 by %c126_i32_219 dim 1 : vector<8x128xf32>, i32 -> vector<8x128xf32>
    %718 = vector.broadcast %593 : vector<1x128xf32> to vector<8x128xf32>
    %719 = arith.mulf %717, %718 : vector<8x128xf32>
    %c125_i32_220 = arith.constant 125 : i32
    %720 = tpu.dynamic_rotate %704 by %c125_i32_220 dim 1 : vector<8x128xf32>, i32 -> vector<8x128xf32>
    %721 = vector.broadcast %526 : vector<1x128xf32> to vector<8x128xf32>
    %722 = arith.mulf %720, %721 : vector<8x128xf32>
    %723 = tpu.concatenate %707, %710, %713, %704, %716, %719, %722 in 0 : vector<8x128xf32>, vector<8x128xf32>, vector<8x128xf32>, vector<8x128xf32>, vector<8x128xf32>, vector<8x128xf32>, vector<8x128xf32> -> vector<56x128xf32>
    %c272 = arith.constant 272 : index
    %c0_221 = arith.constant 0 : index
    %724 = vector.load %arg1[%c272, %c0_221] : memref<280x128xf32, #tpu.memory_space<vmem>>, vector<1x56xf32>
    %cst_222 = arith.constant dense<0.000000e+00> : vector<1x128xf32>
    %725 = tpu.matmul %724, %723, %cst_222 {dimension_numbers = #tpu.dot_dimension_numbers<[1], [0], [0], [1], [0, 0, 1, 1], [], []>} : vector<1x56xf32>, vector<56x128xf32>, vector<1x128xf32> -> vector<1x128xf32>
    %c0_223 = arith.constant 0 : index
    %c19 = arith.constant 19 : index
    %726 = vector.load %arg2[%c0_223, %c19] : memref<32x128xf32, #tpu.memory_space<vmem>>, vector<1x1xf32>
    %727 = vector.broadcast %726 : vector<1x1xf32> to vector<1x128xf32>
    %728 = arith.addf %725, %727 : vector<1x128xf32>
    %729 = math.tanh %728 : vector<1x128xf32>
    %c0_224 = arith.constant 0 : index
    %c0_225 = arith.constant 0 : index
    %730 = vector.load %arg3[%c0_224, %c0_225] : memref<1x128xf32, #tpu.memory_space<vmem>>, vector<1x128xf32>
    tpu.vector_store %arg3[%c0_224, %c0_225], %729 {strides = array<i32>} : memref<1x128xf32, #tpu.memory_space<vmem>>, vector<1x128xf32>,
    return
  }
}

</mosaic_0001>

<bundles_post_ra>
// kernel: squeeze.1
= control target key start
LH: loop header
LB: loop body
LE: loop exit
PB: predicated region body
PF: predicated region fallthrough
CT: control target
= control target key end

     0   :  { %s85_s0 = inlined_call_operand.vmem [shape: f32[128], index: 0, kind: input, shape index: {}]   ;;  %s86_s1 = inlined_call_operand.hbm [shape: f32[2,64], index: 1, kind: output, shape index: {}]  }
   0x1   :  { %v5_v0 = vld [vmem:[%s85_s0] sm:$0x1] }
   0x2   :  { %2 = vsyncpa [#allocation1], 0  ;;  %6 = vst [vmem:[#allocation3] sm:$0x1] %v5_v0  ;;  %vm8_vm0 = vcmask 523264   ;;  %s58_s0 = smov 64  }
   0x3   :  { %s59_s8 = smov [#allocation0]  }
   0x4   :  { %s26_s9 = sshll.u32 %s59_s8, 4  ;;  %s27_s9 = int_to_ptr.vmem [resolvable:$true] %s26_s9 }
   0x5   :  { %s34_s10 = scalar_lea.vmem %s27_s9, 32  ;;  %p39_p1 = scmp.lt.s32.totalorder %s27_s9, %s27_s9 }
   0x6   :  { %p35_p0 = scmp.ne.s32.totalorder %s27_s9, %s34_s10  ;;  %p40_p2 = scmp.lt.s32.totalorder %s34_s10, %s34_s10 }
   0x8   :  { %p41_p3 = por %p40_p2, %p39_p1 }
   0x9   :  { %v10_v1 = vld [vmem:[#allocation3] sm:$0x1]  }
   0xa   :  { %v7_v2 = vld [vmem:[#allocation3] sm:$0x1]   ;;  %11 = vrot.lane.b32.xlu0 %v10_v1, %s58_s0  ;;  %p42_p4 = pnand %p41_p3, %p35_p0 }
   0xb   :  { %9 = vst.msk [vmem:[#allocation2] sm:$0x1] %vm8_vm0, %v7_v2  }
  0x7c   :  { %v12_v3 = vpop.permute.xlu0 %11  }
  0x7d   :  { %15 = vst.msk [vmem:[#allocation2 + $0x1] sm:$0x1] %vm8_vm0, %v12_v3  }
  0x84   :  { %v19_v4 = vld [vmem:[#allocation2] sm:$0x3] }
  0x85   :  { %21 = vst [vmem:[#allocation0] sm:$0x3] %v19_v4 }
  0x86   :  { %45 = shalt.err (!%p42_p4)
}
  0x87   :  { %s46_s13 = scalar_lea.hbm %s86_s1, 32 }
  0x88   :  { %p47_p5 = scmp.ne.s32.totalorder %s86_s1, %s46_s13  ;;  %p50_p6 = scmp.lt.u32.totalorder %s46_s13, %s86_s1 }
  0x8a   :  { %p52_p7 = pnand %p50_p6, %p47_p5 }
  0x8c   :  { %55 = shalt.err (!%p52_p7)
}
  0x8d   :  { %29 = dma.vmem_to_hbm [thread:$0]  %s27_s9, 32, %s86_s1, [#allocation1]  }
  0x8e   :  { %56 = dma.done.wait [#allocation1], 32  }
  0x8f   :  { %57 = vsyncadd [#allocation1], 4294967264 }
  0x90   :  { %31 = vsyncpa [#allocation1], 1 }

// kernel: _lambda_.1
= control target key start
LH: loop header
LB: loop body
LE: loop exit
PB: predicated region body
PF: predicated region fallthrough
CT: control target
= control target key end

     0   :  { %8 = vsyncpa [#allocation3], 0  ;;  %s4051_s12 = smov [#allocation2]   ;;  %s5144_s0 = inlined_call_operand.vmem [shape: f32[8,128], index: 0, kind: input, shape index: {}]   ;;  %s5145_s1 = inlined_call_operand.hbm [shape: f32[280,128], index: 1, kind: input, shape index: {}]   ;;  %s5146_s2 = inlined_call_operand.vmem [shape: f32[32,128], index: 2, kind: input, shape index: {}]   ;;  %s5147_s3 = inlined_call_operand.vmem [shape: f32[1,128], index: 3, kind: output, shape index: {}]  }
   0x1   :  { %s16_s13 = sshll.u32 %s4051_s12, 4  ;;  %s4027_s16 = scalar_lea.hbm %s5145_s1, 4480  ;;  %s17_s13 = int_to_ptr.vmem [resolvable:$true] %s16_s13 }
   0x2   :  { %p4028_p0 = scmp.ne.s32.totalorder %s5145_s1, %s4027_s16  ;;  %p4031_p1 = scmp.lt.u32.totalorder %s4027_s16, %s5145_s1 }
   0x4   :  { %p4033_p2 = pnand %p4031_p1, %p4028_p0 }
   0x6   :  { %4036 = shalt.err (!%p4033_p2)
}
   0x7   :  { %s4037_s21 = scalar_lea.vmem %s17_s13, 4480  ;;  %p4042_p4 = scmp.lt.s32.totalorder %s17_s13, %s17_s13 }
   0x8   :  { %p4038_p3 = scmp.ne.s32.totalorder %s17_s13, %s4037_s21  ;;  %p4043_p5 = scmp.lt.s32.totalorder %s4037_s21, %s4037_s21 }
   0xa   :  { %p4044_p6 = por %p4043_p5, %p4042_p4 }
   0xc   :  { %p4045_p7 = pnand %p4044_p6, %p4038_p3 }
   0xe   :  { %4048 = shalt.err (!%p4045_p7)
}
   0xf   :  { %s4052_s22 = smov 128   ;;  %s4053_s23 = smov 8  }
  0x10   :  { %22 = dma.hbm_to_vmem [thread:$0]  %s5145_s1, 4480, %s17_s13, [#allocation3], %s4052_s22, %s4052_s22, %s4053_s23  }
  0x11   :  { %4049 = dma.done.wait [#allocation3], 4480  }
  0x12   :  { %4050 = vsyncadd [#allocation3], 4294962816  ;;  %v4121_v0 = vld [vmem:[%s5144_s0] sm:$0xff]  ;;  %s4054_s28 = smov 3   ;;  %s4055_s29 = smov 1   ;;  %vm5149_vm0 = vcmask 457728   ;;  %v28_v7 = vlaneseq }
  0x13   :  { %31 = vrot.lane.b32.xlu0 %v4121_v0, %s4054_s28  ;;  %53 = vrot.lane.b32.xlu1 %v4121_v0, %s4055_s29  ;;  %s4056_s30 = smov 2   ;;  %s4057_s1 = smov 127   ;;  %v95_v1 = vld [vmem:[#allocation2] sm:$0xff]  ;;  %v4139_v2 = vld [vmem:[%s5146_s2 + $0x8] sm:$0xff]  ;;  %v4060_v4 = vmov 0   ;;  %v101_v5 = vld [vmem:[%s5146_s2 + $0x10] sm:$0xff] }
  0x14   :  { %s4058_s0 = smov 126   ;;  %s4059_s4 = smov 125   ;;  %3158 = vmatprep.mubr.msk.f32.mxu0 %vm5149_vm0, %v95_v1  ;;  %v4144_v3 = vld [vmem:[%s5146_s2] sm:$0xff]  ;;  %3993 = vset.pattern.permute.xlu1 %v4060_v4  ;;  %v102_v6 = vld [vmem:[%s5146_s2 + $0x18] sm:$0xff]  ;;  %v4155_v8 = vand.u32 127, %v28_v7  ;;  %v4061_v13 = vmov 0.0  }
  0x15   :  { %3992 = vset.pattern.permute.xlu0 %v4060_v4  ;;  %v96_v34 = vld [vmem:[#allocation2 + $0x8] sm:$0xff]  ;;  %v97_v35 = vld [vmem:[#allocation2 + $0x10] sm:$0xff]  ;;  %v98_v36 = vld [vmem:[#allocation2 + $0x18] sm:$0xff]  ;;  %v4249_v60 = vshrl.u32 %v28_v7, 7  ;;  %s4069_s17 = smov 6   ;;  %s4070_s18 = smov 122  }
  0x16   :  { %vm5148_vm1 = vcmp.ge.s32.totalorder %v4155_v8, 3  ;;  %vm34_vm2 = vcmp.lt.s32.totalorder %v4155_v8, 16  ;;  %vm36_vm3 = vcmp.ge.s32.totalorder %v4155_v8, 19  ;;  %vm5155_vm4 = vcmp.lt.s32.totalorder %v4155_v8, 32  ;;  %v257_v59 = vld [vmem:[#allocation2 + $0x20] sm:$0xff] }
  0x17   :  { %43 = vrot.lane.b32.xlu0 %v4121_v0, %s4056_s30  ;;  %63 = vrot.lane.b32.xlu1 %v4121_v0, %s4057_s1  ;;  %vm4163_vm5 = vmand %vm5148_vm1, %vm34_vm2  ;;  %vm5150_vm7 = vcmp.ge.s32.totalorder %v4155_v8, 1  ;;  %vm57_vm8 = vcmp.ge.s32.totalorder %v4155_v8, 17  ;;  %vm5152_vm10 = vcmp.ge.s32.totalorder %v4155_v8, 2  ;;  %vm47_vm12 = vcmp.ge.s32.totalorder %v4155_v8, 18 }
  0x18   :  { %vm4169_vm6 = vmand %vm36_vm3, %vm5155_vm4  ;;  %vm68_vm15 = vcmp.ge.s32.totalorder %v4155_v8, 16  ;;  %vm5154_vm3 = vcmp.lt.s32.totalorder %v4155_v8, 31  ;;  %vm66_vm9 = vcmp.lt.s32.totalorder %v4155_v8, 15  ;;  %v4252_v61 = vadd.s32 8, %v4249_v60 }
  0x19   :  { %vm56_vm11 = vmand %vm5150_vm7, %vm34_vm2  ;;  %vm5151_vm7 = vcmp.lt.s32.totalorder %v4155_v8, 30  ;;  %v376_v62 = vmul.u32 2, %v4249_v60  ;;  %v4256_v63 = vadd.s32 16, %v4249_v60  ;;  %v4262_v1 = vadd.s32 32, %v4249_v60 }
  0x1a   :  { %vm58_vm13 = vmand %vm57_vm8, %vm5155_vm4  ;;  %v4265_v4 = vadd.s32 40, %v4249_v60  ;;  %v377_v7 = vmul.u32 2, %v4252_v61 }
  0x1b   :  { %75 = vrot.lane.b32.xlu0 %v4121_v0, %s4058_s0  ;;  %85 = vrot.lane.b32.xlu1 %v4121_v0, %s4059_s4  ;;  %vm4187_vm14 = vmand %vm5152_vm10, %vm34_vm2  ;;  %v440_v9 = vadd.s32 1, %v376_v62  ;;  %v378_v10 = vmul.u32 2, %v4256_v63 }
  0x1c   :  { %vm48_vm1 = vmand %vm47_vm12, %vm5155_vm4 }
  0x1d   :  { %vm59_vm0 = vmor %vm56_vm11, %vm58_vm13  ;;  %vm77_vm11 = vcmp.lt.s32.totalorder %v4155_v8, 14 }
  0x1e   :  { %vm70_vm2 = vmand %vm68_vm15, %vm5154_vm3  ;;  %v4204_v14 = vsel %vm59_vm0, 1.0, %v4061_v13 }
  0x1f   :  { %110 = vperm.xlu1 %3993, %v4139_v2   ;;  %105 = vperm.xlu0 %3992, %v4144_v3   ;;  %vm49_vm8 = vmor %vm4187_vm14, %vm48_vm1  ;;  %vm5153_vm14 = vcmp.lt.s32.totalorder %v4155_v8, 29 }
  0x20   :  { %vm80_vm12 = vmand %vm68_vm15, %vm5151_vm7  ;;  %v2759_v17 = vsel %vm49_vm8, 1.0, %v4061_v13 }
  0x21   :  { %vm71_vm13 = vmor %vm66_vm9, %vm70_vm2  ;;  %vm87_vm9 = vcmp.lt.s32.totalorder %v4155_v8, 13 }
  0x22   :  { %vm5177_vm1 = vmor %vm4163_vm5, %vm4169_vm6  ;;  %v4221_v20 = vsel %vm71_vm13, 1.0, %v4061_v13 }
  0x23   :  { %115 = vperm.xlu1 %3993, %v101_v5   ;;  %120 = vperm.xlu0 %3992, %v102_v6   ;;  %v2758_v16 = vsel %vm5177_vm1, 1.0, %v4061_v13  ;;  %vm81_vm0 = vmor %vm77_vm11, %vm80_vm12  ;;  %v4268_v5 = vadd.s32 48, %v4249_v60  ;;  %v4271_v6 = vadd.s32 56, %v4249_v60 }
  0x24   :  { %v2762_v24 = vsel %vm81_vm0, 1.0, %v4061_v13  ;;  %vm90_vm5 = vmand %vm68_vm15, %vm5153_vm14  ;;  %vm5178_vm15 = vcmask 457728   ;;  %vm261_vm0 = vcmask 785408  }
  0x25   :  { %vm91_vm6 = vmor %vm87_vm9, %vm90_vm5  ;;  %3188 = vmatprep.mubr.msk.f32.mxu1 %vm261_vm0, %v257_v59  ;;  %vm456_vm9 = vcmp.eq.s32.totalorder %v4155_v8, %v440_v9 }
  0x26   :  { %v2763_v31 = vsel %vm91_vm6, 1.0, %v4061_v13  ;;  %vm5179_vm2 = vmmov %vm5178_vm15 }
  0x27   :  { %vm5180_vm8 = vmmov %vm5179_vm2 }
  0x85   :  { %v32_v12 = vpop.permute.xlu0 %31  ;;  %v54_v15 = vpop.permute.xlu1 %53 }
  0x86   :  { %v62_v18 = vmul.f32 %v4204_v14, %v54_v15  ;;  %v42_v22 = vmul.f32 %v2758_v16, %v32_v12  ;;  %v380_v12 = vmul.u32 2, %v4262_v1  ;;  %v4280_v15 = vadd.s32 64, %v4249_v60 }
  0x87   :  { %v4283_v16 = vadd.s32 72, %v4249_v60 }
  0x88   :  { %v3610_v25 = vpack.c.bf16 %v4121_v0, %v62_v18  ;;  %v4259_v0 = vadd.s32 24, %v4249_v60  ;;  %v442_v18 = vadd.s32 1, %v378_v10 }
  0x89   :  { %v44_v19 = vpop.permute.xlu0 %43  ;;  %v64_v21 = vpop.permute.xlu1 %63 }
  0x8a   :  { %v52_v23 = vmul.f32 %v2759_v17, %v44_v19  ;;  %v74_v27 = vmul.f32 %v4221_v20, %v64_v21  ;;  %v379_v11 = vmul.u32 2, %v4259_v0  ;;  %v441_v17 = vadd.s32 1, %v377_v7 }
  0x8b   :  { %v381_v19 = vmul.u32 2, %v4265_v4  ;;  %vm458_vm6 = vcmp.eq.s32.totalorder %v4155_v8, %v442_v18 }
  0x8c   :  { %v3606_v26 = vpack.c.bf16 %v52_v23, %v42_v22  ;;  %v443_v21 = vadd.s32 1, %v379_v11  ;;  %v444_v22 = vadd.s32 1, %v380_v12  ;;  %v382_v23 = vmul.u32 2, %v4268_v5 }
  0x8d   :  { %v76_v28 = vpop.permute.xlu0 %75  ;;  %v86_v32 = vpop.permute.xlu1 %85  ;;  %vm457_vm5 = vcmp.eq.s32.totalorder %v4155_v8, %v441_v17  ;;  %vm397_vm3 = vcmp.eq.s32.totalorder %v4155_v8, %v381_v19  ;;  %v5211_v5 = vmov 0 }
  0x8e   :  { %3607 = vmatprep.subr.bf16.mxu0 %v3606_v26  ;;  %v84_v29 = vmul.f32 %v2762_v24, %v76_v28  ;;  %v94_v33 = vmul.f32 %v2763_v31, %v86_v32  ;;  %v383_v24 = vmul.u32 2, %v4271_v6  ;;  %v446_v28 = vadd.s32 1, %v382_v23 }
  0x8f   :  { %3609 = vmatpush3.bf16.msra.mxu0 %v3606_v26  ;;  %v4302_v26 = vadd.s32 80, %v4249_v60  ;;  %v4062_v31 = vmov 1.0|1.0   ;;  %v5183_v32 = vmov 0 }
  0x90   :  { %v3614_v30 = vpack.c.bf16 %v84_v29, %v74_v27  ;;  %3611 = vmatprep.subr.bf16.mxu0 %v3610_v25  ;;  %v5181_v27 = vmov 0  ;;  %v447_v29 = vadd.s32 1, %v383_v24  ;;  %vm399_vm4 = vcmp.eq.s32.totalorder %v4155_v8, %v383_v24 }
  0x93   :  { %3613 = vmatpush3.bf16.msra.mxu0 %v3610_v25  ;;  %v445_v25 = vadd.s32 1, %v381_v19 }
  0x94   :  { %3615 = vmatprep.subr.bf16.mxu0 %v3614_v30 }
  0x97   :  { %3617 = vmatpush3.bf16.msra.mxu0 %v3614_v30  ;;  %v384_v30 = vmul.u32 2, %v4280_v15 }
  0x98   :  { %3156 = vmatprep.subr.mxu0 %v94_v33 }
  0x9b   :  { %3157 = vmatpush3.msra.mxu0 %v94_v33  ;;  %v385_v33 = vmul.u32 2, %v4283_v16 }
  0x9c   :  { %3159 = vmatmul.mubr.msk.f32.vlgmr.msra.gmra.mrb[0].mxu0 %vm5178_vm15, %v96_v34  ;;  %vm4304_vm15 = vmpackc.low %vm457_vm5, %vm456_vm9  ;;  %v4325_v34 = vadd.s32 88, %v4249_v60  ;;  %vm463_vm9 = vcmp.eq.s32.totalorder %v4155_v8, %v447_v29 }
  0x9d   :  { %3161 = vmatprep.mubr.msk.f32.mxu0 %vm5179_vm2, %v97_v35  ;;  %v5182_v27 = vsel %vm4304_vm15, 4294967295, %v5181_v27  ;;  %vm459_vm2 = vcmp.eq.s32.totalorder %v4155_v8, %v443_v21  ;;  %3643 = vmatprep.subr.msk.bf16.mxu0 %vm4304_vm15, %v4062_v31  ;;  %v5185_v35 = vmov 0 }
  0x9e   :  { %v106_v37 = vpop.permute.xlu0 %105  ;;  %v111_v38 = vpop.permute.xlu1 %110  ;;  %3645 = vmatpush3.bf16.msk.msra.mxu0 %vm4304_vm15, %v4062_v31  ;;  %vm692_vm15 = vcmp.ge.s32.totalorder %v4155_v8, 32 }
  0xa0   :  { %3162 = vmatmul.mubr.msk.f32.gmra.mrb[2].mxu0 %vm5180_vm8, %v98_v36  ;;  %vm4317_vm8 = vmpackc.low %vm459_vm2, %vm458_vm6  ;;  %v448_v36 = vadd.s32 1, %v384_v30 }
  0xa1   :  { %v5184_v32 = vsel %vm4317_vm8, 4294967295, %v5183_v32  ;;  %3647 = vmatprep.subr.msk.bf16.mxu0 %vm4317_vm8, %v4062_v31 }
  0xa2   :  { %v121_v45 = vpop.permute.xlu0 %120  ;;  %v116_v47 = vpop.permute.xlu1 %115  ;;  %3649 = vmatpush3.bf16.msk.msra.mxu0 %vm4317_vm8, %v4062_v31  ;;  %vm464_vm6 = vcmp.eq.s32.totalorder %v4155_v8, %v448_v36 }
 0x16f   :  { %v3160_v39 = vpop.f32.mrb[0].mxu0 }
 0x170   :  { %v208_v40 = vadd.f32 %v3160_v39, %v111_v38  ;;  %v202_v41 = vpop.f32.mrb[1].mxu0  ;;  %v449_v38 = vadd.s32 1, %v385_v33  ;;  %v387_v39 = vmul.u32 2, %v4325_v34 }
 0x171   :  { %v203_v42 = vadd.f32 %v202_v41, %v106_v37  ;;  %v386_v37 = vmul.u32 2, %v4302_v26  ;;  %v4349_v41 = vadd.s32 104, %v4249_v60 }
 0x172   :  { %v226_v43 = vmul.f32 0.1, %v208_v40  ;;  %vm222_vm11 = vcmp.gt.f32.partialorder %v208_v40, 0.0  ;;  %vm465_vm2 = vcmp.eq.s32.totalorder %v4155_v8, %v449_v38 }
 0x173   :  { %v225_v44 = vmul.f32 0.1, %v203_v42  ;;  %v3163_v46 = vpop.f32.mrb[2].mxu0  ;;  %vm221_vm12 = vcmp.gt.f32.partialorder %v203_v42, 0.0 }
 0x174   :  { %v218_v48 = vadd.f32 %v3163_v46, %v121_v45  ;;  %v212_v49 = vpop.f32.mrb[3].mxu0  ;;  %v230_v50 = vsel %vm222_vm11, %v208_v40, %v226_v43  ;;  %vm460_vm11 = vcmp.eq.s32.totalorder %v4155_v8, %v444_v22  ;;  %v4346_v40 = vadd.s32 96, %v4249_v60 }
 0x175   :  { %v213_v51 = vadd.f32 %v212_v49, %v116_v47  ;;  %235 = vrot.lane.b32.xlu0 %v230_v50, %s4055_s29  ;;  %v229_v52 = vsel %vm221_vm12, %v203_v42, %v225_v44  ;;  %vm461_vm12 = vcmp.eq.s32.totalorder %v4155_v8, %v445_v25  ;;  %v5187_v42 = vmov 0 }
 0x176   :  { %v228_v53 = vmul.f32 0.1, %v218_v48  ;;  %233 = vrot.lane.b32.xlu1 %v229_v52, %s4055_s29  ;;  %vm224_vm13 = vcmp.gt.f32.partialorder %v218_v48, 0.0  ;;  %v4237_v54 = vpack.c.bf16 %v230_v50, %v229_v52  ;;  %v450_v43 = vadd.s32 1, %v386_v37 }
 0x177   :  { %v227_v55 = vmul.f32 0.1, %v213_v51  ;;  %vm223_vm1 = vcmp.gt.f32.partialorder %v213_v51, 0.0  ;;  %v451_v44 = vadd.s32 1, %v387_v39  ;;  %v388_v45 = vmul.u32 2, %v4346_v40 }
 0x178   :  { %v232_v56 = vsel %vm224_vm13, %v218_v48, %v228_v53  ;;  %vm4333_vm13 = vmpackc.low %vm461_vm12, %vm460_vm11  ;;  %v389_v46 = vmul.u32 2, %v4349_v41  ;;  %v5189_v47 = vmov 0  ;;  %vm466_vm12 = vcmp.eq.s32.totalorder %v4155_v8, %v450_v43 }
 0x179   :  { %239 = vrot.lane.b32.xlu0 %v232_v56, %s4055_s29  ;;  %v231_v57 = vsel %vm223_vm1, %v213_v51, %v227_v55  ;;  %v5186_v35 = vsel %vm4333_vm13, 4294967295, %v5185_v35  ;;  %vm462_vm1 = vcmp.eq.s32.totalorder %v4155_v8, %v446_v28  ;;  %3651 = vmatprep.subr.msk.bf16.mxu0 %vm4333_vm13, %v4062_v31  ;;  %vm4375_vm11 = vmpackc.low %vm465_vm2, %vm464_vm6  ;;  %v452_v48 = vadd.s32 1, %v388_v45 }
 0x17a   :  { %237 = vrot.lane.b32.xlu1 %v231_v57, %s4055_s29  ;;  %v4241_v58 = vpack.c.bf16 %v232_v56, %v231_v57  ;;  %vm4357_vm5 = vmpackc.low %vm463_vm9, %vm462_vm1  ;;  %3653 = vmatpush3.bf16.msk.msra.mxu0 %vm4333_vm13, %v4062_v31  ;;  %v5190_v47 = vsel %vm4375_vm11, 4294967295, %v5189_v47  ;;  %vm467_vm1 = vcmp.eq.s32.totalorder %v4155_v8, %v451_v44  ;;  %v453_v49 = vadd.s32 1, %v389_v46 }
 0x17b   :  { %v5188_v42 = vsel %vm4357_vm5, 4294967295, %v5187_v42  ;;  %3655 = vmatprep.subr.msk.bf16.mxu0 %vm4357_vm5, %v4062_v31  ;;  %vm4391_vm9 = vmpackc.low %vm467_vm1, %vm466_vm12  ;;  %vm468_vm6 = vcmp.eq.s32.totalorder %v4155_v8, %v452_v48  ;;  %v5193_v51 = vmov 0 }
 0x17c   :  { %vm469_vm2 = vcmp.eq.s32.totalorder %v4155_v8, %v453_v49  ;;  %v258_v49 = vld [vmem:[#allocation2 + $0x28] sm:$0xff] }
 0x17d   :  { %247 = vrot.lane.b32.xlu0 %v230_v50, %s4057_s1  ;;  %v5191_v50 = vmov 0  ;;  %vm4403_vm7 = vmpackc.low %vm469_vm2, %vm468_vm6  ;;  %vm393_vm2 = vcmp.eq.s32.totalorder %v4155_v8, %v377_v7 }
 0x17e   :  { %245 = vrot.lane.b32.xlu1 %v229_v52, %s4057_s1  ;;  %3657 = vmatpush3.bf16.msk.msra.mxu0 %vm4357_vm5, %v4062_v31  ;;  %v5192_v50 = vsel %vm4391_vm9, 4294967295, %v5191_v50  ;;  %v5194_v51 = vsel %vm4403_vm7, 4294967295, %v5193_v51  ;;  %vm5214_vm5 = vcmp.ge.s32.totalorder %v4155_v8, 1 }
 0x17f   :  { %3659 = vmatprep.subr.msk.bf16.mxu0 %vm4375_vm11, %v4062_v31 }
 0x181   :  { %251 = vrot.lane.b32.xlu0 %v232_v56, %s4057_s1 }
 0x182   :  { %249 = vrot.lane.b32.xlu1 %v231_v57, %s4057_s1  ;;  %3661 = vmatpush3.bf16.msk.msra.mxu0 %vm4375_vm11, %v4062_v31  ;;  %vm5213_vm11 = vcmp.lt.s32.totalorder %v4155_v8, 32 }
 0x183   :  { %3663 = vmatprep.subr.msk.bf16.mxu0 %vm4391_vm9, %v4062_v31  ;;  %vm678_vm13 = vmand %vm5214_vm5, %vm5213_vm11  ;;  %vm5215_vm5 = vcmp.lt.s32.totalorder %v4155_v8, 31 }
 0x186   :  { %3665 = vmatpush3.bf16.msk.msra.mxu0 %vm4391_vm9, %v4062_v31  ;;  %vm405_vm9 = vcmp.eq.s32.totalorder %v4155_v8, %v389_v46 }
 0x187   :  { %3667 = vmatprep.subr.msk.bf16.mxu0 %vm4403_vm7, %v4062_v31 }
 0x18a   :  { %3669 = vmatpush3.bf16.msk.msra.mxu0 %vm4403_vm7, %v4062_v31  ;;  %vm403_vm7 = vcmp.eq.s32.totalorder %v4155_v8, %v387_v39 }
 0x1e7   :  { %v236_v52 = vpop.permute.xlu0 %235 }
 0x1e8   :  { %v242_v53 = vmul.f32 %v4204_v14, %v236_v52  ;;  %v234_v55 = vpop.permute.xlu1 %233  ;;  %v259_v52 = vld [vmem:[#allocation2 + $0x30] sm:$0xff] }
 0x1e9   :  { %v241_v56 = vmul.f32 %v4204_v14, %v234_v55 }
 0x1eb   :  { %v240_v57 = vpop.permute.xlu0 %239  ;;  %v3618_v59 = vpack.c.bf16 %v242_v53, %v241_v56  ;;  %v374_v53 = vadd.s32 112, %v4249_v60 }
 0x1ec   :  { %v244_v9 = vmul.f32 %v4204_v14, %v240_v57  ;;  %v238_v17 = vpop.permute.xlu1 %237 }
 0x1ed   :  { %v243_v18 = vmul.f32 %v4204_v14, %v238_v17  ;;  %3619 = vmatprep.subr.bf16.mxu1 %v3618_v59  ;;  %v390_v55 = vmul.u32 2, %v374_v53 }
 0x1ee   :  { %3621 = vmatpush3.bf16.msra.mxu1 %v3618_v59  ;;  %v5195_v59 = vmov 0 }
 0x1ef   :  { %v3622_v21 = vpack.c.bf16 %v244_v9, %v243_v18  ;;  %v248_v22 = vpop.permute.xlu0 %247  ;;  %v454_v56 = vadd.s32 1, %v390_v55 }
 0x1f0   :  { %v246_v25 = vpop.permute.xlu1 %245  ;;  %v254_v28 = vmul.f32 %v4221_v20, %v248_v22 }
 0x1f1   :  { %3623 = vmatprep.subr.bf16.mxu1 %v3622_v21  ;;  %v253_v29 = vmul.f32 %v4221_v20, %v246_v25  ;;  %vm470_vm12 = vcmp.eq.s32.totalorder %v4155_v8, %v454_v56 }
 0x1f2   :  { %3625 = vmatpush3.bf16.msra.mxu1 %v3622_v21 }
 0x1f3   :  { %3627 = vmatprep.subr.bf16.mxu1 %v4237_v54  ;;  %v252_v36 = vpop.permute.xlu0 %251  ;;  %v3634_v14 = vpack.c.bf16 %v254_v28, %v253_v29 }
 0x1f4   :  { %v250_v38 = vpop.permute.xlu1 %249  ;;  %v256_v43 = vmul.f32 %v4221_v20, %v252_v36 }
 0x1f5   :  { %v255_v44 = vmul.f32 %v4221_v20, %v250_v38  ;;  %v375_v20 = vadd.s32 120, %v4249_v60  ;;  %v5199_v60 = vmov 0 }
 0x1f6   :  { %3629 = vmatpush3.bf16.msra.mxu1 %v4237_v54  ;;  %v260_v54 = vld [vmem:[#allocation2 + $0x38] sm:$0xff] }
 0x1f7   :  { %3631 = vmatprep.subr.bf16.mxu1 %v4241_v58  ;;  %v3638_v48 = vpack.c.bf16 %v256_v43, %v255_v44 }
 0x1fa   :  { %3633 = vmatpush3.bf16.msra.mxu1 %v4241_v58  ;;  %v391_v58 = vmul.u32 2, %v375_v20 }
 0x1fb   :  { %3635 = vmatprep.subr.bf16.mxu1 %v3634_v14 }
 0x1fc   :  { %v455_v57 = vadd.s32 1, %v391_v58  ;;  %vm407_vm10 = vcmp.eq.s32.totalorder %v4155_v8, %v391_v58 }
 0x1fe   :  { %3637 = vmatpush3.bf16.msra.mxu1 %v3634_v14  ;;  %vm471_vm1 = vcmp.eq.s32.totalorder %v4155_v8, %v455_v57  ;;  %v701_v14 = vld [vmem:[#allocation2 + $0x48] sm:$0xff]  ;;  %v810_v57 = vld [vmem:[#allocation2 + $0x50] sm:$0xff] }
 0x1ff   :  { %3639 = vmatprep.subr.bf16.mxu1 %v3638_v48  ;;  %vm4435_vm6 = vmpackc.low %vm471_vm1, %vm470_vm12  ;;  %vm406_vm1 = vcmp.eq.s32.totalorder %v4155_v8, %v390_v55 }
 0x200   :  { %v5196_v59 = vsel %vm4435_vm6, 4294967295, %v5195_v59  ;;  %3671 = vmatprep.subr.msk.bf16.mxu0 %vm4435_vm6, %v4062_v31  ;;  %vm4460_vm14 = vmpackc.low %vm407_vm10, %vm406_vm1  ;;  %vm395_vm10 = vcmp.eq.s32.totalorder %v4155_v8, %v379_v11  ;;  %vm396_vm1 = vcmp.eq.s32.totalorder %v4155_v8, %v380_v12 }
 0x201   :  { %3673 = vmatpush3.bf16.msk.msra.mxu0 %vm4435_vm6, %v4062_v31  ;;  %v5200_v60 = vsel %vm4460_vm14, 4294967295, %v5199_v60  ;;  %vm401_vm6 = vcmp.eq.s32.totalorder %v4155_v8, %v385_v33  ;;  %v4064_v33 = vmov 2  }
 0x202   :  { %3641 = vmatpush3.bf16.msra.mxu1 %v3638_v48 }
 0x205   :  { %3189 = vmatmul.mubr.msk.f32.vlgmr.msra.gmra.mrb[0].mxu1 %vm261_vm0, %v258_v49 }
 0x206   :  { %3191 = vmatprep.mubr.msk.f32.mxu1 %vm261_vm0, %v259_v52 }
 0x209   :  { %3192 = vmatmul.mubr.msk.f32.gmra.mrb[2].mxu1 %vm261_vm0, %v260_v54  ;;  %vm392_vm0 = vcmp.eq.s32.totalorder %v4155_v8, %v376_v62  ;;  %v4063_v62 = vmov 1  }
 0x20a   :  { %vm4451_vm12 = vmpackc.low %vm393_vm2, %vm392_vm0  ;;  %3995 = vset.pattern.permute.xlu0 %v4063_v62  ;;  %3994 = vset.pattern.permute.xlu1 %v4063_v62  ;;  %vm394_vm0 = vcmp.eq.s32.totalorder %v4155_v8, %v378_v10  ;;  %v4065_v62 = vmov 3  }
 0x20b   :  { %3675 = vmatprep.subr.msk.bf16.mxu0 %vm4451_vm12, %v4062_v31  ;;  %663 = vperm.xlu0 %3995, %v4139_v2   ;;  %vm4472_vm2 = vmpackc.low %vm395_vm10, %vm394_vm0  ;;  %vm398_vm10 = vcmp.eq.s32.totalorder %v4155_v8, %v382_v23 }
 0x20c   :  { %658 = vperm.xlu1 %3994, %v4144_v3   ;;  %vm4488_vm0 = vmpackc.low %vm397_vm3, %vm396_vm1  ;;  %vm400_vm1 = vcmp.eq.s32.totalorder %v4155_v8, %v384_v30  ;;  %v700_v30 = vld [vmem:[#allocation2 + $0x40] sm:$0xff] }
 0x20d   :  { %vm4504_vm3 = vmpackc.low %vm399_vm4, %vm398_vm10  ;;  %vm402_vm10 = vcmp.eq.s32.totalorder %v4155_v8, %v386_v37 }
 0x20e   :  { %vm4520_vm4 = vmpackc.low %vm401_vm6, %vm400_vm1  ;;  %vm404_vm1 = vcmp.eq.s32.totalorder %v4155_v8, %v388_v45 }
 0x20f   :  { %vm4536_vm6 = vmpackc.low %vm403_vm7, %vm402_vm10  ;;  %3996 = vset.pattern.permute.xlu0 %v4064_v33 }
 0x210   :  { %vm4552_vm7 = vmpackc.low %vm405_vm9, %vm404_vm1  ;;  %vm5162_vm1 = vcmask 392192   ;;  %3997 = vset.pattern.permute.xlu1 %v4064_v33 }
 0x211   :  { %v5212_v5 = vsel %vm4552_vm7, 4294967295, %v5211_v5  ;;  %3276 = vmatprep.mubr.msk.f32.mxu1 %vm5162_vm1, %v700_v30  ;;  %v811_v30 = vld [vmem:[#allocation2 + $0x58] sm:$0xff] }
 0x28a   :  { %v664_v6 = vpop.permute.xlu0 %663 }
 0x28b   :  { %v659_v10 = vpop.permute.xlu1 %658 }
 0x2d8   :  { %v3190_v61 = vpop.f32.mrb[0].mxu1 }
 0x2d9   :  { %v340_v7 = vpop.f32.mrb[1].mxu1 }
 0x2dc   :  { %v3193_v17 = vpop.f32.mrb[2].mxu1 }
 0x2dd   :  { %v350_v18 = vpop.f32.mrb[3].mxu1 }
 0x2de   :  { %3226 = vmatprep.mubr.f32.mxu0 %v350_v18 }
 0x2df   :  { %3227 = vmatmul.mubr.f32.vlgmr.msra.gmra.mrb[4].mxu0 %v3193_v17 }
 0x2e0   :  { %3677 = vmatpush3.bf16.msk.msra.mxu0 %vm4451_vm12, %v4062_v31  ;;  %3261 = vmatprep.mubr.f32.mxu0 %v340_v7 }
 0x2e1   :  { %3679 = vmatprep.subr.msk.bf16.mxu0 %vm4472_vm2, %v4062_v31 }
 0x2e4   :  { %3681 = vmatpush3.bf16.msk.msra.mxu0 %vm4472_vm2, %v4062_v31 }
 0x2e5   :  { %3683 = vmatprep.subr.msk.bf16.mxu0 %vm4488_vm0, %v4062_v31 }
 0x2e8   :  { %3685 = vmatpush3.bf16.msk.msra.mxu0 %vm4488_vm0, %v4062_v31 }
 0x2e9   :  { %3687 = vmatprep.subr.msk.bf16.mxu0 %vm4504_vm3, %v4062_v31 }
 0x2ec   :  { %3689 = vmatpush3.bf16.msk.msra.mxu0 %vm4504_vm3, %v4062_v31 }
 0x2ed   :  { %3691 = vmatprep.subr.msk.bf16.mxu0 %vm4520_vm4, %v4062_v31 }
 0x2f0   :  { %3693 = vmatpush3.bf16.msk.msra.mxu0 %vm4520_vm4, %v4062_v31 }
 0x2f1   :  { %3695 = vmatprep.subr.msk.bf16.mxu0 %vm4536_vm6, %v4062_v31 }
 0x2f4   :  { %3697 = vmatpush3.bf16.msk.msra.mxu0 %vm4536_vm6, %v4062_v31 }
 0x2f5   :  { %3699 = vmatprep.subr.msk.bf16.mxu0 %vm4552_vm7, %v4062_v31 }
 0x2f8   :  { %3701 = vmatpush3.bf16.msk.msra.mxu0 %vm4552_vm7, %v4062_v31 }
 0x2f9   :  { %3703 = vmatprep.subr.msk.bf16.mxu0 %vm4460_vm14, %v4062_v31 }
 0x2fc   :  { %3705 = vmatpush3.bf16.msk.msra.mxu0 %vm4460_vm14, %v4062_v31  ;;  %vm5167_vm14 = vcmp.lt.s32.totalorder %v4155_v8, 63 }
 0x2fd   :  { %vm694_vm7 = vmand %vm692_vm15, %vm5167_vm14 }
 0x2fe   :  { %vm695_vm11 = vmor %vm5215_vm5, %vm694_vm7 }
 0x2ff   :  { %3262 = vmatmul.mubr.f32.vlgmr.msra.gmra.mrb[4].mxu0 %v3190_v61  ;;  %v4620_v46 = vsel %vm695_vm11, 1.0, %v4061_v13 }
 0x3d2   :  { %v3263_v11 = vpop.f32.mrb[4].mxu0 }
 0x3d3   :  { %v645_v12 = vpop.f32.mrb[5].mxu0  ;;  %v4571_v15 = vadd.f32 %v3263_v11, %v664_v6 }
 0x3d4   :  { %v4573_v16 = vadd.f32 %v659_v10, %v645_v12 }
 0x3d5   :  { %v671_v24 = vmul.f32 0.1, %v4571_v15  ;;  %vm669_vm10 = vcmp.gt.f32.partialorder %v4571_v15, 0.0 }
 0x3d6   :  { %vm668_vm9 = vcmp.gt.f32.partialorder %v4573_v16, 0.0  ;;  %v670_v19 = vmul.f32 0.1, %v4573_v16 }
 0x3d7   :  { %v4587_v26 = vsel %vm669_vm10, %v4571_v15, %v671_v24  ;;  %vm680_vm10 = vcmp.lt.s32.totalorder %v4155_v8, 64 }
 0x3d8   :  { %v4578_v23 = vsel %vm668_vm9, %v4573_v16, %v670_v19  ;;  %vm679_vm9 = vcmp.ge.s32.totalorder %v4155_v8, 33 }
 0x3d9   :  { %687 = vrot.lane.b32.xlu0 %v4578_v23, %s4057_s1  ;;  %674 = vrot.lane.b32.xlu1 %v4578_v23, %s4055_s29  ;;  %vm681_vm1 = vmand %vm679_vm9, %vm680_vm10  ;;  %v4626_v29 = vpack.c.bf16 %v4587_v26, %v4578_v23 }
 0x3da   :  { %vm682_vm8 = vmor %vm678_vm13, %vm681_vm1 }
 0x3db   :  { %v4607_v37 = vsel %vm682_vm8, 1.0, %v4061_v13  ;;  %vm5216_vm8 = vcmask 392192  }
 0x3dc   :  { %vm5217_vm1 = vmmov %vm5216_vm8 }
 0x3dd   :  { %676 = vrot.lane.b32.xlu1 %v4587_v26, %s4055_s29  ;;  %703 = vperm.xlu0 %3996, %v4144_v3   ;;  %vm5218_vm9 = vmmov %vm5217_vm1 }
 0x3e1   :  { %689 = vrot.lane.b32.xlu1 %v4587_v26, %s4057_s1  ;;  %3999 = vset.pattern.permute.xlu0 %v4065_v62 }
 0x3e5   :  { %707 = vperm.xlu1 %3997, %v4139_v2  }
 0x3e9   :  { %3998 = vset.pattern.permute.xlu1 %v4065_v62 }
 0x44b   :  { %v675_v34 = vpop.permute.xlu1 %674  ;;  %v688_v22 = vpop.permute.xlu0 %687 }
 0x44c   :  { %v685_v40 = vmul.f32 %v4607_v37, %v675_v34  ;;  %v698_v36 = vmul.f32 %v4620_v46, %v688_v22 }
 0x44f   :  { %v677_v39 = vpop.permute.xlu1 %676 }
 0x450   :  { %v686_v41 = vmul.f32 %v4607_v37, %v677_v39 }
 0x452   :  { %v4617_v45 = vpack.c.bf16 %v686_v41, %v685_v40 }
 0x453   :  { %v690_v25 = vpop.permute.xlu1 %689 }
 0x454   :  { %v699_v28 = vmul.f32 %v4620_v46, %v690_v25  ;;  %3707 = vmatprep.subr.bf16.mxu1 %v4617_v45 }
 0x455   :  { %3709 = vmatpush3.bf16.msra.mxu1 %v4617_v45 }
 0x456   :  { %3711 = vmatprep.subr.bf16.mxu1 %v4626_v29  ;;  %v4631_v38 = vpack.c.bf16 %v699_v28, %v698_v36 }
 0x459   :  { %3713 = vmatpush3.bf16.msra.mxu1 %v4626_v29 }
 0x45a   :  { %3715 = vmatprep.subr.bf16.mxu1 %v4631_v38 }
 0x45c   :  { %v704_v44 = vpop.permute.xlu0 %703 }
 0x45d   :  { %3717 = vmatpush3.bf16.msra.mxu1 %v4631_v38 }
 0x460   :  { %3277 = vmatmul.mubr.msk.f32.vlgmr.msra.gmra.mrb[4].mxu1 %vm5216_vm8, %v701_v14  ;;  %vm5219_vm8 = vmmov %vm5217_vm1 }
 0x461   :  { %3291 = vmatprep.mubr.msk.f32.mxu1 %vm5217_vm1, %v810_v57  ;;  %vm5221_vm1 = vcmp.ge.s32.totalorder %v4155_v8, 3 }
 0x464   :  { %v708_v43 = vpop.permute.xlu1 %707 }
 0x533   :  { %v3278_v48 = vpop.f32.mrb[4].mxu1 }
 0x534   :  { %v789_v49 = vadd.f32 %v3278_v48, %v708_v43  ;;  %v783_v52 = vpop.f32.mrb[5].mxu1 }
 0x535   :  { %v784_v54 = vadd.f32 %v783_v52, %v704_v44  ;;  %v4066_v52 = vmov 4  }
 0x536   :  { %v795_v53 = vmul.f32 0.1, %v789_v49  ;;  %vm793_vm13 = vcmp.gt.f32.partialorder %v789_v49, 0.0 }
 0x537   :  { %v794_v20 = vmul.f32 0.1, %v784_v54  ;;  %vm792_vm7 = vcmp.gt.f32.partialorder %v784_v54, 0.0 }
 0x538   :  { %v797_v55 = vsel %vm793_vm13, %v789_v49, %v795_v53  ;;  %v933_v49 = vld [vmem:[#allocation2 + $0x60] sm:$0xff]  ;;  %vm914_vm13 = vcmp.ge.s32.totalorder %v4155_v8, 35 }
 0x539   :  { %800 = vrot.lane.b32.xlu0 %v797_v55, %s4055_s29  ;;  %v796_v58 = vsel %vm792_vm7, %v784_v54, %v794_v20  ;;  %vm5220_vm7 = vcmp.lt.s32.totalorder %v4155_v8, 32 }
 0x53a   :  { %798 = vrot.lane.b32.xlu1 %v796_v58, %s4055_s29  ;;  %v3722_v56 = vpack.c.bf16 %v797_v55, %v796_v58 }
 0x53d   :  { %806 = vrot.lane.b32.xlu0 %v797_v55, %s4057_s1 }
 0x53e   :  { %804 = vrot.lane.b32.xlu1 %v796_v58, %s4057_s1 }
 0x541   :  { %817 = vperm.xlu0 %3999, %v4139_v2  }
 0x542   :  { %813 = vperm.xlu1 %3998, %v4144_v3  }
 0x545   :  { %4000 = vset.pattern.permute.xlu0 %v4066_v52 }
 0x546   :  { %4001 = vset.pattern.permute.xlu1 %v4066_v52 }
 0x5ab   :  { %v801_v61 = vpop.permute.xlu0 %800 }
 0x5ac   :  { %v803_v7 = vmul.f32 %v4607_v37, %v801_v61  ;;  %v799_v17 = vpop.permute.xlu1 %798 }
 0x5ad   :  { %v802_v18 = vmul.f32 %v4607_v37, %v799_v17 }
 0x5af   :  { %v3718_v6 = vpack.c.bf16 %v803_v7, %v802_v18  ;;  %v807_v10 = vpop.permute.xlu0 %806 }
 0x5b0   :  { %v805_v11 = vpop.permute.xlu1 %804  ;;  %v809_v12 = vmul.f32 %v4620_v46, %v807_v10 }
 0x5b1   :  { %v808_v19 = vmul.f32 %v4620_v46, %v805_v11  ;;  %3719 = vmatprep.subr.bf16.mxu1 %v3718_v6 }
 0x5b2   :  { %3721 = vmatpush3.bf16.msra.mxu1 %v3718_v6  ;;  %v934_v6 = vld [vmem:[#allocation2 + $0x68] sm:$0xff] }
 0x5b3   :  { %3723 = vmatprep.subr.bf16.mxu1 %v3722_v56  ;;  %v3726_v24 = vpack.c.bf16 %v809_v12, %v808_v19 }
 0x5b6   :  { %3725 = vmatpush3.bf16.msra.mxu1 %v3722_v56 }
 0x5b7   :  { %3727 = vmatprep.subr.bf16.mxu1 %v3726_v24 }
 0x5ba   :  { %3729 = vmatpush3.bf16.msra.mxu1 %v3726_v24 }
 0x5bd   :  { %3292 = vmatmul.mubr.msk.f32.vlgmr.msra.gmra.mrb[6].mxu1 %vm5218_vm9, %v811_v30  ;;  %vm913_vm9 = vmand %vm5221_vm1, %vm5220_vm7  ;;  %vm5222_vm7 = vcmp.lt.s32.totalorder %v4155_v8, 29 }
 0x5be   :  { %3306 = vmatprep.mubr.msk.f32.mxu1 %vm5219_vm8, %v933_v49  ;;  %vm5169_vm8 = vcmp.lt.s32.totalorder %v4155_v8, 61 }
 0x5bf   :  { %vm927_vm14 = vmand %vm692_vm15, %vm5169_vm8  ;;  %vm1411_vm8 = vcmp.lt.s32.totalorder %v4155_v8, 58 }
 0x5c0   :  { %v818_v33 = vpop.permute.xlu0 %817  ;;  %vm928_vm1 = vmor %vm5222_vm7, %vm927_vm14  ;;  %vm5223_vm14 = vcmask 392192   ;;  %vm5225_vm7 = vcmp.lt.s32.totalorder %v4155_v8, 32 }
 0x5c1   :  { %v814_v34 = vpop.permute.xlu1 %813  ;;  %v4688_v57 = vsel %vm928_vm1, 1.0, %v4061_v13  ;;  %vm5226_vm1 = vcmp.ge.s32.totalorder %v4155_v8, 2 }
 0x690   :  { %v3293_v39 = vpop.f32.mrb[6].mxu1 }
 0x691   :  { %v898_v40 = vadd.f32 %v3293_v39, %v818_v33  ;;  %v892_v41 = vpop.f32.mrb[7].mxu1 }
 0x692   :  { %v893_v22 = vadd.f32 %v892_v41, %v814_v34 }
 0x693   :  { %v4650_v25 = vadd.f32 %v898_v40, %v4571_v15 }
 0x694   :  { %v4653_v28 = vadd.f32 %v893_v22, %v4573_v16  ;;  %v1042_v22 = vld [vmem:[#allocation2 + $0x70] sm:$0xff] }
 0x695   :  { %vm904_vm5 = vcmp.gt.f32.partialorder %v4650_v25, 0.0  ;;  %v906_v36 = vmul.f32 0.1, %v4650_v25 }
 0x696   :  { %vm903_vm11 = vcmp.gt.f32.partialorder %v4653_v28, 0.0  ;;  %v905_v14 = vmul.f32 0.1, %v4653_v28 }
 0x697   :  { %v908_v43 = vsel %vm904_vm5, %v4650_v25, %v906_v36  ;;  %vm915_vm5 = vmand %vm914_vm13, %vm680_vm10  ;;  %v4067_v36 = vmov 6  }
 0x698   :  { %v907_v44 = vsel %vm903_vm11, %v4653_v28, %v905_v14  ;;  %vm916_vm11 = vmor %vm913_vm9, %vm915_vm5 }
 0x699   :  { %921 = vrot.lane.b32.xlu0 %v907_v44, %s4059_s4  ;;  %909 = vrot.lane.b32.xlu1 %v907_v44, %s4054_s28  ;;  %v3734_v48 = vpack.c.bf16 %v908_v43, %v907_v44  ;;  %v4677_v53 = vsel %vm916_vm11, 1.0, %v4061_v13  ;;  %vm5224_vm5 = vmmov %vm5223_vm14  ;;  %vm1140_vm11 = vcmp.ge.s32.totalorder %v4155_v8, 34 }
 0x69d   :  { %911 = vrot.lane.b32.xlu1 %v908_v43, %s4054_s28  ;;  %936 = vperm.xlu0 %4000, %v4144_v3  }
 0x6a1   :  { %923 = vrot.lane.b32.xlu1 %v908_v43, %s4059_s4  ;;  %4003 = vset.pattern.permute.xlu0 %v4067_v36 }
 0x6a5   :  { %940 = vperm.xlu1 %4001, %v4139_v2  }
 0x6a9   :  { %4002 = vset.pattern.permute.xlu1 %v4067_v36  ;;  %v1281_v36 = vld [vmem:[#allocation2 + $0x90] sm:$0xff] }
 0x70b   :  { %v910_v54 = vpop.permute.xlu1 %909  ;;  %v922_v62 = vpop.permute.xlu0 %921 }
 0x70c   :  { %v919_v55 = vmul.f32 %v4677_v53, %v910_v54  ;;  %v931_v17 = vmul.f32 %v4688_v57, %v922_v62 }
 0x70f   :  { %v912_v20 = vpop.permute.xlu1 %911 }
 0x710   :  { %v920_v58 = vmul.f32 %v4677_v53, %v912_v20 }
 0x712   :  { %v3730_v56 = vpack.c.bf16 %v920_v58, %v919_v55 }
 0x713   :  { %v924_v61 = vpop.permute.xlu1 %923 }
 0x714   :  { %v932_v7 = vmul.f32 %v4688_v57, %v924_v61  ;;  %3731 = vmatprep.subr.bf16.mxu1 %v3730_v56  ;;  %v1043_v61 = vld [vmem:[#allocation2 + $0x78] sm:$0xff] }
 0x715   :  { %3733 = vmatpush3.bf16.msra.mxu1 %v3730_v56 }
 0x716   :  { %3735 = vmatprep.subr.bf16.mxu1 %v3734_v48  ;;  %v3738_v18 = vpack.c.bf16 %v932_v7, %v931_v17  ;;  %v1159_v7 = vld [vmem:[#allocation2 + $0x80] sm:$0xff] }
 0x719   :  { %3737 = vmatpush3.bf16.msra.mxu1 %v3734_v48 }
 0x71a   :  { %3739 = vmatprep.subr.bf16.mxu1 %v3738_v18 }
 0x71c   :  { %v937_v11 = vpop.permute.xlu0 %936 }
 0x71d   :  { %3741 = vmatpush3.bf16.msra.mxu1 %v3738_v18 }
 0x720   :  { %3307 = vmatmul.mubr.msk.f32.vlgmr.msra.gmra.mrb[8].mxu1 %vm5223_vm14, %v934_v6  ;;  %vm1139_vm14 = vmand %vm5226_vm1, %vm5225_vm7  ;;  %vm5227_vm1 = vcmask 392192  }
 0x721   :  { %3321 = vmatprep.mubr.msk.f32.mxu1 %vm5224_vm5, %v1042_v22  ;;  %vm5168_vm5 = vcmp.lt.s32.totalorder %v4155_v8, 62 }
 0x722   :  { %vm1153_vm7 = vmand %vm692_vm15, %vm5168_vm5 }
 0x724   :  { %v941_v10 = vpop.permute.xlu1 %940 }
 0x7f3   :  { %v3308_v12 = vpop.f32.mrb[8].mxu1 }
 0x7f4   :  { %v1021_v19 = vadd.f32 %v3308_v12, %v941_v10  ;;  %v1015_v24 = vpop.f32.mrb[9].mxu1 }
 0x7f5   :  { %v1016_v30 = vadd.f32 %v1015_v24, %v937_v11 }
 0x7f6   :  { %v1027_v33 = vmul.f32 0.1, %v1021_v19  ;;  %vm1025_vm13 = vcmp.gt.f32.partialorder %v1021_v19, 0.0 }
 0x7f7   :  { %v1026_v34 = vmul.f32 0.1, %v1016_v30  ;;  %vm1024_vm9 = vcmp.gt.f32.partialorder %v1016_v30, 0.0 }
 0x7f8   :  { %v1029_v39 = vsel %vm1025_vm13, %v1021_v19, %v1027_v33  ;;  %vm1141_vm13 = vmand %vm1140_vm11, %vm680_vm10  ;;  %vm5170_vm11 = vcmask 654336   ;;  %v1160_v19 = vld [vmem:[#allocation2 + $0x88] sm:$0xff] }
 0x7f9   :  { %1032 = vrot.lane.b32.xlu0 %v1029_v39, %s4055_s29  ;;  %v1028_v40 = vsel %vm1024_vm9, %v1016_v30, %v1026_v34  ;;  %vm1142_vm9 = vmor %vm1139_vm14, %vm1141_vm13  ;;  %vm5228_vm14 = vcmp.lt.s32.totalorder %v4155_v8, 30  ;;  %3367 = vmatprep.mubr.msk.f32.mxu0 %vm5170_vm11, %v1281_v36 }
 0x7fa   :  { %1030 = vrot.lane.b32.xlu1 %v1028_v40, %s4055_s29  ;;  %v3746_v41 = vpack.c.bf16 %v1029_v39, %v1028_v40  ;;  %v4720_v52 = vsel %vm1142_vm9, 1.0, %v4061_v13  ;;  %vm1154_vm13 = vmor %vm5228_vm14, %vm1153_vm7 }
 0x7fb   :  { %v4735_v17 = vsel %vm1154_vm13, 1.0, %v4061_v13  ;;  %vm1384_vm13 = vcmp.ge.s32.totalorder %v4155_v8, 6 }
 0x7fd   :  { %1038 = vrot.lane.b32.xlu0 %v1029_v39, %s4057_s1 }
 0x7fe   :  { %1036 = vrot.lane.b32.xlu1 %v1028_v40, %s4057_s1 }
 0x801   :  { %1137 = vrot.lane.b32.xlu0 %v4587_v26, %s4056_s30 }
 0x802   :  { %1135 = vrot.lane.b32.xlu1 %v4578_v23, %s4056_s30 }
 0x805   :  { %1149 = vrot.lane.b32.xlu0 %v4587_v26, %s4058_s0 }
 0x806   :  { %1147 = vrot.lane.b32.xlu1 %v4578_v23, %s4058_s0 }
 0x809   :  { %1166 = vperm.xlu0 %4003, %v4139_v2  }
 0x80a   :  { %1162 = vperm.xlu1 %4002, %v4144_v3  }
 0x86b   :  { %v1033_v14 = vpop.permute.xlu0 %1032 }
 0x86c   :  { %v1035_v23 = vmul.f32 %v4607_v37, %v1033_v14  ;;  %v1031_v26 = vpop.permute.xlu1 %1030  ;;  %v4068_v14 = vmov 7  }
 0x86d   :  { %v1034_v43 = vmul.f32 %v4607_v37, %v1031_v26  ;;  %4004 = vset.pattern.permute.xlu0 %v4068_v14  ;;  %4005 = vset.pattern.permute.xlu1 %v4068_v14  ;;  %v4763_v26 = vld [vmem:[%s5146_s2 + $0x8] sm:$0xff] }
 0x86f   :  { %v3742_v2 = vpack.c.bf16 %v1035_v23, %v1034_v43  ;;  %v1039_v44 = vpop.permute.xlu0 %1038  ;;  %v4757_v23 = vld [vmem:[%s5146_s2] sm:$0xff] }
 0x870   :  { %v1037_v3 = vpop.permute.xlu1 %1036  ;;  %v1041_v48 = vmul.f32 %v4620_v46, %v1039_v44 }
 0x871   :  { %v1040_v49 = vmul.f32 %v4620_v46, %v1037_v3  ;;  %3743 = vmatprep.subr.bf16.mxu1 %v3742_v2 }
 0x872   :  { %3745 = vmatpush3.bf16.msra.mxu1 %v3742_v2 }
 0x873   :  { %3747 = vmatprep.subr.bf16.mxu1 %v3746_v41  ;;  %v1138_v54 = vpop.permute.xlu0 %1137  ;;  %v3750_v55 = vpack.c.bf16 %v1041_v48, %v1040_v49 }
 0x874   :  { %v1136_v20 = vpop.permute.xlu1 %1135  ;;  %v1146_v58 = vmul.f32 %v4720_v52, %v1138_v54 }
 0x875   :  { %v1145_v56 = vmul.f32 %v4720_v52, %v1136_v20 }
 0x876   :  { %3749 = vmatpush3.bf16.msra.mxu1 %v3746_v41 }
 0x877   :  { %3751 = vmatprep.subr.bf16.mxu1 %v3750_v55  ;;  %v3754_v62 = vpack.c.bf16 %v1146_v58, %v1145_v56  ;;  %v1150_v18 = vpop.permute.xlu0 %1149 }
 0x878   :  { %v1148_v6 = vpop.permute.xlu1 %1147  ;;  %v1158_v10 = vmul.f32 %v4735_v17, %v1150_v18 }
 0x879   :  { %v1157_v11 = vmul.f32 %v4735_v17, %v1148_v6 }
 0x87a   :  { %3753 = vmatpush3.bf16.msra.mxu1 %v3750_v55 }
 0x87b   :  { %3755 = vmatprep.subr.bf16.mxu1 %v3754_v62  ;;  %v3770_v12 = vpack.c.bf16 %v1158_v10, %v1157_v11 }
 0x87d   :  { %3322 = vmatmul.mubr.msk.f32.vlgmr.msra.gmra.mrb[10].mxu1 %vm5227_vm1, %v1043_v61 }
 0x87e   :  { %3757 = vmatpush3.bf16.msra.mxu1 %v3754_v62  ;;  %3344 = vmatprep.mubr.msk.f32.mxu1 %vm5170_vm11, %v1159_v7 }
 0x87f   :  { %3759 = vmatprep.subr.bf16.mxu1 %v4617_v45 }
 0x882   :  { %3761 = vmatpush3.bf16.msra.mxu1 %v4617_v45 }
 0x883   :  { %3763 = vmatprep.subr.bf16.mxu1 %v4626_v29 }
 0x886   :  { %3765 = vmatpush3.bf16.msra.mxu1 %v4626_v29 }
 0x887   :  { %3767 = vmatprep.subr.bf16.mxu1 %v4631_v38 }
 0x888   :  { %v1167_v24 = vpop.permute.xlu0 %1166 }
 0x889   :  { %v1163_v45 = vpop.permute.xlu1 %1162 }
 0x88a   :  { %3769 = vmatpush3.bf16.msra.mxu1 %v4631_v38 }
 0x88b   :  { %3771 = vmatprep.subr.bf16.mxu1 %v3770_v12 }
 0x88e   :  { %3773 = vmatpush3.bf16.msra.mxu1 %v3770_v12 }
 0x891   :  { %3345 = vmatmul.mubr.msk.f32.vlgmr.msra.gmra.mrb[12].mxu1 %vm5170_vm11, %v1160_v19 }
 0x964   :  { %v3346_v30 = vpop.f32.mrb[12].mxu1 }
 0x965   :  { %v1248_v33 = vadd.f32 %v3346_v30, %v1167_v24  ;;  %v1242_v34 = vpop.f32.mrb[13].mxu1  ;;  %v1282_v24 = vld [vmem:[#allocation2 + $0x98] sm:$0xff] }
 0x966   :  { %v1243_v39 = vadd.f32 %v1242_v34, %v1163_v45 }
 0x967   :  { %vm1252_vm9 = vcmp.gt.f32.partialorder %v1248_v33, 0.0  ;;  %v1254_v40 = vmul.f32 0.1, %v1248_v33 }
 0x968   :  { %vm1251_vm7 = vcmp.gt.f32.partialorder %v1243_v39, 0.0  ;;  %v1253_v29 = vmul.f32 0.1, %v1243_v39 }
 0x969   :  { %v1256_v41 = vsel %vm1252_vm9, %v1248_v33, %v1254_v40  ;;  %vm1386_vm9 = vcmp.ge.s32.totalorder %v4155_v8, 38 }
 0x96a   :  { %v1255_v22 = vsel %vm1251_vm7, %v1243_v39, %v1253_v29  ;;  %1259 = vrot.lane.b32.xlu1 %v1256_v41, %s4056_s30  ;;  %vm5229_vm7 = vcmp.lt.s32.totalorder %v4155_v8, 32 }
 0x96b   :  { %1263 = vrot.lane.b32.xlu0 %v1255_v22, %s4055_s29  ;;  %v3782_v38 = vpack.c.bf16 %v1256_v41, %v1255_v22 }
 0x96e   :  { %1257 = vrot.lane.b32.xlu1 %v1255_v22, %s4056_s30 }
 0x96f   :  { %1269 = vrot.lane.b32.xlu0 %v1255_v22, %s4057_s1 }
 0x972   :  { %1265 = vrot.lane.b32.xlu1 %v1256_v41, %s4055_s29 }
 0x973   :  { %1275 = vrot.lane.b32.xlu0 %v1255_v22, %s4058_s0 }
 0x976   :  { %1271 = vrot.lane.b32.xlu1 %v1256_v41, %s4057_s1 }
 0x977   :  { %1284 = vperm.xlu0 %4004, %v4757_v23  }
 0x97a   :  { %1277 = vrot.lane.b32.xlu1 %v1256_v41, %s4058_s0 }
 0x97e   :  { %1288 = vperm.xlu1 %4005, %v4763_v26  }
 0x9dc   :  { %v1260_v43 = vpop.permute.xlu1 %1259 }
 0x9dd   :  { %v1264_v2 = vpop.permute.xlu0 %1263  ;;  %v1262_v3 = vmul.f32 %v4720_v52, %v1260_v43  ;;  %v4071_v43 = vmov 8  }
 0x9de   :  { %v1267_v20 = vmul.f32 %v4607_v37, %v1264_v2  ;;  %4007 = vset.pattern.permute.xlu0 %v4071_v43  ;;  %4006 = vset.pattern.permute.xlu1 %v4071_v43 }
 0x9e0   :  { %v1258_v44 = vpop.permute.xlu1 %1257 }
 0x9e1   :  { %v1261_v48 = vmul.f32 %v4720_v52, %v1258_v44  ;;  %v1270_v58 = vpop.permute.xlu0 %1269 }
 0x9e2   :  { %v1273_v7 = vmul.f32 %v4620_v46, %v1270_v58 }
 0x9e3   :  { %v3774_v49 = vpack.c.bf16 %v1262_v3, %v1261_v48 }
 0x9e4   :  { %v1266_v54 = vpop.permute.xlu1 %1265 }
 0x9e5   :  { %v1268_v55 = vmul.f32 %v4607_v37, %v1266_v54  ;;  %3775 = vmatprep.subr.bf16.mxu0 %v3774_v49  ;;  %v1276_v18 = vpop.permute.xlu0 %1275 }
 0x9e6   :  { %3777 = vmatpush3.bf16.msra.mxu0 %v3774_v49  ;;  %v1279_v12 = vmul.f32 %v4735_v17, %v1276_v18 }
 0x9e7   :  { %v3778_v56 = vpack.c.bf16 %v1268_v55, %v1267_v20 }
 0x9e8   :  { %v1272_v62 = vpop.permute.xlu1 %1271 }
 0x9e9   :  { %v1274_v61 = vmul.f32 %v4620_v46, %v1272_v62  ;;  %3779 = vmatprep.subr.bf16.mxu0 %v3778_v56 }
 0x9ea   :  { %3781 = vmatpush3.bf16.msra.mxu0 %v3778_v56 }
 0x9eb   :  { %3783 = vmatprep.subr.bf16.mxu0 %v3782_v38  ;;  %v3786_v10 = vpack.c.bf16 %v1274_v61, %v1273_v7 }
 0x9ec   :  { %v1278_v6 = vpop.permute.xlu1 %1277 }
 0x9ed   :  { %v1280_v11 = vmul.f32 %v4735_v17, %v1278_v6 }
 0x9ee   :  { %3785 = vmatpush3.bf16.msra.mxu0 %v3782_v38 }
 0x9ef   :  { %3787 = vmatprep.subr.bf16.mxu0 %v3786_v10  ;;  %v3790_v19 = vpack.c.bf16 %v1280_v11, %v1279_v12 }
 0x9f2   :  { %3789 = vmatpush3.bf16.msra.mxu0 %v3786_v10 }
 0x9f3   :  { %3791 = vmatprep.subr.bf16.mxu0 %v3790_v19 }
 0x9f6   :  { %3793 = vmatpush3.bf16.msra.mxu0 %v3790_v19  ;;  %v1285_v30 = vpop.permute.xlu0 %1284 }
 0x9f9   :  { %3368 = vmatmul.mubr.msk.f32.vlgmr.msra.gmra.mrb[6].mxu0 %vm5170_vm11, %v1282_v24 }
 0x9fd   :  { %v1289_v45 = vpop.permute.xlu1 %1288 }
 0xacc   :  { %v3369_v33 = vpop.f32.mrb[6].mxu0 }
 0xacd   :  { %v1369_v34 = vadd.f32 %v3369_v33, %v1289_v45  ;;  %v1363_v39 = vpop.f32.mrb[7].mxu0 }
 0xace   :  { %v1364_v40 = vadd.f32 %v1363_v39, %v1285_v30  ;;  %v1419_v30 = vld [vmem:[#allocation2 + $0xa8] sm:$0xff] }
 0xacf   :  { %v4776_v29 = vadd.f32 %v1369_v34, %v4571_v15 }
 0xad0   :  { %v4779_v41 = vadd.f32 %v1364_v40, %v4573_v16  ;;  %v1418_v16 = vld [vmem:[#allocation2 + $0xa0] sm:$0xff] }
 0xad1   :  { %vm1375_vm1 = vcmp.gt.f32.partialorder %v4776_v29, 0.0  ;;  %v1377_v22 = vmul.f32 0.1, %v4776_v29  ;;  %3390 = vmatprep.mubr.msk.f32.mxu1 %vm5170_vm11, %v1418_v16  ;;  %vm1409_vm11 = vcmp.lt.s32.totalorder %v4155_v8, 26 }
 0xad2   :  { %vm1374_vm14 = vcmp.gt.f32.partialorder %v4779_v41, 0.0  ;;  %v1376_v38 = vmul.f32 0.1, %v4779_v41 }
 0xad3   :  { %v1379_v36 = vsel %vm1375_vm1, %v4776_v29, %v1377_v22  ;;  %vm1385_vm1 = vmand %vm1384_vm13, %vm5229_vm7 }
 0xad4   :  { %1382 = vrot.lane.b32.xlu0 %v1379_v36, %s4069_s17  ;;  %v1378_v14 = vsel %vm1374_vm14, %v4779_v41, %v1376_v38  ;;  %vm1387_vm14 = vmand %vm1386_vm9, %vm680_vm10 }
 0xad5   :  { %1380 = vrot.lane.b32.xlu1 %v1378_v14, %s4069_s17  ;;  %v3802_v15 = vpack.c.bf16 %v1379_v36, %v1378_v14  ;;  %vm1388_vm5 = vmor %vm1385_vm1, %vm1387_vm14 }
 0xad6   :  { %v2854_v2 = vsel %vm1388_vm5, 1.0, %v4061_v13  ;;  %vm1412_vm9 = vmand %vm692_vm15, %vm1411_vm8  ;;  %vm5230_vm15 = vcmask 654336  }
 0xad7   :  { %vm1413_vm5 = vmor %vm1409_vm11, %vm1412_vm9 }
 0xad8   :  { %1395 = vrot.lane.b32.xlu0 %v1379_v36, %s4054_s28  ;;  %v2855_v10 = vsel %vm1413_vm5, 1.0, %v4061_v13  ;;  %vm5231_vm1 = vmmov %vm5230_vm15 }
 0xad9   :  { %1393 = vrot.lane.b32.xlu1 %v1378_v14, %s4054_s28  ;;  %vm5232_vm14 = vmmov %vm5231_vm1 }
 0xadc   :  { %1401 = vrot.lane.b32.xlu0 %v1379_v36, %s4059_s4 }
 0xadd   :  { %1399 = vrot.lane.b32.xlu1 %v1378_v14, %s4059_s4 }
 0xae0   :  { %1407 = vrot.lane.b32.xlu0 %v1379_v36, %s4070_s18 }
 0xae1   :  { %1405 = vrot.lane.b32.xlu1 %v1378_v14, %s4070_s18 }
 0xae4   :  { %1425 = vperm.xlu0 %4007, %v4763_v26  }
 0xae5   :  { %1421 = vperm.xlu1 %4006, %v4757_v23  }
 0xb46   :  { %v1383_v44 = vpop.permute.xlu0 %1382 }
 0xb47   :  { %v1392_v3 = vmul.f32 %v2854_v2, %v1383_v44  ;;  %v1381_v48 = vpop.permute.xlu1 %1380  ;;  %v4073_v44 = vmov 9  }
 0xb48   :  { %v1391_v49 = vmul.f32 %v2854_v2, %v1381_v48  ;;  %v1539_v2 = vld [vmem:[#allocation2 + $0xb0] sm:$0xff] }
 0xb4a   :  { %v3794_v54 = vpack.c.bf16 %v1392_v3, %v1391_v49  ;;  %v1396_v20 = vpop.permute.xlu0 %1395 }
 0xb4b   :  { %v1398_v55 = vmul.f32 %v4677_v53, %v1396_v20  ;;  %v1394_v58 = vpop.permute.xlu1 %1393 }
 0xb4c   :  { %v1397_v56 = vmul.f32 %v4677_v53, %v1394_v58  ;;  %3795 = vmatprep.subr.bf16.mxu1 %v3794_v54 }
 0xb4d   :  { %3797 = vmatpush3.bf16.msra.mxu1 %v3794_v54 }
 0xb4e   :  { %v3798_v62 = vpack.c.bf16 %v1398_v55, %v1397_v56  ;;  %v1402_v61 = vpop.permute.xlu0 %1401 }
 0xb4f   :  { %v1400_v7 = vpop.permute.xlu1 %1399  ;;  %v1404_v18 = vmul.f32 %v4688_v57, %v1402_v61 }
 0xb50   :  { %v1403_v6 = vmul.f32 %v4688_v57, %v1400_v7  ;;  %3799 = vmatprep.subr.bf16.mxu1 %v3798_v62  ;;  %v4072_v57 = vmov 5  }
 0xb51   :  { %3801 = vmatpush3.bf16.msra.mxu1 %v3798_v62  ;;  %4008 = vset.pattern.permute.xlu0 %v4072_v57 }
 0xb52   :  { %3803 = vmatprep.subr.bf16.mxu1 %v3802_v15  ;;  %v1408_v11 = vpop.permute.xlu0 %1407  ;;  %v3806_v19 = vpack.c.bf16 %v1404_v18, %v1403_v6  ;;  %4009 = vset.pattern.permute.xlu1 %v4072_v57 }
 0xb53   :  { %v1406_v12 = vpop.permute.xlu1 %1405  ;;  %v1417_v24 = vmul.f32 %v2855_v10, %v1408_v11 }
 0xb54   :  { %v1416_v53 = vmul.f32 %v2855_v10, %v1406_v12 }
 0xb55   :  { %3805 = vmatpush3.bf16.msra.mxu1 %v3802_v15 }
 0xb56   :  { %3807 = vmatprep.subr.bf16.mxu1 %v3806_v19  ;;  %v3810_v45 = vpack.c.bf16 %v1417_v24, %v1416_v53  ;;  %v1540_v24 = vld [vmem:[#allocation2 + $0xb8] sm:$0xff] }
 0xb59   :  { %3809 = vmatpush3.bf16.msra.mxu1 %v3806_v19 }
 0xb5a   :  { %3811 = vmatprep.subr.bf16.mxu1 %v3810_v45 }
 0xb5d   :  { %3813 = vmatpush3.bf16.msra.mxu1 %v3810_v45 }
 0xb60   :  { %3391 = vmatmul.mubr.msk.f32.vlgmr.msra.gmra.mrb[14].mxu1 %vm5230_vm15, %v1419_v30  ;;  %vm5233_vm15 = vcmask 392192  }
 0xb61   :  { %3413 = vmatprep.mubr.msk.f32.mxu1 %vm5231_vm1, %v1539_v2  ;;  %vm5242_vm1 = vnez %v5192_v50 }
 0xb63   :  { %v1426_v33 = vpop.permute.xlu0 %1425 }
 0xb64   :  { %v1422_v34 = vpop.permute.xlu1 %1421 }
 0xc33   :  { %v3392_v39 = vpop.f32.mrb[14].mxu1 }
 0xc34   :  { %v1506_v40 = vadd.f32 %v3392_v39, %v1426_v33  ;;  %v1500_v22 = vpop.f32.mrb[15].mxu1 }
 0xc35   :  { %v1501_v38 = vadd.f32 %v1500_v22, %v1422_v34 }
 0xc36   :  { %vm1510_vm11 = vcmp.gt.f32.partialorder %v1506_v40, 0.0  ;;  %v1512_v36 = vmul.f32 0.1, %v1506_v40 }
 0xc37   :  { %vm1509_vm7 = vcmp.gt.f32.partialorder %v1501_v38, 0.0  ;;  %v1511_v14 = vmul.f32 0.1, %v1501_v38 }
 0xc38   :  { %v1514_v15 = vsel %vm1510_vm11, %v1506_v40, %v1512_v36  ;;  %vm5240_vm11 = vnez %v5188_v42  ;;  %v4079_v42 = vmov 13  }
 0xc39   :  { %v1513_v16 = vsel %vm1509_vm7, %v1501_v38, %v1511_v14  ;;  %1517 = vrot.lane.b32.xlu1 %v1514_v15, %s4056_s30  ;;  %vm5241_vm7 = vnez %v5190_v47 }
 0xc3a   :  { %1521 = vrot.lane.b32.xlu0 %v1513_v16, %s4055_s29  ;;  %v3822_v43 = vpack.c.bf16 %v1514_v15, %v1513_v16 }
 0xc3d   :  { %1515 = vrot.lane.b32.xlu1 %v1513_v16, %s4056_s30 }
 0xc3e   :  { %1527 = vrot.lane.b32.xlu0 %v1513_v16, %s4057_s1 }
 0xc41   :  { %1523 = vrot.lane.b32.xlu1 %v1514_v15, %s4055_s29 }
 0xc42   :  { %1533 = vrot.lane.b32.xlu0 %v1513_v16, %s4058_s0 }
 0xc45   :  { %1529 = vrot.lane.b32.xlu1 %v1514_v15, %s4057_s1 }
 0xc46   :  { %1045 = vperm.xlu0 %4008, %v4757_v23  }
 0xc49   :  { %1535 = vrot.lane.b32.xlu1 %v1514_v15, %s4058_s0 }
 0xc4a   :  { %4011 = vset.pattern.permute.xlu0 %v4073_v44 }
 0xc4b   :  { %1546 = vperm.xlu0 %4011, %v4763_v26  }
 0xc4d   :  { %1049 = vperm.xlu1 %4009, %v4763_v26  }
 0xc51   :  { %4010 = vset.pattern.permute.xlu1 %v4073_v44 }
 0xc52   :  { %1542 = vperm.xlu1 %4010, %v4757_v23  }
 0xcab   :  { %v1518_v3 = vpop.permute.xlu1 %1517 }
 0xcac   :  { %v1522_v48 = vpop.permute.xlu0 %1521  ;;  %v1520_v54 = vmul.f32 %v4720_v52, %v1518_v3 }
 0xcad   :  { %v1525_v56 = vmul.f32 %v4607_v37, %v1522_v48  ;;  %v1653_v48 = vld [vmem:[#allocation2 + $0xc8] sm:$0xff] }
 0xcaf   :  { %v1516_v49 = vpop.permute.xlu1 %1515 }
 0xcb0   :  { %v1519_v20 = vmul.f32 %v4720_v52, %v1516_v49  ;;  %v1528_v61 = vpop.permute.xlu0 %1527 }
 0xcb1   :  { %v1531_v18 = vmul.f32 %v4620_v46, %v1528_v61 }
 0xcb2   :  { %v3814_v55 = vpack.c.bf16 %v1520_v54, %v1519_v20 }
 0xcb3   :  { %v1524_v58 = vpop.permute.xlu1 %1523 }
 0xcb4   :  { %v1526_v62 = vmul.f32 %v4607_v37, %v1524_v58  ;;  %3815 = vmatprep.subr.bf16.mxu1 %v3814_v55  ;;  %v1534_v6 = vpop.permute.xlu0 %1533 }
 0xcb5   :  { %3817 = vmatpush3.bf16.msra.mxu1 %v3814_v55  ;;  %v1537_v12 = vmul.f32 %v4735_v17, %v1534_v6  ;;  %v1905_v6 = vld [vmem:[#allocation2 + $0xd0] sm:$0xff] }
 0xcb6   :  { %v3818_v26 = vpack.c.bf16 %v1526_v62, %v1525_v56 }
 0xcb7   :  { %v1530_v7 = vpop.permute.xlu1 %1529 }
 0xcb8   :  { %v1532_v23 = vmul.f32 %v4620_v46, %v1530_v7  ;;  %3819 = vmatprep.subr.bf16.mxu1 %v3818_v26 }
 0xcb9   :  { %3821 = vmatpush3.bf16.msra.mxu1 %v3818_v26 }
 0xcba   :  { %3823 = vmatprep.subr.bf16.mxu1 %v3822_v43  ;;  %v3826_v10 = vpack.c.bf16 %v1532_v23, %v1531_v18 }
 0xcbb   :  { %v1536_v52 = vpop.permute.xlu1 %1535 }
 0xcbc   :  { %v1538_v11 = vmul.f32 %v4735_v17, %v1536_v52 }
 0xcbd   :  { %3825 = vmatpush3.bf16.msra.mxu1 %v3822_v43 }
 0xcbe   :  { %3827 = vmatprep.subr.bf16.mxu1 %v3826_v10  ;;  %v3830_v19 = vpack.c.bf16 %v1538_v11, %v1537_v12 }
 0xcc1   :  { %3829 = vmatpush3.bf16.msra.mxu1 %v3826_v10 }
 0xcc2   :  { %3831 = vmatprep.subr.bf16.mxu1 %v3830_v19 }
 0xcc5   :  { %3833 = vmatpush3.bf16.msra.mxu1 %v3830_v19  ;;  %v1046_v45 = vpop.permute.xlu0 %1045 }
 0xcc6   :  { %v3943_v57 = vadd.f32 %v1046_v45, %v4653_v28 }
 0xcc8   :  { %3414 = vmatmul.mubr.msk.f32.vlgmr.msra.gmra.mrb[10].mxu1 %vm5232_vm14, %v1540_v24  ;;  %v3944_v17 = vadd.f32 %v3943_v57, %v4779_v41  ;;  %v4074_v41 = vmov 0.0|0.0   ;;  %vm5243_vm14 = vnez %v5194_v51 }
 0xcc9   :  { %3870 = vmatprep.subr.bf16.mxu1 %v4074_v41 }
 0xcca   :  { %v1547_v34 = vpop.permute.xlu0 %1546  ;;  %3872 = vmatpush3.bf16.msk.msra.mxu1 %vm4451_vm12, %v4062_v31  ;;  %vm5234_vm12 = vnez %v5212_v5 }
 0xccb   :  { %3873 = vmatprep.subr.bf16.mxu1 %v4074_v41 }
 0xccc   :  { %v1050_v53 = vpop.permute.xlu1 %1049 }
 0xccd   :  { %v3939_v30 = vadd.f32 %v1050_v53, %v4650_v25 }
 0xcce   :  { %3875 = vmatpush3.bf16.msk.msra.mxu1 %vm4472_vm2, %v4062_v31  ;;  %vm5235_vm2 = vnez %v5200_v60 }
 0xccf   :  { %v3940_v33 = vadd.f32 %v3939_v30, %v4776_v29  ;;  %v1652_v29 = vld [vmem:[#allocation2 + $0xc0] sm:$0xff]  ;;  %3876 = vmatprep.subr.bf16.mxu1 %v4074_v41 }
 0xcd0   :  { %3428 = vmatprep.mubr.msk.f32.mxu0 %vm5233_vm15, %v1652_v29 }
 0xcd1   :  { %v1543_v39 = vpop.permute.xlu1 %1542  ;;  %v3941_v40 = vadd.f32 %v3940_v33, %v1547_v34  ;;  %v1993_v34 = vld [vmem:[#allocation2 + $0xd8] sm:$0xff] }
 0xcd2   :  { %v3945_v22 = vadd.f32 %v3944_v17, %v1543_v39  ;;  %3878 = vmatpush3.bf16.msk.msra.mxu1 %vm4488_vm0, %v4062_v31  ;;  %vm5236_vm0 = vmmov %vm5233_vm15 }
 0xcd3   :  { %3879 = vmatprep.subr.bf16.mxu1 %v4074_v41 }
 0xcd6   :  { %3881 = vmatpush3.bf16.msk.msra.mxu1 %vm4504_vm3, %v4062_v31  ;;  %vm5237_vm3 = vnez %v5182_v27  ;;  %v4928_v27 = vld [vmem:[%s5146_s2] sm:$0xff] }
 0xcd7   :  { %3882 = vmatprep.subr.bf16.mxu1 %v4074_v41 }
 0xcda   :  { %3884 = vmatpush3.bf16.msk.msra.mxu1 %vm4520_vm4, %v4062_v31  ;;  %vm5238_vm4 = vnez %v5184_v32  ;;  %v4076_v32 = vmov 10  }
 0xcdb   :  { %3885 = vmatprep.subr.bf16.mxu1 %v4074_v41  ;;  %4012 = vset.pattern.permute.xlu0 %v4076_v32 }
 0xcde   :  { %3887 = vmatpush3.bf16.msk.msra.mxu1 %vm4536_vm6, %v4062_v31  ;;  %vm5239_vm6 = vnez %v5186_v35  ;;  %v4077_v35 = vmov 11  }
 0xcdf   :  { %3888 = vmatprep.subr.bf16.mxu1 %v4074_v41 }
 0xce2   :  { %3890 = vmatpush3.bf16.msk.msra.mxu1 %vm5234_vm12, %v4062_v31  ;;  %vm5245_vm12 = vcmp.ge.s32.totalorder %v4155_v8, 1 }
 0xce3   :  { %3891 = vmatprep.subr.bf16.mxu1 %v4074_v41 }
 0xce6   :  { %3893 = vmatpush3.bf16.msk.msra.mxu1 %vm5235_vm2, %v4062_v31  ;;  %vm1887_vm2 = vmand %vm5245_vm12, %vm680_vm10  ;;  %vm5247_vm12 = vcmp.ge.s32.totalorder %v4155_v8, 3 }
 0xce7   :  { %3894 = vmatprep.subr.bf16.mxu1 %v4074_v41 }
 0xd9b   :  { %v3415_v38 = vpop.f32.mrb[10].mxu1 }
 0xd9c   :  { %v3942_v36 = vadd.f32 %v3941_v40, %v3415_v38  ;;  %v1621_v14 = vpop.f32.mrb[11].mxu1 }
 0xd9d   :  { %v3946_v15 = vadd.f32 %v3945_v22, %v1621_v14 }
 0xd9e   :  { %v1637_v16 = vmul.f32 0.1, %v3942_v36  ;;  %vm1635_vm9 = vcmp.gt.f32.partialorder %v3942_v36, 0.0 }
 0xd9f   :  { %v1636_v43 = vmul.f32 0.1, %v3946_v15  ;;  %vm1634_vm5 = vcmp.gt.f32.partialorder %v3946_v15, 0.0 }
 0xda0   :  { %v1639_v2 = vsel %vm1635_vm9, %v3942_v36, %v1637_v16  ;;  %vm5244_vm9 = vnez %v5196_v59 }
 0xda1   :  { %v1638_v25 = vsel %vm1634_vm5, %v3946_v15, %v1636_v43  ;;  %vm4075_vm5 = vmmov 0  }
 0xda2   :  { %1646 = vrot.lane.b32.xlu0 %v1638_v25, %s4057_s1  ;;  %1640 = vrot.lane.b32.xlu1 %v1638_v25, %s4055_s29  ;;  %v3838_v28 = vpack.c.bf16 %v1639_v2, %v1638_v25 }
 0xda3   :  { %3498 = vmatprep.mubr.msk.f32.mxu1 %vm4075_vm5, %v4061_v13 }
 0xda6   :  { %1642 = vrot.lane.b32.xlu1 %v1639_v2, %s4055_s29  ;;  %1878 = vperm.xlu0 %4012, %v4928_v27  }
 0xdaa   :  { %1648 = vrot.lane.b32.xlu1 %v1639_v2, %s4057_s1  ;;  %4013 = vset.pattern.permute.xlu0 %v4077_v35 }
 0xdab   :  { %1907 = vperm.xlu0 %4013, %v4928_v27  }
 0xe14   :  { %v1641_v9 = vpop.permute.xlu1 %1640  ;;  %v1647_v4 = vpop.permute.xlu0 %1646 }
 0xe15   :  { %v1644_v63 = vmul.f32 %v4607_v37, %v1641_v9  ;;  %v1650_v3 = vmul.f32 %v4620_v46, %v1647_v4  ;;  %v2093_v9 = vld [vmem:[#allocation2 + $0xe0] sm:$0xff] }
 0xe18   :  { %v1643_v21 = vpop.permute.xlu1 %1642 }
 0xe19   :  { %v1645_v0 = vmul.f32 %v4607_v37, %v1643_v21 }
 0xe1b   :  { %v3834_v1 = vpack.c.bf16 %v1645_v0, %v1644_v63 }
 0xe1c   :  { %v1649_v44 = vpop.permute.xlu1 %1648 }
 0xe1d   :  { %v1651_v5 = vmul.f32 %v4620_v46, %v1649_v44  ;;  %3835 = vmatprep.subr.bf16.mxu0 %v3834_v1 }
 0xe1e   :  { %3837 = vmatpush3.bf16.msra.mxu0 %v3834_v1 }
 0xe1f   :  { %3839 = vmatprep.subr.bf16.mxu0 %v3838_v28  ;;  %v3842_v60 = vpack.c.bf16 %v1651_v5, %v1650_v3  ;;  %v4080_v5 = vmov 15  }
 0xe22   :  { %3841 = vmatpush3.bf16.msra.mxu0 %v3838_v28 }
 0xe23   :  { %3843 = vmatprep.subr.bf16.mxu0 %v3842_v60 }
 0xe25   :  { %v1879_v59 = vpop.permute.xlu0 %1878 }
 0xe26   :  { %3845 = vmatpush3.bf16.msra.mxu0 %v3842_v60 }
 0xe27   :  { %3846 = vmatprep.subr.bf16.mxu0 %v4074_v41 }
 0xe29   :  { %3429 = vmatmul.mubr.msk.f32.vlgmr.msra.gmra.mrb[8].mxu0 %vm5236_vm0, %v1653_v48  ;;  %vm1888_vm0 = vcmp.ge.s32.totalorder %v4155_v8, 65 }
 0xe2a   :  { %3848 = vmatpush3.bf16.msk.msra.mxu0 %vm5237_vm3, %v4062_v31  ;;  %3463 = vmatprep.mubr.msk.f32.mxu0 %vm4075_vm5, %v4061_v13  ;;  %vm1891_vm3 = vmor %vm1887_vm2, %vm1888_vm0  ;;  %v1908_v52 = vpop.permute.xlu0 %1907  ;;  %vm2078_vm0 = vcmp.ge.s32.totalorder %v4155_v8, 67 }
 0xe2b   :  { %3849 = vmatprep.subr.bf16.mxu0 %v4074_v41  ;;  %v4959_v56 = vsel %vm1891_vm3, 1.0, %v4061_v13  ;;  %vm2077_vm2 = vmand %vm5247_vm12, %vm680_vm10 }
 0xe2c   :  { %vm2080_vm3 = vmor %vm2077_vm2, %vm2078_vm0  ;;  %vm2262_vm2 = vcmp.ge.s32.totalorder %v4155_v8, 66 }
 0xe2d   :  { %v5006_v15 = vsel %vm2080_vm3, 1.0, %v4061_v13  ;;  %vm2271_vm3 = vcmp.lt.s32.totalorder %v4155_v8, 126 }
 0xe2e   :  { %3851 = vmatpush3.bf16.msk.msra.mxu0 %vm5238_vm4, %v4062_v31  ;;  %vm1898_vm4 = vcmp.ge.s32.totalorder %v4155_v8, 64 }
 0xe2f   :  { %3852 = vmatprep.subr.bf16.mxu0 %v4074_v41 }
 0xe32   :  { %3854 = vmatpush3.bf16.msk.msra.mxu0 %vm5239_vm6, %v4062_v31  ;;  %vm1899_vm6 = vcmp.lt.s32.totalorder %v4155_v8, 127 }
 0xe33   :  { %3855 = vmatprep.subr.bf16.mxu0 %v4074_v41 }
 0xe36   :  { %3857 = vmatpush3.bf16.msk.msra.mxu0 %vm5240_vm11, %v4062_v31  ;;  %vm1900_vm11 = vmand %vm1898_vm4, %vm1899_vm6  ;;  %vm2087_vm6 = vcmp.lt.s32.totalorder %v4155_v8, 125 }
 0xe37   :  { %3858 = vmatprep.subr.bf16.mxu0 %v4074_v41 }
 0xe3a   :  { %3860 = vmatpush3.bf16.msk.msra.mxu0 %vm5241_vm7, %v4062_v31  ;;  %vm5246_vm7 = vcmp.lt.s32.totalorder %v4155_v8, 63 }
 0xe3b   :  { %3861 = vmatprep.subr.bf16.mxu0 %v4074_v41 }
 0xe3e   :  { %3863 = vmatpush3.bf16.msk.msra.mxu0 %vm5242_vm1, %v4062_v31  ;;  %vm1901_vm1 = vmor %vm5246_vm7, %vm1900_vm11  ;;  %vm5248_vm7 = vcmp.lt.s32.totalorder %v4155_v8, 61 }
 0xe3f   :  { %3864 = vmatprep.subr.bf16.mxu0 %v4074_v41  ;;  %v4971_v7 = vsel %vm1901_vm1, 1.0, %v4061_v13  ;;  %vm2088_vm11 = vmand %vm1898_vm4, %vm2087_vm6 }
 0xe40   :  { %vm2089_vm1 = vmor %vm5248_vm7, %vm2088_vm11  ;;  %vm5250_vm11 = vcmp.lt.s32.totalorder %v4155_v8, 62 }
 0xe41   :  { %v5014_v25 = vsel %vm2089_vm1, 1.0, %v4061_v13  ;;  %vm2272_vm6 = vmand %vm1898_vm4, %vm2271_vm3 }
 0xe42   :  { %3866 = vmatpush3.bf16.msk.msra.mxu0 %vm5243_vm14, %v4062_v31  ;;  %vm1910_vm14 = vcmask 195584   ;;  %vm2273_vm7 = vmor %vm5250_vm11, %vm2272_vm6 }
 0xe43   :  { %3867 = vmatprep.subr.bf16.mxu0 %v4074_v41 }
 0xe46   :  { %3869 = vmatpush3.bf16.msk.msra.mxu0 %vm5244_vm9, %v4062_v31  ;;  %v4078_v31 = vmov 12  }
 0xe47   :  { %3897 = vmatprep.subr.bf16.mxu0 %v4074_v41  ;;  %4014 = vset.pattern.permute.xlu0 %v4078_v31 }
 0xe48   :  { %1995 = vperm.xlu0 %4014, %v4928_v27  }
 0xe4c   :  { %4015 = vset.pattern.permute.xlu0 %v4079_v42 }
 0xe4d   :  { %2095 = vperm.xlu0 %4015, %v4928_v27  }
 0xe51   :  { %4016 = vset.pattern.permute.xlu0 %v4080_v5  ;;  %v4084_v5 = vmov 18  }
 0xe52   :  { %4020 = vset.pattern.permute.xlu1 %v4084_v5 }
 0xec7   :  { %v1996_v39 = vpop.permute.xlu0 %1995 }
 0xecc   :  { %v2096_v21 = vpop.permute.xlu0 %2095 }
 0xefc   :  { %v3430_v47 = vpop.f32.mrb[8].mxu0 }
 0xefd   :  { %v1726_v50 = vpop.f32.mrb[9].mxu0  ;;  %3464 = vmatmul.mubr.f32.vlgmr.msra.gmra.mrb[10].mxu0 %v3430_v47 }
 0xefe   :  { %3499 = vmatmul.mubr.f32.vlgmr.msra.gmra.mrb[16].mxu1 %v1726_v50  ;;  %3516 = vmatprep.mubr.msk.f32.mxu0 %vm4075_vm5, %v4061_v13  ;;  %v2180_v50 = vld [vmem:[#allocation2 + $0xe8] sm:$0xff] }
 0xeff   :  { %3507 = vmatprep.mubr.msk.f32.mxu1 %vm4075_vm5, %v4061_v13 }
 0xfd0   :  { %v1801_v51 = vpop.f32.mrb[10].mxu0 }
 0xfd1   :  { %v3465_v37 = vpop.f32.mrb[11].mxu0  ;;  %v1871_v46 = vpop.f32.mrb[16].mxu1 }
 0xfd2   :  { %v1872_v49 = vadd.f32 %v1871_v46, %v1801_v51  ;;  %v3500_v54 = vpop.f32.mrb[17].mxu1  ;;  %v5053_v37 = vsel %vm2273_vm7, 1.0, %v4061_v13 }
 0xfd3   :  { %v2277_v54 = vld [vmem:[#allocation2 + $0xf0] sm:$0xff] }
 0xfd4   :  { %v4938_v20 = vadd.f32 %v1879_v59, %v1872_v49 }
 0xfd6   :  { %vm1882_vm15 = vcmp.gt.f32.partialorder %v4938_v20, 0.0  ;;  %v1883_v55 = vmul.f32 0.1, %v4938_v20 }
 0xfd8   :  { %v4943_v58 = vsel %vm1882_vm15, %v4938_v20, %v1883_v55 }
 0xfd9   :  { %2259 = vrot.lane.b32.xlu0 %v4943_v58, %s4056_s30  ;;  %1885 = vrot.lane.b32.xlu1 %v4943_v58, %s4055_s29 }
 0xfdd   :  { %1895 = vrot.lane.b32.xlu1 %v4943_v58, %s4057_s1  ;;  %2279 = vperm.xlu0 %4016, %v4928_v27  }
0x104b   :  { %v1886_v62 = vpop.permute.xlu1 %1885  ;;  %v2260_v32 = vpop.permute.xlu0 %2259 }
0x104c   :  { %v4964_v61 = vmul.f32 %v4959_v56, %v1886_v62 }
0x104e   :  { %v3895_v26 = vpack.c.bf16 %v4943_v58, %v4964_v61 }
0x104f   :  { %v1896_v23 = vpop.permute.xlu1 %1895 }
0x1050   :  { %3896 = vmatpush3.bf16.msra.mxu1 %v3895_v26  ;;  %v4975_v18 = vmul.f32 %v4971_v7, %v1896_v23 }
0x1051   :  { %3505 = vmatprep.subr.mxu1 %v4061_v13 }
0x1052   :  { %v3910_v59 = vpack.c.bf16 %v4975_v18, %v4943_v58 }
0x1054   :  { %3506 = vmatpush3.msra.mxu1 %v4975_v18  ;;  %v4081_v18 = vmov 16  }
0x1055   :  { %3508 = vmatmul.mubr.msk.f32.vlgmr.msra.gmra.mrb[18].mxu1 %vm1910_vm14, %v1905_v6  ;;  %3918 = vmatprep.subr.bf16.mxu1 %v4074_v41 }
0x1056   :  { %3573 = vmatprep.mubr.msk.f32.mxu1 %vm4075_vm5, %v4061_v13  ;;  %4017 = vset.pattern.permute.xlu0 %v4081_v18 }
0x105c   :  { %v2280_v55 = vpop.permute.xlu0 %2279 }
0x1128   :  { %v1980_v10 = vpop.f32.mrb[18].mxu1 }
0x1129   :  { %v1981_v11 = vadd.f32 %v1980_v10, %v1908_v52  ;;  %v3509_v12 = vpop.f32.mrb[19].mxu1 }
0x112b   :  { %vm1984_vm9 = vcmp.gt.f32.partialorder %v1981_v11, 0.0  ;;  %v1985_v19 = vmul.f32 0.1, %v1981_v11 }
0x112d   :  { %v1986_v24 = vsel %vm1984_vm9, %v1981_v11, %v1985_v19 }
0x112e   :  { %1987 = vrot.lane.b32.xlu1 %v1986_v24, %s4055_s29 }
0x1132   :  { %1990 = vrot.lane.b32.xlu1 %v1986_v24, %s4057_s1 }
0x11a0   :  { %v1988_v53 = vpop.permute.xlu1 %1987 }
0x11a1   :  { %v1989_v45 = vmul.f32 %v4959_v56, %v1988_v53 }
0x11a3   :  { %v3898_v30 = vpack.c.bf16 %v1986_v24, %v1989_v45 }
0x11a4   :  { %v1991_v57 = vpop.permute.xlu1 %1990 }
0x11a5   :  { %3899 = vmatpush3.bf16.msra.mxu0 %v3898_v30  ;;  %v1992_v33 = vmul.f32 %v4971_v7, %v1991_v57  ;;  %v2371_v57 = vld [vmem:[#allocation2 + $0xf8] sm:$0xff] }
0x11a6   :  { %3514 = vmatprep.subr.mxu0 %v4061_v13 }
0x11a9   :  { %3515 = vmatpush3.msra.mxu0 %v1992_v33 }
0x11aa   :  { %3517 = vmatmul.mubr.msk.f32.vlgmr.msra.gmra.mrb[12].mxu0 %vm1910_vm14, %v1993_v34  ;;  %3900 = vmatprep.subr.bf16.mxu0 %v4074_v41 }
0x11ab   :  { %3525 = vmatprep.mubr.msk.f32.mxu0 %vm4075_vm5, %v4061_v13 }
0x127d   :  { %v2067_v17 = vpop.f32.mrb[12].mxu0 }
0x127e   :  { %v2068_v40 = vadd.f32 %v2067_v17, %v1996_v39  ;;  %v3518_v22 = vpop.f32.mrb[13].mxu0 }
0x1280   :  { %v4992_v38 = vadd.f32 %v2068_v40, %v4938_v20 }
0x1282   :  { %vm2072_vm15 = vcmp.gt.f32.partialorder %v4992_v38, 0.0  ;;  %v2073_v36 = vmul.f32 0.1, %v4992_v38 }
0x1284   :  { %v2074_v14 = vsel %vm2072_vm15, %v4992_v38, %v2073_v36  ;;  %vm5249_vm15 = vcmp.ge.s32.totalorder %v4155_v8, 2 }
0x1285   :  { %2075 = vrot.lane.b32.xlu1 %v2074_v14, %s4054_s28  ;;  %vm2261_vm12 = vmand %vm5249_vm15, %vm680_vm10 }
0x1286   :  { %vm2264_vm0 = vmor %vm2261_vm12, %vm2262_vm2  ;;  %vm2456_vm12 = vcmp.ge.s32.totalorder %v4155_v8, 70 }
0x1287   :  { %v5034_v48 = vsel %vm2264_vm0, 1.0, %v4061_v13  ;;  %vm2455_vm15 = vmand %vm1384_vm13, %vm680_vm10  ;;  %vm2471_vm0 = vcmp.lt.s32.totalorder %v4155_v8, 122  ;;  %v4083_v8 = vmov 14  }
0x1288   :  { %v2267_v42 = vmul.f32 %v5034_v48, %v2260_v32  ;;  %vm2458_vm2 = vmor %vm2455_vm15, %vm2456_vm12 }
0x1289   :  { %2084 = vrot.lane.b32.xlu1 %v2074_v14, %s4059_s4  ;;  %vm2472_vm3 = vmand %vm1898_vm4, %vm2471_vm0 }
0x128a   :  { %v3907_v51 = vpack.c.bf16 %v4964_v61, %v2267_v42  ;;  %vm2473_vm10 = vmor %vm1411_vm8, %vm2472_vm3 }
0x12f7   :  { %v2076_v16 = vpop.permute.xlu1 %2075 }
0x12f8   :  { %v2083_v43 = vmul.f32 %v5006_v15, %v2076_v16  ;;  %v2906_v16 = vsel %vm2458_vm2, 1.0, %v4061_v13 }
0x12fa   :  { %v3901_v2 = vpack.c.bf16 %v2074_v14, %v2083_v43  ;;  %v4082_v14 = vmov 17  }
0x12fb   :  { %v2085_v28 = vpop.permute.xlu1 %2084 }
0x12fc   :  { %3902 = vmatpush3.bf16.msra.mxu0 %v3901_v2  ;;  %v2092_v29 = vmul.f32 %v5014_v25, %v2085_v28 }
0x12fd   :  { %3523 = vmatprep.subr.mxu0 %v4061_v13 }
0x1300   :  { %3524 = vmatpush3.msra.mxu0 %v2092_v29 }
0x1301   :  { %3526 = vmatmul.mubr.msk.f32.vlgmr.msra.gmra.mrb[14].mxu0 %vm1910_vm14, %v2093_v9  ;;  %3903 = vmatprep.subr.bf16.mxu0 %v4074_v41 }
0x1302   :  { %3534 = vmatprep.mubr.msk.f32.mxu0 %vm4075_vm5, %v4061_v13 }
0x13d4   :  { %v2167_v63 = vpop.f32.mrb[14].mxu0 }
0x13d5   :  { %v2168_v0 = vadd.f32 %v2167_v63, %v2096_v21  ;;  %v3527_v1 = vpop.f32.mrb[15].mxu0 }
0x13d7   :  { %vm2171_vm9 = vcmp.gt.f32.partialorder %v2168_v0, 0.0  ;;  %v2172_v4 = vmul.f32 0.1, %v2168_v0 }
0x13d9   :  { %v2173_v44 = vsel %vm2171_vm9, %v2168_v0, %v2172_v4  ;;  %v2907_v0 = vsel %vm2473_vm10, 1.0, %v4061_v13 }
0x13da   :  { %2174 = vrot.lane.b32.xlu1 %v2173_v44, %s4055_s29 }
0x13de   :  { %2177 = vrot.lane.b32.xlu1 %v2173_v44, %s4057_s1 }
0x13e2   :  { %2268 = vrot.lane.b32.xlu1 %v4943_v58, %s4058_s0 }
0x144c   :  { %v2175_v3 = vpop.permute.xlu1 %2174 }
0x144d   :  { %v2176_v60 = vmul.f32 %v4959_v56, %v2175_v3 }
0x144f   :  { %v3904_v35 = vpack.c.bf16 %v2173_v44, %v2176_v60  ;;  %v2477_v44 = vld [vmem:[#allocation2 + $0x100] sm:$0xff] }
0x1450   :  { %v2178_v31 = vpop.permute.xlu1 %2177 }
0x1451   :  { %3905 = vmatpush3.bf16.msra.mxu0 %v3904_v35  ;;  %v2179_v47 = vmul.f32 %v4971_v7, %v2178_v31 }
0x1452   :  { %3532 = vmatprep.subr.mxu0 %v4061_v13 }
0x1454   :  { %v2269_v46 = vpop.permute.xlu1 %2268 }
0x1455   :  { %3533 = vmatpush3.msra.mxu0 %v2179_v47  ;;  %v2276_v49 = vmul.f32 %v5053_v37, %v2269_v46 }
0x1456   :  { %3906 = vmatprep.subr.bf16.mxu0 %v4074_v41  ;;  %3535 = vmatmul.mubr.msk.f32.vlgmr.msra.gmra.mrb[16].mxu0 %vm1910_vm14, %v2180_v50  ;;  %vm2282_vm14 = vcmask 326656  }
0x1457   :  { %3908 = vmatpush3.bf16.msra.mxu0 %v3907_v51  ;;  %3547 = vmatprep.mubr.msk.f32.mxu0 %vm4075_vm5, %v4061_v13 }
0x1458   :  { %3909 = vmatprep.subr.bf16.mxu0 %v4074_v41 }
0x145b   :  { %3911 = vmatpush3.bf16.msra.mxu0 %v3910_v59 }
0x145c   :  { %3545 = vmatprep.subr.mxu0 %v4061_v13 }
0x145f   :  { %3546 = vmatpush3.msra.mxu0 %v2276_v49 }
0x1460   :  { %3548 = vmatmul.mubr.msk.f32.vlgmr.msra.gmra.mrb[18].mxu0 %vm2282_vm14, %v2277_v54  ;;  %3912 = vmatprep.subr.bf16.mxu0 %v4074_v41 }
0x1461   :  { %3560 = vmatprep.mubr.msk.f32.mxu0 %vm4075_vm5, %v4061_v13 }
0x1533   :  { %v2352_v58 = vpop.f32.mrb[18].mxu0 }
0x1534   :  { %v2353_v62 = vadd.f32 %v2352_v58, %v2280_v55  ;;  %v3549_v61 = vpop.f32.mrb[19].mxu0 }
0x1536   :  { %vm2356_vm1 = vcmp.gt.f32.partialorder %v2353_v62, 0.0  ;;  %v2357_v26 = vmul.f32 0.1, %v2353_v62 }
0x1538   :  { %v2358_v23 = vsel %vm2356_vm1, %v2353_v62, %v2357_v26  ;;  %v2570_v62 = vld [vmem:[#allocation2 + $0x108] sm:$0xff] }
0x1539   :  { %2365 = vrot.lane.b32.xlu0 %v2358_v23, %s4057_s1  ;;  %2359 = vrot.lane.b32.xlu1 %v2358_v23, %s4056_s30 }
0x153d   :  { %2362 = vrot.lane.b32.xlu1 %v2358_v23, %s4055_s29  ;;  %2373 = vperm.xlu0 %4017, %v4928_v27  }
0x1541   :  { %2368 = vrot.lane.b32.xlu1 %v2358_v23, %s4058_s0  ;;  %4018 = vset.pattern.permute.xlu0 %v4082_v14 }
0x15ab   :  { %v2360_v6 = vpop.permute.xlu1 %2359  ;;  %v2366_v52 = vpop.permute.xlu0 %2365 }
0x15ac   :  { %v2361_v11 = vmul.f32 %v5034_v48, %v2360_v6  ;;  %v2367_v19 = vmul.f32 %v4971_v7, %v2366_v52 }
0x15ae   :  { %v3916_v53 = vpack.c.bf16 %v2367_v19, %v2358_v23 }
0x15af   :  { %v2363_v10 = vpop.permute.xlu1 %2362 }
0x15b0   :  { %v2364_v12 = vmul.f32 %v4959_v56, %v2363_v10 }
0x15b2   :  { %v3913_v24 = vpack.c.bf16 %v2364_v12, %v2361_v11 }
0x15b3   :  { %v2369_v45 = vpop.permute.xlu1 %2368 }
0x15b4   :  { %3914 = vmatpush3.bf16.msra.mxu0 %v3913_v24  ;;  %v2370_v30 = vmul.f32 %v5053_v37, %v2369_v45  ;;  %v4085_v24 = vmov 19  }
0x15b5   :  { %3915 = vmatprep.subr.bf16.mxu0 %v4074_v41 }
0x15b8   :  { %3917 = vmatpush3.bf16.msra.mxu0 %v3916_v53 }
0x15b9   :  { %3558 = vmatprep.subr.mxu0 %v4061_v13 }
0x15bc   :  { %3559 = vmatpush3.msra.mxu0 %v2370_v30  ;;  %v2374_v33 = vpop.permute.xlu0 %2373 }
0x15bd   :  { %3561 = vmatmul.mubr.msk.f32.vlgmr.msra.gmra.mrb[20].mxu0 %vm2282_vm14, %v2371_v57  ;;  %3924 = vmatprep.subr.bf16.mxu0 %v4074_v41 }
0x15be   :  { %3586 = vmatprep.mubr.msk.f32.mxu0 %vm4075_vm5, %v4061_v13 }
0x1690   :  { %v2445_v34 = vpop.f32.mrb[20].mxu0 }
0x1691   :  { %v2446_v39 = vadd.f32 %v2445_v34, %v2374_v33  ;;  %v3562_v17 = vpop.f32.mrb[21].mxu0 }
0x1693   :  { %v5077_v40 = vadd.f32 %v2446_v39, %v4938_v20 }
0x1695   :  { %vm2450_vm9 = vcmp.gt.f32.partialorder %v5077_v40, 0.0  ;;  %v2451_v22 = vmul.f32 0.1, %v5077_v40 }
0x1697   :  { %v2452_v36 = vsel %vm2450_vm9, %v5077_v40, %v2451_v22 }
0x1698   :  { %2465 = vrot.lane.b32.xlu0 %v2452_v36, %s4059_s4  ;;  %2453 = vrot.lane.b32.xlu1 %v2452_v36, %s4069_s17 }
0x169c   :  { %2462 = vrot.lane.b32.xlu1 %v2452_v36, %s4054_s28  ;;  %2479 = vperm.xlu0 %4018, %v4928_v27  }
0x16a0   :  { %2468 = vrot.lane.b32.xlu1 %v2452_v36, %s4070_s18  ;;  %4019 = vset.pattern.permute.xlu0 %v4083_v8 }
0x170a   :  { %v2454_v20 = vpop.permute.xlu1 %2453  ;;  %v2466_v43 = vpop.permute.xlu0 %2465 }
0x170b   :  { %v2461_v28 = vmul.f32 %v2906_v16, %v2454_v20  ;;  %v2467_v9 = vmul.f32 %v5014_v25, %v2466_v43 }
0x170d   :  { %v3922_v63 = vpack.c.bf16 %v2467_v9, %v2452_v36 }
0x170e   :  { %v2463_v2 = vpop.permute.xlu1 %2462 }
0x170f   :  { %v2464_v29 = vmul.f32 %v5006_v15, %v2463_v2 }
0x1711   :  { %v3919_v21 = vpack.c.bf16 %v2464_v29, %v2461_v28 }
0x1712   :  { %v2469_v1 = vpop.permute.xlu1 %2468 }
0x1713   :  { %3920 = vmatpush3.bf16.msra.mxu1 %v3919_v21  ;;  %v2476_v4 = vmul.f32 %v2907_v0, %v2469_v1 }
0x1714   :  { %3921 = vmatprep.subr.bf16.mxu1 %v4074_v41 }
0x1717   :  { %3923 = vmatpush3.bf16.msra.mxu1 %v3922_v63 }
0x1718   :  { %3571 = vmatprep.subr.mxu1 %v4061_v13 }
0x171b   :  { %3572 = vmatpush3.msra.mxu1 %v2476_v4  ;;  %v2480_v3 = vpop.permute.xlu0 %2479 }
0x171c   :  { %3574 = vmatmul.mubr.msk.f32.vlgmr.msra.gmra.mrb[20].mxu1 %vm2282_vm14, %v2477_v44  ;;  %3930 = vmatprep.subr.bf16.mxu1 %v4074_v41 }
0x171d   :  { %3603 = vmatprep.mubr.msk.f32.mxu1 %vm4075_vm5, %v4061_v13  ;;  %vm5251_vm5 = vcmask 457728  }
0x17ef   :  { %v2551_v60 = vpop.f32.mrb[20].mxu1 }
0x17f0   :  { %v2552_v32 = vadd.f32 %v2551_v60, %v2480_v3  ;;  %v3575_v35 = vpop.f32.mrb[21].mxu1 }
0x17f2   :  { %vm2555_vm8 = vcmp.gt.f32.partialorder %v2552_v32, 0.0  ;;  %v2556_v31 = vmul.f32 0.1, %v2552_v32 }
0x17f4   :  { %v2557_v42 = vsel %vm2555_vm8, %v2552_v32, %v2556_v31 }
0x17f5   :  { %2564 = vrot.lane.b32.xlu0 %v2557_v42, %s4057_s1  ;;  %2558 = vrot.lane.b32.xlu1 %v2557_v42, %s4056_s30 }
0x17f9   :  { %2182 = vperm.xlu0 %4019, %v4928_v27   ;;  %2561 = vrot.lane.b32.xlu1 %v2557_v42, %s4055_s29 }
0x17fd   :  { %2567 = vrot.lane.b32.xlu1 %v2557_v42, %s4058_s0  ;;  %4022 = vset.pattern.permute.xlu0 %v4085_v24 }
0x1801   :  { %2572 = vperm.xlu1 %4020, %v4928_v27  }
0x1805   :  { %4021 = vset.pattern.permute.xlu1 %v4085_v24 }
0x1867   :  { %v2559_v47 = vpop.permute.xlu1 %2558  ;;  %v2565_v50 = vpop.permute.xlu0 %2564 }
0x1868   :  { %v2560_v59 = vmul.f32 %v5034_v48, %v2559_v47  ;;  %v2566_v49 = vmul.f32 %v4971_v7, %v2565_v50 }
0x186a   :  { %v3928_v55 = vpack.c.bf16 %v2566_v49, %v2557_v42 }
0x186b   :  { %v2562_v51 = vpop.permute.xlu1 %2561 }
0x186c   :  { %v2563_v46 = vmul.f32 %v4959_v56, %v2562_v51 }
0x186e   :  { %v3925_v54 = vpack.c.bf16 %v2563_v46, %v2560_v59 }
0x186f   :  { %v2568_v58 = vpop.permute.xlu1 %2567 }
0x1870   :  { %3926 = vmatpush3.bf16.msra.mxu0 %v3925_v54  ;;  %v2569_v27 = vmul.f32 %v5053_v37, %v2568_v58 }
0x1871   :  { %3927 = vmatprep.subr.bf16.mxu0 %v4074_v41 }
0x1874   :  { %3929 = vmatpush3.bf16.msra.mxu0 %v3928_v55 }
0x1875   :  { %3584 = vmatprep.subr.mxu0 %v4061_v13 }
0x1878   :  { %3585 = vmatpush3.msra.mxu0 %v2569_v27  ;;  %v2183_v61 = vpop.permute.xlu0 %2182 }
0x1879   :  { %3587 = vmatmul.mubr.msk.f32.vlgmr.msra.gmra.mrb[16].mxu0 %vm2282_vm14, %v2570_v62  ;;  %v3947_v26 = vadd.f32 %v2183_v61, %v4992_v38  ;;  %v2672_v38 = vld [vmem:[%s5146_s2] sm:$0x1] }
0x187b   :  { %v3948_v18 = vadd.f32 %v3947_v26, %v5077_v40 }
0x1880   :  { %v2573_v23 = vpop.permute.xlu1 %2572 }
0x1881   :  { %v3949_v6 = vadd.f32 %v3948_v18, %v2573_v23 }
0x194c   :  { %v2644_v52 = vpop.f32.mrb[16].mxu0 }
0x194d   :  { %v3950_v10 = vadd.f32 %v3949_v6, %v2644_v52  ;;  %v3588_v11 = vpop.f32.mrb[17].mxu0 }
0x194f   :  { %vm2650_vm13 = vcmp.gt.f32.partialorder %v3950_v10, 0.0  ;;  %v2651_v12 = vmul.f32 0.1, %v3950_v10 }
0x1951   :  { %v2652_v19 = vsel %vm2650_vm13, %v3950_v10, %v2651_v12 }
0x1952   :  { %2656 = vrot.lane.b32.xlu0 %v2652_v19, %s4056_s30  ;;  %2653 = vrot.lane.b32.xlu1 %v2652_v19, %s4054_s28 }
0x1956   :  { %2662 = vrot.lane.b32.xlu0 %v2652_v19, %s4057_s1  ;;  %2659 = vrot.lane.b32.xlu1 %v2652_v19, %s4055_s29 }
0x195a   :  { %2668 = vrot.lane.b32.xlu0 %v2652_v19, %s4059_s4  ;;  %2665 = vrot.lane.b32.xlu1 %v2652_v19, %s4058_s0 }
0x195e   :  { %2675 = vperm.xlu1 %4021, %v2672_v38  }
0x19c4   :  { %v2657_v53 = vpop.permute.xlu0 %2656  ;;  %v2654_v45 = vpop.permute.xlu1 %2653 }
0x19c5   :  { %v2658_v30 = vmul.f32 %v5034_v48, %v2657_v53  ;;  %v2655_v57 = vmul.f32 %v5006_v15, %v2654_v45  ;;  %v2671_v15 = vld [vmem:[#allocation2 + $0x110] sm:$0x1] }
0x19c7   :  { %v3931_v33 = vpack.c.bf16 %v2658_v30, %v2655_v57 }
0x19c8   :  { %v2660_v34 = vpop.permute.xlu1 %2659  ;;  %v2663_v17 = vpop.permute.xlu0 %2662 }
0x19c9   :  { %v2661_v39 = vmul.f32 %v4959_v56, %v2660_v34  ;;  %3932 = vmatpush3.bf16.msra.mxu1 %v3931_v33  ;;  %v2664_v36 = vmul.f32 %v4971_v7, %v2663_v17 }
0x19ca   :  { %3933 = vmatprep.subr.bf16.mxu1 %v4074_v41 }
0x19cb   :  { %v3934_v40 = vpack.c.bf16 %v2652_v19, %v2661_v39 }
0x19cc   :  { %v2666_v22 = vpop.permute.xlu1 %2665  ;;  %v2669_v20 = vpop.permute.xlu0 %2668 }
0x19cd   :  { %v2667_v14 = vmul.f32 %v5053_v37, %v2666_v22  ;;  %3935 = vmatpush3.bf16.msra.mxu1 %v3934_v40  ;;  %v2670_v56 = vmul.f32 %v5014_v25, %v2669_v20 }
0x19ce   :  { %3936 = vmatprep.subr.bf16.mxu1 %v4074_v41 }
0x19cf   :  { %v3937_v48 = vpack.c.bf16 %v2667_v14, %v2664_v36 }
0x19d1   :  { %3938 = vmatpush3.bf16.msra.mxu1 %v3937_v48 }
0x19d2   :  { %3601 = vmatprep.subr.mxu1 %v4061_v13 }
0x19d5   :  { %3602 = vmatpush3.msra.mxu1 %v2670_v56 }
0x19d6   :  { %3604 = vmatmul.mubr.msk.f32.vlgmr.msra.gmra.mrb[22].mxu1 %vm5251_vm5, %v2671_v15 }
0x19dd   :  { %v2676_v16 = vpop.permute.xlu1 %2675 }
0x1aa9   :  { %v2747_v43 = vpop.f32.mrb[22].mxu1 }
0x1aaa   :  { %v3605_v2 = vpop.f32.mrb[23].mxu1  ;;  %v2748_v7 = vadd.f32 %v2747_v43, %v2676_v16 }
0x1aac   :  { %4023 = vtanh.f32 %v2748_v7 }
0x1ab6   :  { %v4024_v37 = vpop.eup %4023 }
0x1ab7   :  { %2752 = vst [vmem:[%s5147_s3] sm:$0x1] %v4024_v37 }
0x1ab8   :  { %2757 = vsyncpa [#allocation3], 1 }

</bundles_post_ra>
